<compile_context>
chip_gen: v6e
topology: v6e:2x2x1
jax: 0.10.0
libtpu: 0.0.40
codegen_flags: <defaults>
</compile_context>

<pallas_src>
import jax
import jax.numpy as jnp
from jax import lax
from jax.experimental import pallas as pl
from jax.experimental.pallas import tpu as pltpu

IN_FEATURES = 196608   # fixed by the module definition
OUT_FEATURES = 10


def linear_kernel(x_ref, w_ref, b_ref, o_ref):
    """Accumulating x @ W^T over the K (reduction) grid axis.

    x_ref: (B, tk)   f32
    w_ref: (N, tk)   f32  (native PyTorch Linear weight layout, K-slab)
    b_ref: (1, N)    f32
    o_ref: (B, N)    f32  (resident across all k steps -> accumulator)
    """
    k = pl.program_id(0)

    @pl.when(k == 0)
    def _():
        o_ref[...] = jnp.zeros_like(o_ref)

    # (B, tk) . (N, tk) contracting on axis 1 of both -> (B, N)
    o_ref[...] += lax.dot_general(
        x_ref[...],
        w_ref[...],
        dimension_numbers=(((1,), (1,)), ((), ())),
        preferred_element_type=jnp.float32,
    )

    @pl.when(k == pl.num_programs(0) - 1)
    def _():
        o_ref[...] = o_ref[...] + b_ref[...]


def linear_pallas(x, weight, bias, *, tk=32768):
    """x: (B, K) f32, weight: (N, K) f32, bias: (N,) f32 -> (B, N) f32."""
    B, K = x.shape
    N, K2 = weight.shape
    assert K == K2, "weight in_features mismatch"
    assert K % tk == 0, "tk must divide K (196608 = 6 * 32768)"

    b2 = bias.reshape(1, N)  # (1, N) for in-kernel broadcast

    grid = (K // tk,)
    return pl.pallas_call(
        linear_kernel,
        out_shape=jax.ShapeDtypeStruct((B, N), x.dtype),
        grid_spec=pltpu.PrefetchScalarGridSpec(
            num_scalar_prefetch=0,
            grid=grid,
            in_specs=[
                # x tile: full (small) batch, one K-slab per grid step
                pl.BlockSpec((B, tk), lambda k: (0, k)),
                # weight tile: full (small) N, matching K-slab; K on lanes
                pl.BlockSpec((N, tk), lambda k: (0, k)),
                # bias: same tiny block every step
                pl.BlockSpec((1, N), lambda k: (0, 0)),
            ],
            # output block identical for all k -> stays resident (accumulator)
            out_specs=pl.BlockSpec((B, N), lambda k: (0, 0)),
        ),
        compiler_params=pltpu.CompilerParams(
            dimension_semantics=("arbitrary",),
        ),
    )(x, weight, b2)


if __name__ == "__main__":
    key = jax.random.PRNGKey(0)
    kx, kw, kb = jax.random.split(key, 3)

    B = 2
    # Deterministic PyTorch-style init: uniform(-1/sqrt(K), 1/sqrt(K))
    bound = 1.0 / (IN_FEATURES ** 0.5)
    weight = jax.random.uniform(
        kw, (OUT_FEATURES, IN_FEATURES), jnp.float32, -bound, bound
    )
    bias = jax.random.uniform(kb, (OUT_FEATURES,), jnp.float32, -bound, bound)

    x = jax.random.normal(kx, (B, IN_FEATURES), jnp.float32)

    out = linear_pallas(x, weight, bias)
    out = jax.block_until_ready(out)

    # sanity check against plain JAX reference
    ref = x @ weight.T + bias
    assert out.shape == (B, OUT_FEATURES)
    assert jnp.allclose(out, ref, atol=2e-3, rtol=2e-3)

    print("KERNEL_OK")
</pallas_src>

<mosaic_0001>
module attributes {stable_mosaic.version = 11 : i64} {
  func.func @linear_kernel(%arg0: i32, %arg1: memref<2x32768xf32, #tpu.memory_space<vmem>>, %arg2: memref<10x32768xf32, #tpu.memory_space<vmem>>, %arg3: memref<1x10xf32, #tpu.memory_space<vmem>>, %arg4: memref<2x10xf32, #tpu.memory_space<vmem>>) attributes {dimension_semantics = [#tpu.dimension_semantics<arbitrary>], iteration_bounds = array<i64: 6>, scalar_prefetch = 0 : i64, scratch_operands = 0 : i64, tpu.core_type = #tpu.core_type<tc>, window_params = [{transform_indices = @transform_0, window_bounds = array<i64: 2, 32768>}, {transform_indices = @transform_1, window_bounds = array<i64: 10, 32768>}, {pipeline_mode = #tpu.pipeline_mode<synchronous>, transform_indices = @transform_2, window_bounds = array<i64: 1, 10>}, {pipeline_mode = #tpu.pipeline_mode<synchronous>, transform_indices = @transform_3, window_bounds = array<i64: 2, 10>}]} {
    %c0_i32 = arith.constant 0 : i32
    %0 = arith.cmpi eq, %arg0, %c0_i32 : i32
    %1 = arith.extui %0 : i1 to i32
    %c0_i32_0 = arith.constant 0 : i32
    %2 = arith.cmpi ne, %1, %c0_i32_0 : i32
    scf.if %2 {
      %cst_9 = arith.constant 0.000000e+00 : f32
      %12 = vector.broadcast %cst_9 : f32 to vector<2x10xf32>
      %c0_10 = arith.constant 0 : index
      %c0_11 = arith.constant 0 : index
      %13 = vector.load %arg4[%c0_10, %c0_11] : memref<2x10xf32, #tpu.memory_space<vmem>>, vector<2x10xf32>
      tpu.vector_store %arg4[%c0_10, %c0_11], %12 {strides = array<i32>} : memref<2x10xf32, #tpu.memory_space<vmem>>, vector<2x10xf32>,
    } else {
    }
    %c0 = arith.constant 0 : index
    %c0_1 = arith.constant 0 : index
    %3 = vector.load %arg4[%c0, %c0_1] : memref<2x10xf32, #tpu.memory_space<vmem>>, vector<2x10xf32>
    %c0_2 = arith.constant 0 : index
    %c0_3 = arith.constant 0 : index
    %4 = vector.load %arg1[%c0_2, %c0_3] : memref<2x32768xf32, #tpu.memory_space<vmem>>, vector<2x32768xf32>
    %c0_4 = arith.constant 0 : index
    %c0_5 = arith.constant 0 : index
    %5 = vector.load %arg2[%c0_4, %c0_5] : memref<10x32768xf32, #tpu.memory_space<vmem>>, vector<10x32768xf32>
    %cst = arith.constant dense<0.000000e+00> : vector<2x10xf32>
    %6 = tpu.matmul %4, %5, %cst {dimension_numbers = #tpu.dot_dimension_numbers<[1], [1], [0], [0], [0, 0, 1, 0], [], []>} : vector<2x32768xf32>, vector<10x32768xf32>, vector<2x10xf32> -> vector<2x10xf32>
    %7 = arith.addf %3, %6 : vector<2x10xf32>
    %c0_6 = arith.constant 0 : index
    %c0_7 = arith.constant 0 : index
    %8 = vector.load %arg4[%c0_6, %c0_7] : memref<2x10xf32, #tpu.memory_space<vmem>>, vector<2x10xf32>
    tpu.vector_store %arg4[%c0_6, %c0_7], %7 {strides = array<i32>} : memref<2x10xf32, #tpu.memory_space<vmem>>, vector<2x10xf32>,
    %c5_i32 = arith.constant 5 : i32
    %9 = arith.cmpi eq, %arg0, %c5_i32 : i32
    %10 = arith.extui %9 : i1 to i32
    %c0_i32_8 = arith.constant 0 : i32
    %11 = arith.cmpi ne, %10, %c0_i32_8 : i32
    scf.if %11 {
      %c0_9 = arith.constant 0 : index
      %c0_10 = arith.constant 0 : index
      %12 = vector.load %arg4[%c0_9, %c0_10] : memref<2x10xf32, #tpu.memory_space<vmem>>, vector<2x10xf32>
      %c0_11 = arith.constant 0 : index
      %c0_12 = arith.constant 0 : index
      %13 = vector.load %arg3[%c0_11, %c0_12] : memref<1x10xf32, #tpu.memory_space<vmem>>, vector<1x10xf32>
      %14 = vector.broadcast %13 : vector<1x10xf32> to vector<2x10xf32>
      %15 = arith.addf %12, %14 : vector<2x10xf32>
      %c0_13 = arith.constant 0 : index
      %c0_14 = arith.constant 0 : index
      %16 = vector.load %arg4[%c0_13, %c0_14] : memref<2x10xf32, #tpu.memory_space<vmem>>, vector<2x10xf32>
      tpu.vector_store %arg4[%c0_13, %c0_14], %15 {strides = array<i32>} : memref<2x10xf32, #tpu.memory_space<vmem>>, vector<2x10xf32>,
    } else {
    }
    return
  }
  func.func @transform_0(%arg0: i32) -> (i32, i32) {
    %c0_i32 = arith.constant 0 : i32
    %c0_i32_0 = arith.constant 0 : i32
    return %c0_i32, %arg0 : i32, i32
  }
  func.func @transform_1(%arg0: i32) -> (i32, i32) {
    %c0_i32 = arith.constant 0 : i32
    %c0_i32_0 = arith.constant 0 : i32
    return %c0_i32, %arg0 : i32, i32
  }
  func.func @transform_2(%arg0: i32) -> (i32, i32) {
    %c0_i32 = arith.constant 0 : i32
    %c0_i32_0 = arith.constant 0 : i32
    %c0_i32_1 = arith.constant 0 : i32
    return %c0_i32, %c0_i32_0 : i32, i32
  }
  func.func @transform_3(%arg0: i32) -> (i32, i32) {
    %c0_i32 = arith.constant 0 : i32
    %c0_i32_0 = arith.constant 0 : i32
    %c0_i32_1 = arith.constant 0 : i32
    return %c0_i32, %c0_i32_0 : i32, i32
  }
}

</mosaic_0001>

<bundles_post_ra>
// kernel: tpu_custom_call.1
= control target key start
LH: loop header
LB: loop body
LE: loop exit
PB: predicated region body
PF: predicated region fallthrough
CT: control target
= control target key end

     0   :  { %8 = vsyncpa [#allocation3], 0  ;;  %s12532_s0 = inlined_call_operand.hbm [shape: f32[2,196608], index: 0, kind: input, shape index: {}]   ;;  %s12533_s1 = inlined_call_operand.hbm [shape: f32[10,196608], index: 1, kind: input, shape index: {}]   ;;  %s12534_s2 = inlined_call_operand.hbm [shape: f32[1,10], index: 2, kind: input, shape index: {}]   ;;  %s12535_s3 = inlined_call_operand.hbm [shape: f32[2,10], index: 3, kind: output, shape index: {}]  }
   0x1   :  { %10 = vsyncpa [#allocation3 + $0x1], 0 }
   0x2   :  { %11 = vsyncpa [#allocation6], 0 }
   0x3   :  { %13 = vsyncpa [#allocation6 + $0x1], 0 }
   0x4   :  { %14 = vsyncpa [#allocation4], 0  ;;  %s11623_s12 = smov 0   ;;  %s11625_s13 = smov 0  }
   0x5   :  { %s11627_s14 = smov 0   ;;  %s11629_s15 = smov 0  }
   0x6 LB: > { %s11642_s16 = sadd.s32 4294967295, %s11592_s15   ;;  %s11645_s17 = sadd.s32 1, %s11592_s15   ;;  %s11592_s15 = sphi %s11629_s15, %s12551_s15   ;;  %s11588_s14 = sphi %s11627_s14, %s12550_s14   ;;  %s11584_s13 = sphi %s11625_s13, %s12549_s13   ;;  %s11580_s12 = sphi %s11623_s12, %s12548_s12  }
   0x7   : > { %s24_s18 = ssub.s32 %s11592_s15, %s11645_s17  ;;  %s27_s19 = sadd.s32 1, %s11588_s14 }
   0x8   : > { %p25_p0 = scmp.eq.s32.totalorder %s24_s18, 0  ;;  %p34_p1 = scmp.ne.s32.totalorder %s11588_s14, %s11584_s13 }
   0x9   : > { %p40_p2 = scmp.ne.s32.totalorder %s11584_s13, %s11580_s12  ;;  %p12536_p3 = scmp.eq.s32.totalorder %s11642_s16, 0 }
   0xa   : > { %s11655_s20 = scalar_select %p25_p0, %s11588_s14, %s27_s19  }
   0xb   : > { %p11659_p4 = por %p12536_p3, %p40_p2  ;;  %p11287_p5 = scmp.ge.s32.totalorder %s11592_s15, 1 }
   0xc   : > { %p119_p6 = scmp.lt.s32.totalorder %s11592_s15, 7  ;;  %s11594_s23 = smov [#allocation7]  }
   0xd   : > { %s12538_s21 = scalar_select %p11659_p4, 1, 0 }
   0xe   : > { %p11666_p8 = pnand %p11287_p5, %p119_p6  ;;  %s132_s24 = sshll.u32 %s11594_s23, 4  ;;  %s133_s24 = int_to_ptr.vmem [resolvable:$true] %s132_s24 }
   0xf   : > { %p35_p9 = scmp.eq.s32.totalorder %s11592_s15, 0  ;;  %s11682_s26 = sand.u32 1, %s11588_s14  }
  0x10   : > { %p11321_p10 = pneg %p11666_p8  ;;  %s11290_s28 = sshll.u32 %s11682_s26, 9 }
  0x11   : > { %p11677_p12 = por %p35_p9, %p34_p1  ;;  %s11307_s29 = sshll.u32 %s11592_s15, 13 }
  0x12   : > { %p11686_p13 = pnand %p11321_p10, %p12536_p3  ;;  %s11451_s30 = scalar_lea.vmem %s133_s24, 16 }
  0x13   : > { %p11452_p2 = scmp.ne.s32.totalorder %s133_s24, %s11451_s30  ;;  %s11458_s4 = scalar_lea.vmem %s133_s24, 32 }
  0x14   : > { %p11442_p0 = pneg %p11686_p13  ;;  %p11459_p6 = scmp.lt.s32.totalorder %s133_s24, %s133_s24 }
  0x15   : > { %p11460_p9 = scmp.lt.s32.totalorder %s11458_s4, %s11451_s30 }
  0x16   : > { %p11454_p5 = pnand %p11452_p2, %p11442_p0 }
  0x17   : > { %p11461_p7 = por %p11460_p9, %p11459_p6 }
  0x18   : > { %p11455_p1 = pneg %p11454_p5 }
  0x1a   : > { %p11462_p11 = pnand %p11461_p7, %p11455_p1 }
  0x1c   : > { %11465 = shalt.err (!%p11462_p11)
}
  0x1d   : > { %11324 = dma.hbm_to_vmem [thread:$0]  (!%p11686_p13), %s12534_s2, 16, %s133_s24, [#allocation6]  }
  0x1e   : > { %s11702_s9 = scalar_lea.hbm %s12532_s0, %s11307_s29  ;;  %s147_s10 = scalar_lea.vmem [#allocation2], %s11290_s28 }
  0x1f   : > { %s155_s11 = sshll.u32 %s147_s10, 4  ;;  %p12542_p7 = scmp.lt.s32.totalorder %s11592_s15, 6  ;;  %s11704_s11 = int_to_ptr.vmem [resolvable:$true] %s155_s11 }
  0x20   : > { %s11293_s18 = sshll.u32 %s11682_s26, 12  ;;  %s162_s19 = sand.u32 1, %s11592_s15  }
  0x21   : > { %p11710_p10 = pnand %p12542_p7, %p11677_p12  ;;  %s144_s23 = scalar_lea.sflag [#allocation3], %s11682_s26 }
  0x22   : > { %s11466_s24 = scalar_lea.hbm %s11702_s9, 8192  ;;  %s11471_s28 = scalar_lea.hbm %s12532_s0, 49152 }
  0x23   : > { %p11467_p11 = scmp.ne.s32.totalorder %s11702_s9, %s11466_s24  ;;  %p11468_p13 = pneg %p11710_p10 }
  0x24   : > { %p11472_p12 = scmp.lt.s32.totalorder %s11702_s9, %s12532_s0  ;;  %p11473_p5 = scmp.lt.s32.totalorder %s11471_s28, %s11466_s24 }
  0x25   : > { %p11469_p0 = pnand %p11468_p13, %p11467_p11 }
  0x26   : > { %p11474_p1 = por %p11473_p5, %p11472_p12 }
  0x27   : > { %p11470_p2 = pneg %p11469_p0 }
  0x29   : > { %p11475_p6 = pnand %p11474_p1, %p11470_p2 }
  0x2b   : > { %11478 = shalt.err (!%p11475_p6)
}
  0x2c   : > { %s11479_s4 = scalar_lea.vmem %s11704_s11, 8192  ;;  %s11595_s5 = smov [#allocation2]  }
  0x2d   : > { %p11480_p9 = scmp.ne.s32.totalorder %s11704_s11, %s11479_s4  ;;  %s11484_s6 = sshll.u32 %s11595_s5, 4  ;;  %s11485_s6 = int_to_ptr.vmem [resolvable:$false] %s11484_s6 }
  0x2e   : > { %s11486_s7 = scalar_lea.vmem %s11485_s6, 16384  ;;  %p11487_p0 = scmp.lt.s32.totalorder %s11704_s11, %s11485_s6 }
  0x2f   : > { %p11482_p7 = pnand %p11480_p9, %p11468_p13  ;;  %p11488_p3 = scmp.lt.s32.totalorder %s11486_s7, %s11479_s4 }
  0x31   : > { %p11483_p11 = pneg %p11482_p7  ;;  %p11489_p4 = por %p11488_p3, %p11487_p0 }
  0x33   : > { %p11490_p12 = pnand %p11489_p4, %p11483_p11 }
  0x35   : > { %11493 = shalt.err (!%p11490_p12)
}
  0x36   : > { %11328 = dma.hbm_to_vmem [thread:$0]  (!%p11710_p10), %s11702_s9, 8192, %s11704_s11, %s144_s23  }
  0x37   : > { %s166_s8 = scalar_lea.vmem [#allocation5], %s11293_s18  ;;  %s11308_s24 = sshll.u32 %s11592_s15, 15 }
  0x38   : > { %s173_s10 = sshll.u32 %s166_s8, 4  ;;  %s11749_s28 = scalar_lea.hbm %s12533_s1, %s11308_s24  ;;  %s11743_s10 = int_to_ptr.vmem [resolvable:$true] %s173_s10 }
  0x39   : > { %s11753_s29 = scalar_lea.sflag [#allocation6], %s162_s19  ;;  %s11494_s30 = scalar_lea.hbm %s11749_s28, 65536 }
  0x3a   : > { %p11495_p3 = scmp.ne.s32.totalorder %s11749_s28, %s11494_s30  ;;  %s11499_s11 = scalar_lea.hbm %s12533_s1, 393216 }
  0x3b   : > { %p11500_p5 = scmp.lt.s32.totalorder %s11749_s28, %s12533_s1  ;;  %p11501_p1 = scmp.lt.s32.totalorder %s11499_s11, %s11494_s30 }
  0x3c   : > { %p11497_p4 = pnand %p11495_p3, %p11468_p13 }
  0x3d   : > { %p11502_p6 = por %p11501_p1, %p11500_p5 }
  0x3e   : > { %p11498_p2 = pneg %p11497_p4 }
  0x40   : > { %p11503_p9 = pnand %p11502_p6, %p11498_p2 }
  0x42   : > { %11506 = shalt.err (!%p11503_p9)
}
  0x43   : > { %s11507_s15 = scalar_lea.vmem %s11743_s10, 65536  ;;  %s11596_s19 = smov [#allocation5]  }
  0x44   : > { %p11508_p7 = scmp.ne.s32.totalorder %s11743_s10, %s11507_s15  ;;  %s11512_s4 = sshll.u32 %s11596_s19, 4  ;;  %s11513_s4 = int_to_ptr.vmem [resolvable:$false] %s11512_s4 }
  0x45   : > { %s11514_s5 = scalar_lea.vmem %s11513_s4, 131072  ;;  %p11515_p12 = scmp.lt.s32.totalorder %s11743_s10, %s11513_s4 }
  0x46   : > { %p11510_p11 = pnand %p11508_p7, %p11468_p13  ;;  %p11516_p3 = scmp.lt.s32.totalorder %s11514_s5, %s11507_s15 }
  0x48   : > { %p11511_p0 = pneg %p11510_p11  ;;  %p11517_p4 = por %p11516_p3, %p11515_p12 }
  0x4a   : > { %p11518_p5 = pnand %p11517_p4, %p11511_p0 }
  0x4c   : > { %11521 = shalt.err (!%p11518_p5)
}
  0x4d   : > { %s11597_s6 = smov 196608   ;;  %s11598_s7 = smov 32768  }
  0x4e   : > { %s11599_s8 = smov 2048   ;;  %185 = sbr.rel (%p11666_p8) target bundleno = 841 (0x349), region = 32 }
  0x4f   : > { %11331 = dma.hbm_to_vmem [thread:$0]  (!%p11710_p10), %s11749_s28, 65536, %s11743_s10, %s11753_s29, %s11597_s6, %s11598_s7, %s11599_s8  }
  0x50   : > { %s187_s24 = sand.u32 (!%p11666_p8), 1, %s11584_s13   ;;  %p12544_p13 = scmp.ne.s32.totalorder (!%p11666_p8), %s12538_s21, 0 }
  0x51   : > { %s11297_s27 = sshll.u32 (!%p11666_p8), %s187_s24, 9  ;;  %s188_s25 = scalar_lea.sflag (!%p11666_p8), [#allocation3], %s187_s24 }
  0x52   : > { %s11781_s30 = scalar_lea.vmem (!%p11666_p8), [#allocation2], %s11297_s27 }
  0x53   : > { %11563 = dma.done.wait (%p12544_p13), %s188_s25, 8192  }
  0x54   : > { %11565 = vsyncadd (%p12544_p13), %s188_s25, 4294959104  ;;  %s196_s26 = sand.u32 1, %s11642_s16   ;;  %s11298_s12 = sshll.u32 %s187_s24, 12 }
  0x55   : > { %s197_s10 = scalar_lea.sflag [#allocation6], %s196_s26  ;;  %s11788_s28 = scalar_lea.vmem [#allocation5], %s11298_s12 }
  0x56   : > { %11567 = dma.done.wait (%p12544_p13), %s197_s10, 65536  }
  0x57   : > { %11569 = vsyncadd (%p12544_p13), %s197_s10, 4294901760  ;;  %p12545_p8 = scmp.eq.s32.totalorder %s11642_s16, 0 }
  0x59   : > { %11571 = dma.done.wait (%p12545_p8), [#allocation6], 16   ;;  %p12546_p10 = pmov %p12545_p8 }
  0x5a   : > { %p12547_p2 = scmp.ne.s32.totalorder %s11642_s16, 0 }
  0x5b   : > { %11573 = vsyncadd (%p12546_p10), [#allocation6], 4294967280 }
  0x5c   : > { %232 = sbr.rel (%p12547_p2) target bundleno = 99 (0x63), region = 48 }
  0x61   : > { %vm233_vm0 = vcmask 74752   ;;  %v11600_v0 = vmov 0.0  }
  0x62   : > { %234 = vst.msk [vmem:[#allocation8] sm:$0x3] %vm233_vm0, %v11600_v0 }
  0x63 PF: > { %v557_v1 = vld [vmem:[%s11788_s28 + $0x808] sm:$0x3]  ;;  %v559_v2 = vld [vmem:[%s11788_s28 + $0x818] sm:$0x3]  ;;  %v556_v3 = vld [vmem:[%s11788_s28 + $0x800] sm:$0x3]  ;;  %v880_v4 = vlaneseq }
  0x64   : > { %2248 = vmatprep.subr.mxu0 %v557_v1  ;;  %2318 = vmatprep.subr.mxu1 %v559_v2  ;;  %v558_v5 = vld [vmem:[%s11788_s28 + $0x810] sm:$0x3]  ;;  %v301_v6 = vld [vmem:[%s11788_s28 + $0x8] sm:$0xff]  ;;  %v303_v7 = vld [vmem:[%s11788_s28 + $0x18] sm:$0xff]  ;;  %v11601_v9 = vmov 1983009808  }
  0x65   : > { %2249 = vmatpush1.xpose.msra.mxu0 %v556_v3  ;;  %2319 = vmatpush1.xpose.msra.mxu1 %v558_v5  ;;  %v236_v8 = vld [vmem:[%s11781_s30] sm:$0xff]  ;;  %v878_v10 = vunpack.c.l.s4 %v11601_v9  ;;  %v881_v11 = vshrl.u32 %v880_v4, 7  ;;  %v302_v13 = vld [vmem:[%s11788_s28 + $0x10] sm:$0xff]  ;;  %v561_v16 = vld [vmem:[%s11788_s28 + $0x828] sm:$0x3]  ;;  %vm11181_vm1 = vcmask 74752  }
  0x66   : > { %2250 = vmatprep.subr.mxu0 %v301_v6  ;;  %2320 = vmatprep.subr.mxu1 %v303_v7  ;;  %v300_v12 = vld [vmem:[%s11788_s28] sm:$0xff]  ;;  %v876_v15 = vcombine.high %v236_v8, %v236_v8  ;;  %v563_v17 = vld [vmem:[%s11788_s28 + $0x838] sm:$0x3]  ;;  %v237_v18 = vld [vmem:[%s11781_s30 + $0x8] sm:$0xff]  ;;  %p11301_p1 = scmp.ne.s32.totalorder %s11642_s16, 5 }
  0x67   : > { %v879_v14 = vunpack.c.0.s8 %v878_v10  ;;  %v893_v20 = vcombine.high %v237_v18, %v237_v18  ;;  %v238_v25 = vld [vmem:[%s11781_s30 + $0x10] sm:$0xff]  ;;  %v560_v28 = vld [vmem:[%s11788_s28 + $0x820] sm:$0x3]  ;;  %v305_v30 = vld [vmem:[%s11788_s28 + $0x28] sm:$0xff] }
  0x68   : > { %v562_v29 = vld [vmem:[%s11788_s28 + $0x830] sm:$0x3]  ;;  %v307_v31 = vld [vmem:[%s11788_s28 + $0x38] sm:$0xff]  ;;  %v910_v34 = vcombine.high %v238_v25, %v238_v25  ;;  %v304_v35 = vld [vmem:[%s11788_s28 + $0x20] sm:$0xff] }
  0x69   : > { %2251 = vmatpush1.xpose.msra.mxu0 %v300_v12  ;;  %2321 = vmatpush1.xpose.msra.mxu1 %v302_v13  ;;  %v11812_v19 = vsub.s32 %v879_v14, %v881_v11  ;;  %v306_v36 = vld [vmem:[%s11788_s28 + $0x30] sm:$0xff]  ;;  %v565_v37 = vld [vmem:[%s11788_s28 + $0x848] sm:$0x3]  ;;  %v567_v38 = vld [vmem:[%s11788_s28 + $0x858] sm:$0x3] }
  0x6a   : > { %2388 = vmatprep.subr.mxu0 %v561_v16  ;;  %2458 = vmatprep.subr.mxu1 %v563_v17  ;;  %v239_v41 = vld [vmem:[%s11781_s30 + $0x18] sm:$0xff]  ;;  %v564_v42 = vld [vmem:[%s11788_s28 + $0x840] sm:$0x3]  ;;  %v566_v43 = vld [vmem:[%s11788_s28 + $0x850] sm:$0x3] }
  0x6b   : > { %v883_v21 = vrot.slane %v236_v8, %v11812_v19  ;;  %v890_v22 = vrot.slane %v876_v15, %v11812_v19  ;;  %v900_v23 = vrot.slane %v237_v18, %v11812_v19  ;;  %v907_v24 = vrot.slane %v893_v20, %v11812_v19  ;;  %v309_v44 = vld [vmem:[%s11788_s28 + $0x48] sm:$0xff]  ;;  %v311_v45 = vld [vmem:[%s11788_s28 + $0x58] sm:$0xff]  ;;  %v308_v49 = vld [vmem:[%s11788_s28 + $0x40] sm:$0xff] }
  0x6c   : > { %v917_v39 = vrot.slane %v238_v25, %v11812_v19  ;;  %v924_v40 = vrot.slane %v910_v34, %v11812_v19  ;;  %v927_v48 = vcombine.high %v239_v41, %v239_v41  ;;  %v310_v50 = vld [vmem:[%s11788_s28 + $0x50] sm:$0xff]  ;;  %v569_v51 = vld [vmem:[%s11788_s28 + $0x868] sm:$0x3]  ;;  %v571_v52 = vld [vmem:[%s11788_s28 + $0x878] sm:$0x3]  ;;  %v934_v53 = vrot.slane %v239_v41, %v11812_v19 }
  0x6d   : > { %v891_v26 = vcombine.high %v883_v21, %v883_v21  ;;  %v892_v27 = vcombine.high %v890_v22, %v890_v22  ;;  %v908_v32 = vcombine.high %v900_v23, %v900_v23  ;;  %v909_v33 = vcombine.high %v907_v24, %v907_v24  ;;  %v240_v55 = vld [vmem:[%s11781_s30 + $0x20] sm:$0xff]  ;;  %v570_v57 = vld [vmem:[%s11788_s28 + $0x870] sm:$0x3]  ;;  %v313_v58 = vld [vmem:[%s11788_s28 + $0x68] sm:$0xff] }
  0x6e   : > { %v925_v46 = vcombine.high %v917_v39, %v917_v39  ;;  %v926_v47 = vcombine.high %v924_v40, %v924_v40  ;;  %v941_v54 = vrot.slane %v927_v48, %v11812_v19  ;;  %v568_v56 = vld [vmem:[%s11788_s28 + $0x860] sm:$0x3]  ;;  %v315_v59 = vld [vmem:[%s11788_s28 + $0x78] sm:$0xff]  ;;  %v942_v60 = vcombine.high %v934_v53, %v934_v53  ;;  %v314_v0 = vld [vmem:[%s11788_s28 + $0x70] sm:$0xff] }
  0x6f   : > { %2284 = vmatprep.mubr.f32.mxu0 %v891_v26  ;;  %2354 = vmatprep.mubr.f32.mxu1 %v892_v27  ;;  %v944_v62 = vcombine.high %v240_v55, %v240_v55  ;;  %v312_v63 = vld [vmem:[%s11788_s28 + $0x60] sm:$0xff]  ;;  %v573_v1 = vld [vmem:[%s11788_s28 + $0x888] sm:$0x3]  ;;  %v575_v2 = vld [vmem:[%s11788_s28 + $0x898] sm:$0x3]  ;;  %v951_v3 = vrot.slane %v240_v55, %v11812_v19 }
  0x70   : > { %2285 = vmatmul.mubr.f32.vlgmr.msra.gmra.mxu0 %v883_v21  ;;  %2355 = vmatmul.mubr.f32.vlgmr.msra.gmra.mxu1 %v890_v22  ;;  %v943_v61 = vcombine.high %v941_v54, %v941_v54  ;;  %v241_v5 = vld [vmem:[%s11781_s30 + $0x28] sm:$0xff]  ;;  %v572_v6 = vld [vmem:[%s11788_s28 + $0x880] sm:$0x3]  ;;  %v574_v7 = vld [vmem:[%s11788_s28 + $0x890] sm:$0x3] }
  0x71   : > { %2389 = vmatpush1.xpose.msra.mxu0 %v560_v28  ;;  %2459 = vmatpush1.xpose.msra.mxu1 %v562_v29  ;;  %v958_v4 = vrot.slane %v944_v62, %v11812_v19  ;;  %v317_v8 = vld [vmem:[%s11788_s28 + $0x88] sm:$0xff]  ;;  %v319_v9 = vld [vmem:[%s11788_s28 + $0x98] sm:$0xff]  ;;  %v959_v10 = vcombine.high %v951_v3, %v951_v3  ;;  %v961_v12 = vcombine.high %v241_v5, %v241_v5  ;;  %v316_v13 = vld [vmem:[%s11788_s28 + $0x80] sm:$0xff] }
  0x72   : > { %2390 = vmatprep.subr.mxu0 %v305_v30  ;;  %2460 = vmatprep.subr.mxu1 %v307_v31  ;;  %v318_v14 = vld [vmem:[%s11788_s28 + $0x90] sm:$0xff]  ;;  %v577_v15 = vld [vmem:[%s11788_s28 + $0x8a8] sm:$0x3]  ;;  %v579_v16 = vld [vmem:[%s11788_s28 + $0x8b8] sm:$0x3]  ;;  %v968_v17 = vrot.slane %v241_v5, %v11812_v19 }
  0x73   : > { %2424 = vmatprep.mubr.f32.mxu0 %v908_v32  ;;  %2494 = vmatprep.mubr.f32.mxu1 %v909_v33  ;;  %v960_v11 = vcombine.high %v958_v4, %v958_v4  ;;  %v975_v18 = vrot.slane %v961_v12, %v11812_v19  ;;  %v242_v20 = vld [vmem:[%s11781_s30 + $0x30] sm:$0xff]  ;;  %v576_v21 = vld [vmem:[%s11788_s28 + $0x8a0] sm:$0x3]  ;;  %v581_v30 = vld [vmem:[%s11788_s28 + $0x8c8] sm:$0x3] }
  0x74   : > { %v578_v22 = vld [vmem:[%s11788_s28 + $0x8b0] sm:$0x3]  ;;  %v976_v25 = vcombine.high %v968_v17, %v968_v17  ;;  %v978_v27 = vcombine.high %v242_v20, %v242_v20  ;;  %v320_v28 = vld [vmem:[%s11788_s28 + $0xa0] sm:$0xff]  ;;  %v583_v31 = vld [vmem:[%s11788_s28 + $0x8d8] sm:$0x3]  ;;  %v985_v32 = vrot.slane %v242_v20, %v11812_v19 }
  0x75   : > { %2391 = vmatpush1.xpose.msra.mxu0 %v304_v35  ;;  %2461 = vmatpush1.xpose.msra.mxu1 %v306_v36  ;;  %v977_v26 = vcombine.high %v975_v18, %v975_v18  ;;  %v322_v29 = vld [vmem:[%s11788_s28 + $0xb0] sm:$0xff]  ;;  %v243_v34 = vld [vmem:[%s11781_s30 + $0x38] sm:$0xff]  ;;  %v580_v35 = vld [vmem:[%s11788_s28 + $0x8c0] sm:$0x3] }
  0x76   : > { %2528 = vmatprep.subr.mxu0 %v565_v37  ;;  %2598 = vmatprep.subr.mxu1 %v567_v38  ;;  %v992_v33 = vrot.slane %v978_v27, %v11812_v19  ;;  %v582_v36 = vld [vmem:[%s11788_s28 + $0x8d0] sm:$0x3]  ;;  %v325_v37 = vld [vmem:[%s11788_s28 + $0xc8] sm:$0xff]  ;;  %v327_v38 = vld [vmem:[%s11788_s28 + $0xd8] sm:$0xff]  ;;  %v995_v41 = vcombine.high %v243_v34, %v243_v34 }
  0x77   : > { %v244_v48 = vld [vmem:[%s11781_s30 + $0x40] sm:$0xff]  ;;  %v245_v62 = vld [vmem:[%s11781_s30 + $0x48] sm:$0xff]  ;;  %v246_v12 = vld [vmem:[%s11781_s30 + $0x50] sm:$0xff] }
  0x78   : > { %2425 = vmatmul.mubr.f32.vlgmr.msra.gmra.mxu0 %v900_v23  ;;  %2495 = vmatmul.mubr.f32.vlgmr.msra.gmra.mxu1 %v907_v24  ;;  %v321_v23 = vld [vmem:[%s11788_s28 + $0xa8] sm:$0xff]  ;;  %v323_v24 = vld [vmem:[%s11788_s28 + $0xb8] sm:$0xff]  ;;  %v1012_v55 = vcombine.high %v244_v48, %v244_v48  ;;  %v1029_v5 = vcombine.high %v245_v62, %v245_v62  ;;  %v1046_v20 = vcombine.high %v246_v12, %v246_v12 }
  0x79   : > { %2529 = vmatpush1.xpose.msra.mxu0 %v564_v42  ;;  %2599 = vmatpush1.xpose.msra.mxu1 %v566_v43  ;;  %v324_v42 = vld [vmem:[%s11788_s28 + $0xc0] sm:$0xff]  ;;  %v326_v43 = vld [vmem:[%s11788_s28 + $0xd0] sm:$0xff]  ;;  %v247_v27 = vld [vmem:[%s11781_s30 + $0x58] sm:$0xff] }
  0x7a   : > { %2530 = vmatprep.subr.mxu0 %v309_v44  ;;  %2600 = vmatprep.subr.mxu1 %v311_v45  ;;  %v585_v44 = vld [vmem:[%s11788_s28 + $0x8e8] sm:$0x3]  ;;  %v587_v45 = vld [vmem:[%s11788_s28 + $0x8f8] sm:$0x3] }
  0x7b   : > { %2564 = vmatprep.mubr.f32.mxu0 %v925_v46  ;;  %2634 = vmatprep.mubr.f32.mxu1 %v926_v47  ;;  %v1002_v46 = vrot.slane %v243_v34, %v11812_v19  ;;  %v1009_v47 = vrot.slane %v995_v41, %v11812_v19  ;;  %v1063_v34 = vcombine.high %v247_v27, %v247_v27  ;;  %v248_v41 = vld [vmem:[%s11781_s30 + $0x60] sm:$0xff] }
  0x7d   : > { %2531 = vmatpush1.xpose.msra.mxu0 %v308_v49  ;;  %2601 = vmatpush1.xpose.msra.mxu1 %v310_v50  ;;  %v584_v49 = vld [vmem:[%s11788_s28 + $0x8e0] sm:$0x3]  ;;  %v586_v50 = vld [vmem:[%s11788_s28 + $0x8f0] sm:$0x3] }
  0x7e   : > { %2668 = vmatprep.subr.mxu0 %v569_v51  ;;  %2738 = vmatprep.subr.mxu1 %v571_v52  ;;  %v329_v51 = vld [vmem:[%s11788_s28 + $0xe8] sm:$0xff]  ;;  %v331_v52 = vld [vmem:[%s11788_s28 + $0xf8] sm:$0xff] }
  0x80   : > { %2565 = vmatmul.mubr.f32.vlgmr.msra.gmra.mxu0 %v917_v39  ;;  %2635 = vmatmul.mubr.f32.vlgmr.msra.gmra.mxu1 %v924_v40  ;;  %v993_v39 = vcombine.high %v985_v32, %v985_v32  ;;  %v994_v40 = vcombine.high %v992_v33, %v992_v33 }
  0x81   : > { %2669 = vmatpush1.xpose.msra.mxu0 %v568_v56  ;;  %2739 = vmatpush1.xpose.msra.mxu1 %v570_v57  ;;  %v328_v56 = vld [vmem:[%s11788_s28 + $0xe0] sm:$0xff]  ;;  %v330_v57 = vld [vmem:[%s11788_s28 + $0xf0] sm:$0xff] }
  0x82   : > { %2670 = vmatprep.subr.mxu0 %v313_v58  ;;  %2740 = vmatprep.subr.mxu1 %v315_v59  ;;  %v589_v58 = vld [vmem:[%s11788_s28 + $0x908] sm:$0x3]  ;;  %v591_v59 = vld [vmem:[%s11788_s28 + $0x918] sm:$0x3] }
  0x83   : > { %2704 = vmatprep.mubr.f32.mxu0 %v942_v60  ;;  %2774 = vmatprep.mubr.f32.mxu1 %v943_v61  ;;  %v1019_v60 = vrot.slane %v244_v48, %v11812_v19  ;;  %v1026_v61 = vrot.slane %v1012_v55, %v11812_v19  ;;  %v1080_v48 = vcombine.high %v248_v41, %v248_v41  ;;  %v249_v55 = vld [vmem:[%s11781_s30 + $0x68] sm:$0xff] }
  0x85   : > { %2671 = vmatpush1.xpose.msra.mxu0 %v312_v63  ;;  %2741 = vmatpush1.xpose.msra.mxu1 %v314_v0  ;;  %v588_v63 = vld [vmem:[%s11788_s28 + $0x900] sm:$0x3]  ;;  %v590_v0 = vld [vmem:[%s11788_s28 + $0x910] sm:$0x3] }
  0x86   : > { %2808 = vmatprep.subr.mxu0 %v573_v1  ;;  %2878 = vmatprep.subr.mxu1 %v575_v2  ;;  %v333_v1 = vld [vmem:[%s11788_s28 + $0x108] sm:$0xff]  ;;  %v335_v2 = vld [vmem:[%s11788_s28 + $0x118] sm:$0xff] }
  0x88   : > { %2705 = vmatmul.mubr.f32.vlgmr.msra.gmra.mxu0 %v934_v53  ;;  %2775 = vmatmul.mubr.f32.vlgmr.msra.gmra.mxu1 %v941_v54  ;;  %v1010_v53 = vcombine.high %v1002_v46, %v1002_v46  ;;  %v1011_v54 = vcombine.high %v1009_v47, %v1009_v47 }
  0x89   : > { %2809 = vmatpush1.xpose.msra.mxu0 %v572_v6  ;;  %2879 = vmatpush1.xpose.msra.mxu1 %v574_v7  ;;  %v332_v6 = vld [vmem:[%s11788_s28 + $0x100] sm:$0xff]  ;;  %v334_v7 = vld [vmem:[%s11788_s28 + $0x110] sm:$0xff] }
  0x8a   : > { %2810 = vmatprep.subr.mxu0 %v317_v8  ;;  %2880 = vmatprep.subr.mxu1 %v319_v9  ;;  %v593_v8 = vld [vmem:[%s11788_s28 + $0x928] sm:$0x3]  ;;  %v595_v9 = vld [vmem:[%s11788_s28 + $0x938] sm:$0x3] }
  0x8b   : > { %2844 = vmatprep.mubr.f32.mxu0 %v959_v10  ;;  %2914 = vmatprep.mubr.f32.mxu1 %v960_v11  ;;  %v1036_v10 = vrot.slane %v245_v62, %v11812_v19  ;;  %v1043_v11 = vrot.slane %v1029_v5, %v11812_v19  ;;  %v1097_v62 = vcombine.high %v249_v55, %v249_v55  ;;  %v250_v5 = vld [vmem:[%s11781_s30 + $0x70] sm:$0xff] }
  0x8d   : > { %2811 = vmatpush1.xpose.msra.mxu0 %v316_v13  ;;  %2881 = vmatpush1.xpose.msra.mxu1 %v318_v14  ;;  %v592_v13 = vld [vmem:[%s11788_s28 + $0x920] sm:$0x3]  ;;  %v594_v14 = vld [vmem:[%s11788_s28 + $0x930] sm:$0x3] }
  0x8e   : > { %2948 = vmatprep.subr.mxu0 %v577_v15  ;;  %3018 = vmatprep.subr.mxu1 %v579_v16  ;;  %v337_v15 = vld [vmem:[%s11788_s28 + $0x128] sm:$0xff]  ;;  %v339_v16 = vld [vmem:[%s11788_s28 + $0x138] sm:$0xff] }
  0x90   : > { %2845 = vmatmul.mubr.f32.vlgmr.msra.gmra.mxu0 %v951_v3  ;;  %2915 = vmatmul.mubr.f32.vlgmr.msra.gmra.mxu1 %v958_v4  ;;  %v1027_v3 = vcombine.high %v1019_v60, %v1019_v60  ;;  %v1028_v4 = vcombine.high %v1026_v61, %v1026_v61 }
  0x91   : > { %2949 = vmatpush1.xpose.msra.mxu0 %v576_v21  ;;  %3019 = vmatpush1.xpose.msra.mxu1 %v578_v22  ;;  %v336_v21 = vld [vmem:[%s11788_s28 + $0x120] sm:$0xff]  ;;  %v338_v22 = vld [vmem:[%s11788_s28 + $0x130] sm:$0xff] }
  0x92   : > { %2950 = vmatprep.subr.mxu0 %v321_v23  ;;  %3020 = vmatprep.subr.mxu1 %v323_v24  ;;  %v597_v23 = vld [vmem:[%s11788_s28 + $0x948] sm:$0x3]  ;;  %v599_v24 = vld [vmem:[%s11788_s28 + $0x958] sm:$0x3] }
  0x93   : > { %2984 = vmatprep.mubr.f32.mxu0 %v976_v25  ;;  %3054 = vmatprep.mubr.f32.mxu1 %v977_v26  ;;  %v1053_v25 = vrot.slane %v246_v12, %v11812_v19  ;;  %v1060_v26 = vrot.slane %v1046_v20, %v11812_v19  ;;  %v1114_v12 = vcombine.high %v250_v5, %v250_v5  ;;  %v251_v20 = vld [vmem:[%s11781_s30 + $0x78] sm:$0xff] }
  0x95   : > { %2951 = vmatpush1.xpose.msra.mxu0 %v320_v28  ;;  %3021 = vmatpush1.xpose.msra.mxu1 %v322_v29  ;;  %v596_v28 = vld [vmem:[%s11788_s28 + $0x940] sm:$0x3]  ;;  %v598_v29 = vld [vmem:[%s11788_s28 + $0x950] sm:$0x3] }
  0x96   : > { %3088 = vmatprep.subr.mxu0 %v581_v30  ;;  %3158 = vmatprep.subr.mxu1 %v583_v31  ;;  %v341_v30 = vld [vmem:[%s11788_s28 + $0x148] sm:$0xff]  ;;  %v343_v31 = vld [vmem:[%s11788_s28 + $0x158] sm:$0xff] }
  0x98   : > { %2985 = vmatmul.mubr.f32.vlgmr.msra.gmra.mxu0 %v968_v17  ;;  %3055 = vmatmul.mubr.f32.vlgmr.msra.gmra.mxu1 %v975_v18  ;;  %v1044_v17 = vcombine.high %v1036_v10, %v1036_v10  ;;  %v1045_v18 = vcombine.high %v1043_v11, %v1043_v11 }
  0x99   : > { %3089 = vmatpush1.xpose.msra.mxu0 %v580_v35  ;;  %3159 = vmatpush1.xpose.msra.mxu1 %v582_v36  ;;  %v340_v35 = vld [vmem:[%s11788_s28 + $0x140] sm:$0xff]  ;;  %v342_v36 = vld [vmem:[%s11788_s28 + $0x150] sm:$0xff] }
  0x9a   : > { %3090 = vmatprep.subr.mxu0 %v325_v37  ;;  %3160 = vmatprep.subr.mxu1 %v327_v38  ;;  %v601_v37 = vld [vmem:[%s11788_s28 + $0x968] sm:$0x3]  ;;  %v603_v38 = vld [vmem:[%s11788_s28 + $0x978] sm:$0x3] }
  0x9b   : > { %3124 = vmatprep.mubr.f32.mxu0 %v993_v39  ;;  %3194 = vmatprep.mubr.f32.mxu1 %v994_v40  ;;  %v1070_v39 = vrot.slane %v247_v27, %v11812_v19  ;;  %v1077_v40 = vrot.slane %v1063_v34, %v11812_v19  ;;  %v1131_v27 = vcombine.high %v251_v20, %v251_v20  ;;  %v252_v34 = vld [vmem:[%s11781_s30 + $0x80] sm:$0xff] }
  0x9d   : > { %3091 = vmatpush1.xpose.msra.mxu0 %v324_v42  ;;  %3161 = vmatpush1.xpose.msra.mxu1 %v326_v43  ;;  %v600_v42 = vld [vmem:[%s11788_s28 + $0x960] sm:$0x3]  ;;  %v602_v43 = vld [vmem:[%s11788_s28 + $0x970] sm:$0x3] }
  0x9e   : > { %3228 = vmatprep.subr.mxu0 %v585_v44  ;;  %3298 = vmatprep.subr.mxu1 %v587_v45  ;;  %v345_v44 = vld [vmem:[%s11788_s28 + $0x168] sm:$0xff]  ;;  %v347_v45 = vld [vmem:[%s11788_s28 + $0x178] sm:$0xff] }
  0xa0   : > { %3125 = vmatmul.mubr.f32.vlgmr.msra.gmra.mxu0 %v985_v32  ;;  %3195 = vmatmul.mubr.f32.vlgmr.msra.gmra.mxu1 %v992_v33  ;;  %v1061_v32 = vcombine.high %v1053_v25, %v1053_v25  ;;  %v1062_v33 = vcombine.high %v1060_v26, %v1060_v26 }
  0xa1   : > { %3229 = vmatpush1.xpose.msra.mxu0 %v584_v49  ;;  %3299 = vmatpush1.xpose.msra.mxu1 %v586_v50  ;;  %v344_v49 = vld [vmem:[%s11788_s28 + $0x160] sm:$0xff]  ;;  %v346_v50 = vld [vmem:[%s11788_s28 + $0x170] sm:$0xff] }
  0xa2   : > { %3230 = vmatprep.subr.mxu0 %v329_v51  ;;  %3300 = vmatprep.subr.mxu1 %v331_v52  ;;  %v605_v51 = vld [vmem:[%s11788_s28 + $0x988] sm:$0x3]  ;;  %v607_v52 = vld [vmem:[%s11788_s28 + $0x998] sm:$0x3] }
  0xa3   : > { %3264 = vmatprep.mubr.f32.mxu0 %v1010_v53  ;;  %3334 = vmatprep.mubr.f32.mxu1 %v1011_v54  ;;  %v1087_v53 = vrot.slane %v248_v41, %v11812_v19  ;;  %v1094_v54 = vrot.slane %v1080_v48, %v11812_v19  ;;  %v1148_v41 = vcombine.high %v252_v34, %v252_v34  ;;  %v253_v48 = vld [vmem:[%s11781_s30 + $0x88] sm:$0xff] }
  0xa5   : > { %3231 = vmatpush1.xpose.msra.mxu0 %v328_v56  ;;  %3301 = vmatpush1.xpose.msra.mxu1 %v330_v57  ;;  %v604_v56 = vld [vmem:[%s11788_s28 + $0x980] sm:$0x3]  ;;  %v606_v57 = vld [vmem:[%s11788_s28 + $0x990] sm:$0x3] }
  0xa6   : > { %3368 = vmatprep.subr.mxu0 %v589_v58  ;;  %3438 = vmatprep.subr.mxu1 %v591_v59  ;;  %v349_v58 = vld [vmem:[%s11788_s28 + $0x188] sm:$0xff]  ;;  %v351_v59 = vld [vmem:[%s11788_s28 + $0x198] sm:$0xff] }
  0xa8   : > { %3265 = vmatmul.mubr.f32.vlgmr.msra.gmra.mxu0 %v1002_v46  ;;  %3335 = vmatmul.mubr.f32.vlgmr.msra.gmra.mxu1 %v1009_v47  ;;  %v1078_v46 = vcombine.high %v1070_v39, %v1070_v39  ;;  %v1079_v47 = vcombine.high %v1077_v40, %v1077_v40 }
  0xa9   : > { %3369 = vmatpush1.xpose.msra.mxu0 %v588_v63  ;;  %3439 = vmatpush1.xpose.msra.mxu1 %v590_v0  ;;  %v348_v63 = vld [vmem:[%s11788_s28 + $0x180] sm:$0xff]  ;;  %v350_v0 = vld [vmem:[%s11788_s28 + $0x190] sm:$0xff] }
  0xaa   : > { %3370 = vmatprep.subr.mxu0 %v333_v1  ;;  %3440 = vmatprep.subr.mxu1 %v335_v2  ;;  %v609_v1 = vld [vmem:[%s11788_s28 + $0x9a8] sm:$0x3]  ;;  %v611_v2 = vld [vmem:[%s11788_s28 + $0x9b8] sm:$0x3] }
  0xab   : > { %3404 = vmatprep.mubr.f32.mxu0 %v1027_v3  ;;  %3474 = vmatprep.mubr.f32.mxu1 %v1028_v4  ;;  %v1104_v3 = vrot.slane %v249_v55, %v11812_v19  ;;  %v1111_v4 = vrot.slane %v1097_v62, %v11812_v19  ;;  %v1165_v55 = vcombine.high %v253_v48, %v253_v48  ;;  %v254_v62 = vld [vmem:[%s11781_s30 + $0x90] sm:$0xff] }
  0xad   : > { %3371 = vmatpush1.xpose.msra.mxu0 %v332_v6  ;;  %3441 = vmatpush1.xpose.msra.mxu1 %v334_v7  ;;  %v608_v6 = vld [vmem:[%s11788_s28 + $0x9a0] sm:$0x3]  ;;  %v610_v7 = vld [vmem:[%s11788_s28 + $0x9b0] sm:$0x3] }
  0xae   : > { %3508 = vmatprep.subr.mxu0 %v593_v8  ;;  %3578 = vmatprep.subr.mxu1 %v595_v9  ;;  %v353_v8 = vld [vmem:[%s11788_s28 + $0x1a8] sm:$0xff]  ;;  %v355_v9 = vld [vmem:[%s11788_s28 + $0x1b8] sm:$0xff] }
  0xb0   : > { %3405 = vmatmul.mubr.f32.vlgmr.msra.gmra.mxu0 %v1019_v60  ;;  %3475 = vmatmul.mubr.f32.vlgmr.msra.gmra.mxu1 %v1026_v61  ;;  %v1095_v60 = vcombine.high %v1087_v53, %v1087_v53  ;;  %v1096_v61 = vcombine.high %v1094_v54, %v1094_v54 }
  0xb1   : > { %3509 = vmatpush1.xpose.msra.mxu0 %v592_v13  ;;  %3579 = vmatpush1.xpose.msra.mxu1 %v594_v14  ;;  %v352_v13 = vld [vmem:[%s11788_s28 + $0x1a0] sm:$0xff]  ;;  %v354_v14 = vld [vmem:[%s11788_s28 + $0x1b0] sm:$0xff] }
  0xb2   : > { %3510 = vmatprep.subr.mxu0 %v337_v15  ;;  %3580 = vmatprep.subr.mxu1 %v339_v16  ;;  %v613_v15 = vld [vmem:[%s11788_s28 + $0x9c8] sm:$0x3]  ;;  %v615_v16 = vld [vmem:[%s11788_s28 + $0x9d8] sm:$0x3] }
  0xb3   : > { %3544 = vmatprep.mubr.f32.mxu0 %v1044_v17  ;;  %3614 = vmatprep.mubr.f32.mxu1 %v1045_v18  ;;  %v1121_v17 = vrot.slane %v250_v5, %v11812_v19  ;;  %v1128_v18 = vrot.slane %v1114_v12, %v11812_v19  ;;  %v1182_v5 = vcombine.high %v254_v62, %v254_v62  ;;  %v255_v12 = vld [vmem:[%s11781_s30 + $0x98] sm:$0xff] }
  0xb5   : > { %3511 = vmatpush1.xpose.msra.mxu0 %v336_v21  ;;  %3581 = vmatpush1.xpose.msra.mxu1 %v338_v22  ;;  %v612_v21 = vld [vmem:[%s11788_s28 + $0x9c0] sm:$0x3]  ;;  %v614_v22 = vld [vmem:[%s11788_s28 + $0x9d0] sm:$0x3] }
  0xb6   : > { %3648 = vmatprep.subr.mxu0 %v597_v23  ;;  %3718 = vmatprep.subr.mxu1 %v599_v24  ;;  %v357_v23 = vld [vmem:[%s11788_s28 + $0x1c8] sm:$0xff]  ;;  %v359_v24 = vld [vmem:[%s11788_s28 + $0x1d8] sm:$0xff] }
  0xb8   : > { %3545 = vmatmul.mubr.f32.vlgmr.msra.gmra.mxu0 %v1036_v10  ;;  %3615 = vmatmul.mubr.f32.vlgmr.msra.gmra.mxu1 %v1043_v11  ;;  %v1112_v10 = vcombine.high %v1104_v3, %v1104_v3  ;;  %v1113_v11 = vcombine.high %v1111_v4, %v1111_v4 }
  0xb9   : > { %3649 = vmatpush1.xpose.msra.mxu0 %v596_v28  ;;  %3719 = vmatpush1.xpose.msra.mxu1 %v598_v29  ;;  %v356_v28 = vld [vmem:[%s11788_s28 + $0x1c0] sm:$0xff]  ;;  %v358_v29 = vld [vmem:[%s11788_s28 + $0x1d0] sm:$0xff] }
  0xba   : > { %3650 = vmatprep.subr.mxu0 %v341_v30  ;;  %3720 = vmatprep.subr.mxu1 %v343_v31  ;;  %v617_v30 = vld [vmem:[%s11788_s28 + $0x9e8] sm:$0x3]  ;;  %v619_v31 = vld [vmem:[%s11788_s28 + $0x9f8] sm:$0x3] }
  0xbb   : > { %3684 = vmatprep.mubr.f32.mxu0 %v1061_v32  ;;  %3754 = vmatprep.mubr.f32.mxu1 %v1062_v33  ;;  %v1138_v32 = vrot.slane %v251_v20, %v11812_v19  ;;  %v1145_v33 = vrot.slane %v1131_v27, %v11812_v19  ;;  %v1199_v20 = vcombine.high %v255_v12, %v255_v12  ;;  %v256_v27 = vld [vmem:[%s11781_s30 + $0xa0] sm:$0xff] }
  0xbd   : > { %3651 = vmatpush1.xpose.msra.mxu0 %v340_v35  ;;  %3721 = vmatpush1.xpose.msra.mxu1 %v342_v36  ;;  %v616_v35 = vld [vmem:[%s11788_s28 + $0x9e0] sm:$0x3]  ;;  %v618_v36 = vld [vmem:[%s11788_s28 + $0x9f0] sm:$0x3] }
  0xbe   : > { %3788 = vmatprep.subr.mxu0 %v601_v37  ;;  %3858 = vmatprep.subr.mxu1 %v603_v38  ;;  %v361_v37 = vld [vmem:[%s11788_s28 + $0x1e8] sm:$0xff]  ;;  %v363_v38 = vld [vmem:[%s11788_s28 + $0x1f8] sm:$0xff] }
  0xc0   : > { %3685 = vmatmul.mubr.f32.vlgmr.msra.gmra.mxu0 %v1053_v25  ;;  %3755 = vmatmul.mubr.f32.vlgmr.msra.gmra.mxu1 %v1060_v26  ;;  %v1129_v25 = vcombine.high %v1121_v17, %v1121_v17  ;;  %v1130_v26 = vcombine.high %v1128_v18, %v1128_v18 }
  0xc1   : > { %3789 = vmatpush1.xpose.msra.mxu0 %v600_v42  ;;  %3859 = vmatpush1.xpose.msra.mxu1 %v602_v43  ;;  %v360_v42 = vld [vmem:[%s11788_s28 + $0x1e0] sm:$0xff]  ;;  %v362_v43 = vld [vmem:[%s11788_s28 + $0x1f0] sm:$0xff] }
  0xc2   : > { %3790 = vmatprep.subr.mxu0 %v345_v44  ;;  %3860 = vmatprep.subr.mxu1 %v347_v45  ;;  %v621_v44 = vld [vmem:[%s11788_s28 + $0xa08] sm:$0x3]  ;;  %v623_v45 = vld [vmem:[%s11788_s28 + $0xa18] sm:$0x3] }
  0xc3   : > { %3824 = vmatprep.mubr.f32.mxu0 %v1078_v46  ;;  %3894 = vmatprep.mubr.f32.mxu1 %v1079_v47  ;;  %v1155_v46 = vrot.slane %v252_v34, %v11812_v19  ;;  %v1162_v47 = vrot.slane %v1148_v41, %v11812_v19  ;;  %v1216_v34 = vcombine.high %v256_v27, %v256_v27  ;;  %v257_v41 = vld [vmem:[%s11781_s30 + $0xa8] sm:$0xff] }
  0xc5   : > { %3791 = vmatpush1.xpose.msra.mxu0 %v344_v49  ;;  %3861 = vmatpush1.xpose.msra.mxu1 %v346_v50  ;;  %v620_v49 = vld [vmem:[%s11788_s28 + $0xa00] sm:$0x3]  ;;  %v622_v50 = vld [vmem:[%s11788_s28 + $0xa10] sm:$0x3] }
  0xc6   : > { %3928 = vmatprep.subr.mxu0 %v605_v51  ;;  %3998 = vmatprep.subr.mxu1 %v607_v52  ;;  %v365_v51 = vld [vmem:[%s11788_s28 + $0x208] sm:$0xff]  ;;  %v367_v52 = vld [vmem:[%s11788_s28 + $0x218] sm:$0xff] }
  0xc8   : > { %3825 = vmatmul.mubr.f32.vlgmr.msra.gmra.mxu0 %v1070_v39  ;;  %3895 = vmatmul.mubr.f32.vlgmr.msra.gmra.mxu1 %v1077_v40  ;;  %v1146_v39 = vcombine.high %v1138_v32, %v1138_v32  ;;  %v1147_v40 = vcombine.high %v1145_v33, %v1145_v33 }
  0xc9   : > { %3929 = vmatpush1.xpose.msra.mxu0 %v604_v56  ;;  %3999 = vmatpush1.xpose.msra.mxu1 %v606_v57  ;;  %v364_v56 = vld [vmem:[%s11788_s28 + $0x200] sm:$0xff]  ;;  %v366_v57 = vld [vmem:[%s11788_s28 + $0x210] sm:$0xff] }
  0xca   : > { %3930 = vmatprep.subr.mxu0 %v349_v58  ;;  %4000 = vmatprep.subr.mxu1 %v351_v59  ;;  %v625_v58 = vld [vmem:[%s11788_s28 + $0xa28] sm:$0x3]  ;;  %v627_v59 = vld [vmem:[%s11788_s28 + $0xa38] sm:$0x3] }
  0xcb   : > { %3964 = vmatprep.mubr.f32.mxu0 %v1095_v60  ;;  %4034 = vmatprep.mubr.f32.mxu1 %v1096_v61  ;;  %v1172_v60 = vrot.slane %v253_v48, %v11812_v19  ;;  %v1179_v61 = vrot.slane %v1165_v55, %v11812_v19  ;;  %v1233_v48 = vcombine.high %v257_v41, %v257_v41  ;;  %v258_v55 = vld [vmem:[%s11781_s30 + $0xb0] sm:$0xff] }
  0xcd   : > { %3931 = vmatpush1.xpose.msra.mxu0 %v348_v63  ;;  %4001 = vmatpush1.xpose.msra.mxu1 %v350_v0  ;;  %v624_v63 = vld [vmem:[%s11788_s28 + $0xa20] sm:$0x3]  ;;  %v626_v0 = vld [vmem:[%s11788_s28 + $0xa30] sm:$0x3] }
  0xce   : > { %4068 = vmatprep.subr.mxu0 %v609_v1  ;;  %4138 = vmatprep.subr.mxu1 %v611_v2  ;;  %v369_v1 = vld [vmem:[%s11788_s28 + $0x228] sm:$0xff]  ;;  %v371_v2 = vld [vmem:[%s11788_s28 + $0x238] sm:$0xff] }
  0xd0   : > { %3965 = vmatmul.mubr.f32.vlgmr.msra.gmra.mxu0 %v1087_v53  ;;  %4035 = vmatmul.mubr.f32.vlgmr.msra.gmra.mxu1 %v1094_v54  ;;  %v1163_v53 = vcombine.high %v1155_v46, %v1155_v46  ;;  %v1164_v54 = vcombine.high %v1162_v47, %v1162_v47 }
  0xd1   : > { %4069 = vmatpush1.xpose.msra.mxu0 %v608_v6  ;;  %4139 = vmatpush1.xpose.msra.mxu1 %v610_v7  ;;  %v368_v6 = vld [vmem:[%s11788_s28 + $0x220] sm:$0xff]  ;;  %v370_v7 = vld [vmem:[%s11788_s28 + $0x230] sm:$0xff] }
  0xd2   : > { %4070 = vmatprep.subr.mxu0 %v353_v8  ;;  %4140 = vmatprep.subr.mxu1 %v355_v9  ;;  %v629_v8 = vld [vmem:[%s11788_s28 + $0xa48] sm:$0x3]  ;;  %v631_v9 = vld [vmem:[%s11788_s28 + $0xa58] sm:$0x3] }
  0xd3   : > { %4104 = vmatprep.mubr.f32.mxu0 %v1112_v10  ;;  %4174 = vmatprep.mubr.f32.mxu1 %v1113_v11  ;;  %v1189_v10 = vrot.slane %v254_v62, %v11812_v19  ;;  %v1196_v11 = vrot.slane %v1182_v5, %v11812_v19  ;;  %v1250_v62 = vcombine.high %v258_v55, %v258_v55  ;;  %v259_v5 = vld [vmem:[%s11781_s30 + $0xb8] sm:$0xff] }
  0xd5   : > { %4071 = vmatpush1.xpose.msra.mxu0 %v352_v13  ;;  %4141 = vmatpush1.xpose.msra.mxu1 %v354_v14  ;;  %v628_v13 = vld [vmem:[%s11788_s28 + $0xa40] sm:$0x3]  ;;  %v630_v14 = vld [vmem:[%s11788_s28 + $0xa50] sm:$0x3] }
  0xd6   : > { %4208 = vmatprep.subr.mxu0 %v613_v15  ;;  %4278 = vmatprep.subr.mxu1 %v615_v16  ;;  %v373_v15 = vld [vmem:[%s11788_s28 + $0x248] sm:$0xff]  ;;  %v375_v16 = vld [vmem:[%s11788_s28 + $0x258] sm:$0xff] }
  0xd8   : > { %4105 = vmatmul.mubr.f32.vlgmr.msra.gmra.mxu0 %v1104_v3  ;;  %4175 = vmatmul.mubr.f32.vlgmr.msra.gmra.mxu1 %v1111_v4  ;;  %v1180_v3 = vcombine.high %v1172_v60, %v1172_v60  ;;  %v1181_v4 = vcombine.high %v1179_v61, %v1179_v61 }
  0xd9   : > { %4209 = vmatpush1.xpose.msra.mxu0 %v612_v21  ;;  %4279 = vmatpush1.xpose.msra.mxu1 %v614_v22  ;;  %v372_v21 = vld [vmem:[%s11788_s28 + $0x240] sm:$0xff]  ;;  %v374_v22 = vld [vmem:[%s11788_s28 + $0x250] sm:$0xff] }
  0xda   : > { %4210 = vmatprep.subr.mxu0 %v357_v23  ;;  %4280 = vmatprep.subr.mxu1 %v359_v24  ;;  %v633_v23 = vld [vmem:[%s11788_s28 + $0xa68] sm:$0x3]  ;;  %v635_v24 = vld [vmem:[%s11788_s28 + $0xa78] sm:$0x3] }
  0xdb   : > { %4244 = vmatprep.mubr.f32.mxu0 %v1129_v25  ;;  %4314 = vmatprep.mubr.f32.mxu1 %v1130_v26  ;;  %v1206_v25 = vrot.slane %v255_v12, %v11812_v19  ;;  %v1213_v26 = vrot.slane %v1199_v20, %v11812_v19  ;;  %v1267_v12 = vcombine.high %v259_v5, %v259_v5  ;;  %v260_v20 = vld [vmem:[%s11781_s30 + $0xc0] sm:$0xff] }
  0xdd   : > { %4211 = vmatpush1.xpose.msra.mxu0 %v356_v28  ;;  %4281 = vmatpush1.xpose.msra.mxu1 %v358_v29  ;;  %v632_v28 = vld [vmem:[%s11788_s28 + $0xa60] sm:$0x3]  ;;  %v634_v29 = vld [vmem:[%s11788_s28 + $0xa70] sm:$0x3] }
  0xde   : > { %4348 = vmatprep.subr.mxu0 %v617_v30  ;;  %4418 = vmatprep.subr.mxu1 %v619_v31  ;;  %v377_v30 = vld [vmem:[%s11788_s28 + $0x268] sm:$0xff]  ;;  %v379_v31 = vld [vmem:[%s11788_s28 + $0x278] sm:$0xff] }
  0xe0   : > { %4245 = vmatmul.mubr.f32.vlgmr.msra.gmra.mxu0 %v1121_v17  ;;  %4315 = vmatmul.mubr.f32.vlgmr.msra.gmra.mxu1 %v1128_v18  ;;  %v1197_v17 = vcombine.high %v1189_v10, %v1189_v10  ;;  %v1198_v18 = vcombine.high %v1196_v11, %v1196_v11 }
  0xe1   : > { %4349 = vmatpush1.xpose.msra.mxu0 %v616_v35  ;;  %4419 = vmatpush1.xpose.msra.mxu1 %v618_v36  ;;  %v376_v35 = vld [vmem:[%s11788_s28 + $0x260] sm:$0xff]  ;;  %v378_v36 = vld [vmem:[%s11788_s28 + $0x270] sm:$0xff] }
  0xe2   : > { %4350 = vmatprep.subr.mxu0 %v361_v37  ;;  %4420 = vmatprep.subr.mxu1 %v363_v38  ;;  %v637_v37 = vld [vmem:[%s11788_s28 + $0xa88] sm:$0x3]  ;;  %v639_v38 = vld [vmem:[%s11788_s28 + $0xa98] sm:$0x3] }
  0xe3   : > { %4384 = vmatprep.mubr.f32.mxu0 %v1146_v39  ;;  %4454 = vmatprep.mubr.f32.mxu1 %v1147_v40  ;;  %v1223_v39 = vrot.slane %v256_v27, %v11812_v19  ;;  %v1230_v40 = vrot.slane %v1216_v34, %v11812_v19  ;;  %v1284_v27 = vcombine.high %v260_v20, %v260_v20  ;;  %v261_v34 = vld [vmem:[%s11781_s30 + $0xc8] sm:$0xff] }
  0xe5   : > { %4351 = vmatpush1.xpose.msra.mxu0 %v360_v42  ;;  %4421 = vmatpush1.xpose.msra.mxu1 %v362_v43  ;;  %v636_v42 = vld [vmem:[%s11788_s28 + $0xa80] sm:$0x3]  ;;  %v638_v43 = vld [vmem:[%s11788_s28 + $0xa90] sm:$0x3] }
  0xe6   : > { %4488 = vmatprep.subr.mxu0 %v621_v44  ;;  %4558 = vmatprep.subr.mxu1 %v623_v45  ;;  %v381_v44 = vld [vmem:[%s11788_s28 + $0x288] sm:$0xff]  ;;  %v383_v45 = vld [vmem:[%s11788_s28 + $0x298] sm:$0xff] }
  0xe8   : > { %4385 = vmatmul.mubr.f32.vlgmr.msra.gmra.mxu0 %v1138_v32  ;;  %4455 = vmatmul.mubr.f32.vlgmr.msra.gmra.mxu1 %v1145_v33  ;;  %v1214_v32 = vcombine.high %v1206_v25, %v1206_v25  ;;  %v1215_v33 = vcombine.high %v1213_v26, %v1213_v26 }
  0xe9   : > { %4489 = vmatpush1.xpose.msra.mxu0 %v620_v49  ;;  %4559 = vmatpush1.xpose.msra.mxu1 %v622_v50  ;;  %v380_v49 = vld [vmem:[%s11788_s28 + $0x280] sm:$0xff]  ;;  %v382_v50 = vld [vmem:[%s11788_s28 + $0x290] sm:$0xff] }
  0xea   : > { %4490 = vmatprep.subr.mxu0 %v365_v51  ;;  %4560 = vmatprep.subr.mxu1 %v367_v52  ;;  %v641_v51 = vld [vmem:[%s11788_s28 + $0xaa8] sm:$0x3]  ;;  %v643_v52 = vld [vmem:[%s11788_s28 + $0xab8] sm:$0x3] }
  0xeb   : > { %4524 = vmatprep.mubr.f32.mxu0 %v1163_v53  ;;  %4594 = vmatprep.mubr.f32.mxu1 %v1164_v54  ;;  %v1240_v53 = vrot.slane %v257_v41, %v11812_v19  ;;  %v1247_v54 = vrot.slane %v1233_v48, %v11812_v19  ;;  %v1301_v41 = vcombine.high %v261_v34, %v261_v34  ;;  %v262_v48 = vld [vmem:[%s11781_s30 + $0xd0] sm:$0xff] }
  0xed   : > { %4491 = vmatpush1.xpose.msra.mxu0 %v364_v56  ;;  %4561 = vmatpush1.xpose.msra.mxu1 %v366_v57  ;;  %v640_v56 = vld [vmem:[%s11788_s28 + $0xaa0] sm:$0x3]  ;;  %v642_v57 = vld [vmem:[%s11788_s28 + $0xab0] sm:$0x3] }
  0xee   : > { %4628 = vmatprep.subr.mxu0 %v625_v58  ;;  %4698 = vmatprep.subr.mxu1 %v627_v59  ;;  %v385_v58 = vld [vmem:[%s11788_s28 + $0x2a8] sm:$0xff]  ;;  %v387_v59 = vld [vmem:[%s11788_s28 + $0x2b8] sm:$0xff] }
  0xf0   : > { %4525 = vmatmul.mubr.f32.vlgmr.msra.gmra.mxu0 %v1155_v46  ;;  %4595 = vmatmul.mubr.f32.vlgmr.msra.gmra.mxu1 %v1162_v47  ;;  %v1231_v46 = vcombine.high %v1223_v39, %v1223_v39  ;;  %v1232_v47 = vcombine.high %v1230_v40, %v1230_v40 }
  0xf1   : > { %4629 = vmatpush1.xpose.msra.mxu0 %v624_v63  ;;  %4699 = vmatpush1.xpose.msra.mxu1 %v626_v0  ;;  %v384_v63 = vld [vmem:[%s11788_s28 + $0x2a0] sm:$0xff]  ;;  %v386_v0 = vld [vmem:[%s11788_s28 + $0x2b0] sm:$0xff] }
  0xf2   : > { %4630 = vmatprep.subr.mxu0 %v369_v1  ;;  %4700 = vmatprep.subr.mxu1 %v371_v2  ;;  %v645_v1 = vld [vmem:[%s11788_s28 + $0xac8] sm:$0x3]  ;;  %v647_v2 = vld [vmem:[%s11788_s28 + $0xad8] sm:$0x3] }
  0xf3   : > { %4664 = vmatprep.mubr.f32.mxu0 %v1180_v3  ;;  %4734 = vmatprep.mubr.f32.mxu1 %v1181_v4  ;;  %v1257_v3 = vrot.slane %v258_v55, %v11812_v19  ;;  %v1264_v4 = vrot.slane %v1250_v62, %v11812_v19  ;;  %v1318_v55 = vcombine.high %v262_v48, %v262_v48  ;;  %v402_v62 = vld [vmem:[%s11788_s28 + $0x330] sm:$0xff] }
  0xf5   : > { %4631 = vmatpush1.xpose.msra.mxu0 %v368_v6  ;;  %4701 = vmatpush1.xpose.msra.mxu1 %v370_v7  ;;  %v644_v6 = vld [vmem:[%s11788_s28 + $0xac0] sm:$0x3]  ;;  %v646_v7 = vld [vmem:[%s11788_s28 + $0xad0] sm:$0x3] }
  0xf6   : > { %4768 = vmatprep.subr.mxu0 %v629_v8  ;;  %4838 = vmatprep.subr.mxu1 %v631_v9  ;;  %v389_v8 = vld [vmem:[%s11788_s28 + $0x2c8] sm:$0xff]  ;;  %v391_v9 = vld [vmem:[%s11788_s28 + $0x2d8] sm:$0xff] }
  0xf8   : > { %4665 = vmatmul.mubr.f32.vlgmr.msra.gmra.mxu0 %v1172_v60  ;;  %4735 = vmatmul.mubr.f32.vlgmr.msra.gmra.mxu1 %v1179_v61  ;;  %v1248_v60 = vcombine.high %v1240_v53, %v1240_v53  ;;  %v1249_v61 = vcombine.high %v1247_v54, %v1247_v54 }
  0xf9   : > { %4769 = vmatpush1.xpose.msra.mxu0 %v628_v13  ;;  %4839 = vmatpush1.xpose.msra.mxu1 %v630_v14  ;;  %v388_v13 = vld [vmem:[%s11788_s28 + $0x2c0] sm:$0xff]  ;;  %v390_v14 = vld [vmem:[%s11788_s28 + $0x2d0] sm:$0xff] }
  0xfa   : > { %4770 = vmatprep.subr.mxu0 %v373_v15  ;;  %4840 = vmatprep.subr.mxu1 %v375_v16  ;;  %v649_v15 = vld [vmem:[%s11788_s28 + $0xae8] sm:$0x3]  ;;  %v651_v16 = vld [vmem:[%s11788_s28 + $0xaf8] sm:$0x3] }
  0xfb   : > { %4804 = vmatprep.mubr.f32.mxu0 %v1197_v17  ;;  %4874 = vmatprep.mubr.f32.mxu1 %v1198_v18  ;;  %v1274_v17 = vrot.slane %v259_v5, %v11812_v19  ;;  %v1281_v18 = vrot.slane %v1267_v12, %v11812_v19  ;;  %v662_v5 = vld [vmem:[%s11788_s28 + $0xb50] sm:$0x3] }
  0xfd   : > { %4771 = vmatpush1.xpose.msra.mxu0 %v372_v21  ;;  %4841 = vmatpush1.xpose.msra.mxu1 %v374_v22  ;;  %v648_v21 = vld [vmem:[%s11788_s28 + $0xae0] sm:$0x3]  ;;  %v650_v22 = vld [vmem:[%s11788_s28 + $0xaf0] sm:$0x3] }
  0xfe   : > { %4908 = vmatprep.subr.mxu0 %v633_v23  ;;  %4978 = vmatprep.subr.mxu1 %v635_v24  ;;  %v393_v23 = vld [vmem:[%s11788_s28 + $0x2e8] sm:$0xff]  ;;  %v395_v24 = vld [vmem:[%s11788_s28 + $0x2f8] sm:$0xff] }
 0x100   : > { %4805 = vmatmul.mubr.f32.vlgmr.msra.gmra.mxu0 %v1189_v10  ;;  %4875 = vmatmul.mubr.f32.vlgmr.msra.gmra.mxu1 %v1196_v11  ;;  %v1265_v10 = vcombine.high %v1257_v3, %v1257_v3  ;;  %v1266_v11 = vcombine.high %v1264_v4, %v1264_v4 }
 0x101   : > { %4909 = vmatpush1.xpose.msra.mxu0 %v632_v28  ;;  %4979 = vmatpush1.xpose.msra.mxu1 %v634_v29  ;;  %v392_v28 = vld [vmem:[%s11788_s28 + $0x2e0] sm:$0xff]  ;;  %v394_v29 = vld [vmem:[%s11788_s28 + $0x2f0] sm:$0xff] }
 0x102   : > { %4910 = vmatprep.subr.mxu0 %v377_v30  ;;  %4980 = vmatprep.subr.mxu1 %v379_v31  ;;  %v653_v30 = vld [vmem:[%s11788_s28 + $0xb08] sm:$0x3]  ;;  %v655_v31 = vld [vmem:[%s11788_s28 + $0xb18] sm:$0x3] }
 0x103   : > { %4944 = vmatprep.mubr.f32.mxu0 %v1214_v32  ;;  %5014 = vmatprep.mubr.f32.mxu1 %v1215_v33  ;;  %v1291_v32 = vrot.slane %v260_v20, %v11812_v19  ;;  %v1298_v33 = vrot.slane %v1284_v27, %v11812_v19  ;;  %v665_v20 = vld [vmem:[%s11788_s28 + $0xb68] sm:$0x3] }
 0x104   : > { %v409_v27 = vld [vmem:[%s11788_s28 + $0x368] sm:$0xff] }
 0x105   : > { %4911 = vmatpush1.xpose.msra.mxu0 %v376_v35  ;;  %4981 = vmatpush1.xpose.msra.mxu1 %v378_v36  ;;  %v652_v35 = vld [vmem:[%s11788_s28 + $0xb00] sm:$0x3]  ;;  %v654_v36 = vld [vmem:[%s11788_s28 + $0xb10] sm:$0x3] }
 0x106   : > { %5048 = vmatprep.subr.mxu0 %v637_v37  ;;  %5118 = vmatprep.subr.mxu1 %v639_v38  ;;  %v397_v37 = vld [vmem:[%s11788_s28 + $0x308] sm:$0xff]  ;;  %v399_v38 = vld [vmem:[%s11788_s28 + $0x318] sm:$0xff] }
 0x108   : > { %4945 = vmatmul.mubr.f32.vlgmr.msra.gmra.mxu0 %v1206_v25  ;;  %5015 = vmatmul.mubr.f32.vlgmr.msra.gmra.mxu1 %v1213_v26  ;;  %v1282_v25 = vcombine.high %v1274_v17, %v1274_v17  ;;  %v1283_v26 = vcombine.high %v1281_v18, %v1281_v18 }
 0x109   : > { %5049 = vmatpush1.xpose.msra.mxu0 %v636_v42  ;;  %5119 = vmatpush1.xpose.msra.mxu1 %v638_v43  ;;  %v396_v42 = vld [vmem:[%s11788_s28 + $0x300] sm:$0xff]  ;;  %v398_v43 = vld [vmem:[%s11788_s28 + $0x310] sm:$0xff] }
 0x10a   : > { %5050 = vmatprep.subr.mxu0 %v381_v44  ;;  %5120 = vmatprep.subr.mxu1 %v383_v45  ;;  %v657_v44 = vld [vmem:[%s11788_s28 + $0xb28] sm:$0x3]  ;;  %v659_v45 = vld [vmem:[%s11788_s28 + $0xb38] sm:$0x3] }
 0x10b   : > { %5084 = vmatprep.mubr.f32.mxu0 %v1231_v46  ;;  %5154 = vmatprep.mubr.f32.mxu1 %v1232_v47  ;;  %v1308_v46 = vrot.slane %v261_v34, %v11812_v19  ;;  %v1315_v47 = vrot.slane %v1301_v41, %v11812_v19  ;;  %v671_v41 = vld [vmem:[%s11788_s28 + $0xb98] sm:$0x3] }
 0x10d   : > { %5051 = vmatpush1.xpose.msra.mxu0 %v380_v49  ;;  %5121 = vmatpush1.xpose.msra.mxu1 %v382_v50  ;;  %v656_v49 = vld [vmem:[%s11788_s28 + $0xb20] sm:$0x3]  ;;  %v658_v50 = vld [vmem:[%s11788_s28 + $0xb30] sm:$0x3] }
 0x10e   : > { %5188 = vmatprep.subr.mxu0 %v641_v51  ;;  %5258 = vmatprep.subr.mxu1 %v643_v52  ;;  %v401_v51 = vld [vmem:[%s11788_s28 + $0x328] sm:$0xff]  ;;  %v403_v52 = vld [vmem:[%s11788_s28 + $0x338] sm:$0xff] }
 0x110   : > { %5085 = vmatmul.mubr.f32.vlgmr.msra.gmra.mxu0 %v1223_v39  ;;  %5155 = vmatmul.mubr.f32.vlgmr.msra.gmra.mxu1 %v1230_v40  ;;  %v1299_v39 = vcombine.high %v1291_v32, %v1291_v32  ;;  %v1300_v40 = vcombine.high %v1298_v33, %v1298_v33 }
 0x111   : > { %5189 = vmatpush1.xpose.msra.mxu0 %v640_v56  ;;  %5259 = vmatpush1.xpose.msra.mxu1 %v642_v57 }
 0x112   : > { %5190 = vmatprep.subr.mxu0 %v385_v58  ;;  %5260 = vmatprep.subr.mxu1 %v387_v59 }
 0x113   : > { %5224 = vmatprep.mubr.f32.mxu0 %v1248_v60  ;;  %5294 = vmatprep.mubr.f32.mxu1 %v1249_v61  ;;  %v400_v61 = vld [vmem:[%s11788_s28 + $0x320] sm:$0xff] }
 0x115   : > { %5191 = vmatpush1.xpose.msra.mxu0 %v384_v63  ;;  %5261 = vmatpush1.xpose.msra.mxu1 %v386_v0  ;;  %v661_v63 = vld [vmem:[%s11788_s28 + $0xb48] sm:$0x3]  ;;  %v663_v0 = vld [vmem:[%s11788_s28 + $0xb58] sm:$0x3] }
 0x116   : > { %5328 = vmatprep.subr.mxu0 %v645_v1  ;;  %5398 = vmatprep.subr.mxu1 %v647_v2  ;;  %v1325_v1 = vrot.slane %v262_v48, %v11812_v19  ;;  %v1332_v2 = vrot.slane %v1318_v55, %v11812_v19  ;;  %v415_v48 = vld [vmem:[%s11788_s28 + $0x398] sm:$0xff] }
 0x118   : > { %5225 = vmatmul.mubr.f32.vlgmr.msra.gmra.mxu0 %v1240_v53  ;;  %5295 = vmatmul.mubr.f32.vlgmr.msra.gmra.mxu1 %v1247_v54  ;;  %v1316_v53 = vcombine.high %v1308_v46, %v1308_v46  ;;  %v1317_v54 = vcombine.high %v1315_v47, %v1315_v47 }
 0x119   : > { %5329 = vmatpush1.xpose.msra.mxu0 %v644_v6  ;;  %5399 = vmatpush1.xpose.msra.mxu1 %v646_v7  ;;  %v405_v6 = vld [vmem:[%s11788_s28 + $0x348] sm:$0xff]  ;;  %v407_v7 = vld [vmem:[%s11788_s28 + $0x358] sm:$0xff] }
 0x11a   : > { %5330 = vmatprep.subr.mxu0 %v389_v8  ;;  %5400 = vmatprep.subr.mxu1 %v391_v9  ;;  %v1333_v8 = vcombine.high %v1325_v1, %v1325_v1  ;;  %v1334_v9 = vcombine.high %v1332_v2, %v1332_v2 }
 0x11b   : > { %5364 = vmatprep.mubr.f32.mxu0 %v1265_v10  ;;  %5434 = vmatprep.mubr.f32.mxu1 %v1266_v11 }
 0x11d   : > { %5331 = vmatpush1.xpose.msra.mxu0 %v388_v13  ;;  %5401 = vmatpush1.xpose.msra.mxu1 %v390_v14 }
 0x11e   : > { %5468 = vmatprep.subr.mxu0 %v649_v15  ;;  %5538 = vmatprep.subr.mxu1 %v651_v16  ;;  %v404_v16 = vld [vmem:[%s11788_s28 + $0x340] sm:$0xff] }
 0x120   : > { %5365 = vmatmul.mubr.f32.vlgmr.msra.gmra.mxu0 %v1257_v3  ;;  %5435 = vmatmul.mubr.f32.vlgmr.msra.gmra.mxu1 %v1264_v4  ;;  %v263_v3 = vld [vmem:[%s11781_s30 + $0xd8] sm:$0xff]  ;;  %v660_v4 = vld [vmem:[%s11788_s28 + $0xb40] sm:$0x3] }
 0x121   : > { %5469 = vmatpush1.xpose.msra.mxu0 %v648_v21  ;;  %5539 = vmatpush1.xpose.msra.mxu1 %v650_v22  ;;  %v1335_v10 = vcombine.high %v263_v3, %v263_v3  ;;  %v667_v21 = vld [vmem:[%s11788_s28 + $0xb78] sm:$0x3]  ;;  %v1342_v22 = vrot.slane %v263_v3, %v11812_v19  ;;  %v417_v3 = vld [vmem:[%s11788_s28 + $0x3a8] sm:$0xff] }
 0x122   : > { %5470 = vmatprep.subr.mxu0 %v393_v23  ;;  %5540 = vmatprep.subr.mxu1 %v395_v24  ;;  %v264_v24 = vld [vmem:[%s11781_s30 + $0xe0] sm:$0xff] }
 0x123   : > { %5504 = vmatprep.mubr.f32.mxu0 %v1282_v25  ;;  %5574 = vmatprep.mubr.f32.mxu1 %v1283_v26  ;;  %v1349_v23 = vrot.slane %v1335_v10, %v11812_v19  ;;  %v664_v25 = vld [vmem:[%s11788_s28 + $0xb60] sm:$0x3]  ;;  %v666_v26 = vld [vmem:[%s11788_s28 + $0xb70] sm:$0x3] }
 0x125   : > { %5471 = vmatpush1.xpose.msra.mxu0 %v392_v28  ;;  %5541 = vmatpush1.xpose.msra.mxu1 %v394_v29  ;;  %v411_v28 = vld [vmem:[%s11788_s28 + $0x378] sm:$0xff]  ;;  %v1350_v29 = vcombine.high %v1342_v22, %v1342_v22 }
 0x126   : > { %5608 = vmatprep.subr.mxu0 %v653_v30  ;;  %5678 = vmatprep.subr.mxu1 %v655_v31  ;;  %v1351_v30 = vcombine.high %v1349_v23, %v1349_v23  ;;  %v1352_v31 = vcombine.high %v264_v24, %v264_v24 }
 0x128   : > { %5505 = vmatmul.mubr.f32.vlgmr.msra.gmra.mxu0 %v1274_v17  ;;  %5575 = vmatmul.mubr.f32.vlgmr.msra.gmra.mxu1 %v1281_v18  ;;  %v406_v17 = vld [vmem:[%s11788_s28 + $0x350] sm:$0xff] }
 0x129   : > { %5609 = vmatpush1.xpose.msra.mxu0 %v652_v35  ;;  %5679 = vmatpush1.xpose.msra.mxu1 %v654_v36 }
 0x12a   : > { %5610 = vmatprep.subr.mxu0 %v397_v37  ;;  %5680 = vmatprep.subr.mxu1 %v399_v38  ;;  %v408_v37 = vld [vmem:[%s11788_s28 + $0x360] sm:$0xff]  ;;  %v410_v38 = vld [vmem:[%s11788_s28 + $0x370] sm:$0xff] }
 0x12b   : > { %5644 = vmatprep.mubr.f32.mxu0 %v1299_v39  ;;  %5714 = vmatprep.mubr.f32.mxu1 %v1300_v40  ;;  %v669_v40 = vld [vmem:[%s11788_s28 + $0xb88] sm:$0x3] }
 0x12d   : > { %5611 = vmatpush1.xpose.msra.mxu0 %v396_v42  ;;  %5681 = vmatpush1.xpose.msra.mxu1 %v398_v43  ;;  %v1359_v42 = vrot.slane %v264_v24, %v11812_v19  ;;  %v1366_v43 = vrot.slane %v1352_v31, %v11812_v19  ;;  %v421_v24 = vld [vmem:[%s11788_s28 + $0x3c8] sm:$0xff] }
 0x12e   : > { %5748 = vmatprep.subr.mxu0 %v657_v44  ;;  %5818 = vmatprep.subr.mxu1 %v659_v45  ;;  %v265_v44 = vld [vmem:[%s11781_s30 + $0xe8] sm:$0xff]  ;;  %v668_v45 = vld [vmem:[%s11788_s28 + $0xb80] sm:$0x3] }
 0x130   : > { %5645 = vmatmul.mubr.f32.vlgmr.msra.gmra.mxu0 %v1291_v32  ;;  %v2286_v56 = vpop.f32.mrf.mxu0  ;;  %v2356_v57 = vpop.f32.mrf.mxu1  ;;  %5715 = vmatmul.mubr.f32.vlgmr.msra.gmra.mxu1 %v1298_v33 }
 0x131   : > { %v2357_v58 = vadd.f32 %v2356_v57, %v2286_v56  ;;  %5749 = vmatpush1.xpose.msra.mxu0 %v656_v49  ;;  %5819 = vmatpush1.xpose.msra.mxu1 %v658_v50  ;;  %v1367_v49 = vcombine.high %v1359_v42, %v1359_v42  ;;  %v1368_v50 = vcombine.high %v1366_v43, %v1366_v43  ;;  %v412_v57 = vld [vmem:[%s11788_s28 + $0x380] sm:$0xff] }
 0x132   : > { %v2288_v59 = vpop.f32.mrf.mxu0  ;;  %v2358_v60 = vpop.f32.mrf.mxu1  ;;  %5750 = vmatprep.subr.mxu0 %v401_v51  ;;  %5820 = vmatprep.subr.mxu1 %v403_v52  ;;  %v1369_v51 = vcombine.high %v265_v44, %v265_v44 }
 0x133   : > { %5784 = vmatprep.mubr.f32.mxu0 %v1316_v53  ;;  %5854 = vmatprep.mubr.f32.mxu1 %v1317_v54  ;;  %v673_v60 = vld [vmem:[%s11788_s28 + $0xba8] sm:$0x3] }
 0x135   : > { %5751 = vmatpush1.xpose.msra.mxu0 %v400_v61  ;;  %5821 = vmatpush1.xpose.msra.mxu1 %v402_v62  ;;  %v675_v61 = vld [vmem:[%s11788_s28 + $0xbb8] sm:$0x3]  ;;  %v1376_v62 = vrot.slane %v265_v44, %v11812_v19  ;;  %v425_v44 = vld [vmem:[%s11788_s28 + $0x3e8] sm:$0xff] }
 0x136   : > { %5888 = vmatprep.subr.mxu0 %v661_v63  ;;  %5958 = vmatprep.subr.mxu1 %v663_v0  ;;  %v1383_v63 = vrot.slane %v1369_v51, %v11812_v19  ;;  %v266_v0 = vld [vmem:[%s11781_s30 + $0xf0] sm:$0xff] }
 0x138   : > { %v2426_v11 = vpop.f32.mrf.mxu0  ;;  %5785 = vmatmul.mubr.f32.vlgmr.msra.gmra.mxu0 %v1308_v46  ;;  %v2496_v12 = vpop.f32.mrf.mxu1  ;;  %5855 = vmatmul.mubr.f32.vlgmr.msra.gmra.mxu1 %v1315_v47  ;;  %v670_v46 = vld [vmem:[%s11788_s28 + $0xb90] sm:$0x3]  ;;  %v413_v47 = vld [vmem:[%s11788_s28 + $0x388] sm:$0xff] }
 0x139   : > { %v2427_v13 = vadd.f32 %v2426_v11, %v2357_v58  ;;  %5889 = vmatpush1.xpose.msra.mxu0 %v660_v4  ;;  %5959 = vmatpush1.xpose.msra.mxu1 %v662_v5  ;;  %v414_v58 = vld [vmem:[%s11788_s28 + $0x390] sm:$0xff]  ;;  %v419_v4 = vld [vmem:[%s11788_s28 + $0x3b8] sm:$0xff]  ;;  %v1384_v5 = vcombine.high %v1376_v62, %v1376_v62 }
 0x13a   : > { %v2428_v14 = vpop.f32.mrf.mxu0  ;;  %v2498_v15 = vpop.f32.mrf.mxu1  ;;  %5890 = vmatprep.subr.mxu0 %v405_v6  ;;  %5960 = vmatprep.subr.mxu1 %v407_v7  ;;  %v1385_v6 = vcombine.high %v1383_v63, %v1383_v63  ;;  %v1386_v7 = vcombine.high %v266_v0, %v266_v0 }
 0x13b   : > { %v2497_v18 = vadd.f32 %v2496_v12, %v2427_v13  ;;  %5924 = vmatprep.mubr.f32.mxu0 %v1333_v8  ;;  %5994 = vmatprep.mubr.f32.mxu1 %v1334_v9  ;;  %v416_v13 = vld [vmem:[%s11788_s28 + $0x3a0] sm:$0xff]  ;;  %v418_v14 = vld [vmem:[%s11788_s28 + $0x3b0] sm:$0xff] }
 0x13d   : > { %5891 = vmatpush1.xpose.msra.mxu0 %v404_v16  ;;  %5961 = vmatpush1.xpose.msra.mxu1 %v406_v17  ;;  %v677_v16 = vld [vmem:[%s11788_s28 + $0xbc8] sm:$0x3]  ;;  %v679_v17 = vld [vmem:[%s11788_s28 + $0xbd8] sm:$0x3] }
 0x13e   : > { %6028 = vmatprep.subr.mxu0 %v665_v20  ;;  %6098 = vmatprep.subr.mxu1 %v667_v21  ;;  %v1400_v20 = vrot.slane %v1386_v7, %v11812_v19  ;;  %v267_v21 = vld [vmem:[%s11781_s30 + $0xf8] sm:$0xff] }
 0x140   : > { %v2566_v32 = vpop.f32.mrf.mxu0  ;;  %5925 = vmatmul.mubr.f32.vlgmr.msra.gmra.mxu0 %v1325_v1  ;;  %v2636_v33 = vpop.f32.mrf.mxu1  ;;  %5995 = vmatmul.mubr.f32.vlgmr.msra.gmra.mxu1 %v1332_v2  ;;  %v672_v1 = vld [vmem:[%s11788_s28 + $0xba0] sm:$0x3]  ;;  %v674_v2 = vld [vmem:[%s11788_s28 + $0xbb0] sm:$0x3] }
 0x141   : > { %v2567_v34 = vadd.f32 %v2566_v32, %v2497_v18  ;;  %6029 = vmatpush1.xpose.msra.mxu0 %v664_v25  ;;  %6099 = vmatpush1.xpose.msra.mxu1 %v666_v26  ;;  %v1393_v18 = vrot.slane %v266_v0, %v11812_v19  ;;  %v423_v25 = vld [vmem:[%s11788_s28 + $0x3d8] sm:$0xff]  ;;  %v429_v0 = vld [vmem:[%s11788_s28 + $0x408] sm:$0xff] }
 0x142   : > { %v2568_v35 = vpop.f32.mrf.mxu0  ;;  %v2638_v36 = vpop.f32.mrf.mxu1  ;;  %6030 = vmatprep.subr.mxu0 %v409_v27  ;;  %6100 = vmatprep.subr.mxu1 %v411_v28  ;;  %v1402_v27 = vcombine.high %v1400_v20, %v1400_v20  ;;  %v1403_v28 = vcombine.high %v267_v21, %v267_v21 }
 0x143   : > { %v2637_v39 = vadd.f32 %v2636_v33, %v2567_v34  ;;  %6064 = vmatprep.mubr.f32.mxu0 %v1350_v29  ;;  %6134 = vmatprep.mubr.f32.mxu1 %v1351_v30  ;;  %v1401_v26 = vcombine.high %v1393_v18, %v1393_v18  ;;  %v420_v34 = vld [vmem:[%s11788_s28 + $0x3c0] sm:$0xff]  ;;  %v422_v35 = vld [vmem:[%s11788_s28 + $0x3d0] sm:$0xff] }
 0x145   : > { %6031 = vmatpush1.xpose.msra.mxu0 %v408_v37  ;;  %6101 = vmatpush1.xpose.msra.mxu1 %v410_v38  ;;  %v681_v37 = vld [vmem:[%s11788_s28 + $0xbe8] sm:$0x3]  ;;  %v683_v38 = vld [vmem:[%s11788_s28 + $0xbf8] sm:$0x3] }
 0x146   : > { %6168 = vmatprep.subr.mxu0 %v669_v40  ;;  %6238 = vmatprep.subr.mxu1 %v671_v41  ;;  %v1417_v40 = vrot.slane %v1403_v28, %v11812_v19  ;;  %v268_v41 = vld [vmem:[%s11781_s30 + $0x100] sm:$0xff] }
 0x148   : > { %v2706_v52 = vpop.f32.mrf.mxu0  ;;  %6065 = vmatmul.mubr.f32.vlgmr.msra.gmra.mxu0 %v1342_v22  ;;  %v2776_v53 = vpop.f32.mrf.mxu1  ;;  %6135 = vmatmul.mubr.f32.vlgmr.msra.gmra.mxu1 %v1349_v23  ;;  %v676_v22 = vld [vmem:[%s11788_s28 + $0xbc0] sm:$0x3]  ;;  %v678_v23 = vld [vmem:[%s11788_s28 + $0xbd0] sm:$0x3] }
 0x149   : > { %v2707_v54 = vadd.f32 %v2706_v52, %v2637_v39  ;;  %6169 = vmatpush1.xpose.msra.mxu0 %v668_v45  ;;  %6239 = vmatpush1.xpose.msra.mxu1 %v670_v46  ;;  %v1410_v39 = vrot.slane %v267_v21, %v11812_v19  ;;  %v427_v45 = vld [vmem:[%s11788_s28 + $0x3f8] sm:$0xff]  ;;  %v433_v21 = vld [vmem:[%s11788_s28 + $0x428] sm:$0xff] }
 0x14a   : > { %v2708_v55 = vpop.f32.mrf.mxu0  ;;  %v2778_v56 = vpop.f32.mrf.mxu1  ;;  %6170 = vmatprep.subr.mxu0 %v413_v47  ;;  %6240 = vmatprep.subr.mxu1 %v415_v48  ;;  %v1419_v47 = vcombine.high %v1417_v40, %v1417_v40  ;;  %v1420_v48 = vcombine.high %v268_v41, %v268_v41 }
 0x14b   : > { %v2777_v59 = vadd.f32 %v2776_v53, %v2707_v54  ;;  %6204 = vmatprep.mubr.f32.mxu0 %v1367_v49  ;;  %6274 = vmatprep.mubr.f32.mxu1 %v1368_v50  ;;  %v1418_v46 = vcombine.high %v1410_v39, %v1410_v39  ;;  %v424_v54 = vld [vmem:[%s11788_s28 + $0x3e0] sm:$0xff]  ;;  %v426_v55 = vld [vmem:[%s11788_s28 + $0x3f0] sm:$0xff] }
 0x14d   : > { %6171 = vmatpush1.xpose.msra.mxu0 %v412_v57  ;;  %6241 = vmatpush1.xpose.msra.mxu1 %v414_v58  ;;  %v685_v57 = vld [vmem:[%s11788_s28 + $0xc08] sm:$0x3]  ;;  %v687_v58 = vld [vmem:[%s11788_s28 + $0xc18] sm:$0x3] }
 0x14e   : > { %6308 = vmatprep.subr.mxu0 %v673_v60  ;;  %6378 = vmatprep.subr.mxu1 %v675_v61  ;;  %v1434_v60 = vrot.slane %v1420_v48, %v11812_v19  ;;  %v269_v61 = vld [vmem:[%s11781_s30 + $0x108] sm:$0xff] }
 0x150   : > { %v2846_v8 = vpop.f32.mrf.mxu0  ;;  %6205 = vmatmul.mubr.f32.vlgmr.msra.gmra.mxu0 %v1359_v42  ;;  %v2916_v9 = vpop.f32.mrf.mxu1  ;;  %6275 = vmatmul.mubr.f32.vlgmr.msra.gmra.mxu1 %v1366_v43  ;;  %v680_v42 = vld [vmem:[%s11788_s28 + $0xbe0] sm:$0x3]  ;;  %v682_v43 = vld [vmem:[%s11788_s28 + $0xbf0] sm:$0x3] }
 0x151   : > { %v2847_v10 = vadd.f32 %v2846_v8, %v2777_v59  ;;  %6309 = vmatpush1.xpose.msra.mxu0 %v672_v1  ;;  %6379 = vmatpush1.xpose.msra.mxu1 %v674_v2  ;;  %v1427_v59 = vrot.slane %v268_v41, %v11812_v19  ;;  %v431_v1 = vld [vmem:[%s11788_s28 + $0x418] sm:$0xff]  ;;  %v437_v41 = vld [vmem:[%s11788_s28 + $0x448] sm:$0xff] }
 0x152   : > { %v2848_v11 = vpop.f32.mrf.mxu0  ;;  %v2918_v12 = vpop.f32.mrf.mxu1  ;;  %6310 = vmatprep.subr.mxu0 %v417_v3  ;;  %6380 = vmatprep.subr.mxu1 %v419_v4  ;;  %v1436_v3 = vcombine.high %v1434_v60, %v1434_v60  ;;  %v1437_v4 = vcombine.high %v269_v61, %v269_v61 }
 0x153   : > { %v2917_v15 = vadd.f32 %v2916_v9, %v2847_v10  ;;  %6344 = vmatprep.mubr.f32.mxu0 %v1384_v5  ;;  %6414 = vmatprep.mubr.f32.mxu1 %v1385_v6  ;;  %v1435_v2 = vcombine.high %v1427_v59, %v1427_v59  ;;  %v428_v10 = vld [vmem:[%s11788_s28 + $0x400] sm:$0xff]  ;;  %v430_v11 = vld [vmem:[%s11788_s28 + $0x410] sm:$0xff] }
 0x155   : > { %6311 = vmatpush1.xpose.msra.mxu0 %v416_v13  ;;  %6381 = vmatpush1.xpose.msra.mxu1 %v418_v14  ;;  %v689_v13 = vld [vmem:[%s11788_s28 + $0xc28] sm:$0x3]  ;;  %v691_v14 = vld [vmem:[%s11788_s28 + $0xc38] sm:$0x3] }
 0x156   : > { %6448 = vmatprep.subr.mxu0 %v677_v16  ;;  %6518 = vmatprep.subr.mxu1 %v679_v17  ;;  %v1451_v16 = vrot.slane %v1437_v4, %v11812_v19  ;;  %v270_v17 = vld [vmem:[%s11781_s30 + $0x110] sm:$0xff] }
 0x158   : > { %v2986_v29 = vpop.f32.mrf.mxu0  ;;  %6345 = vmatmul.mubr.f32.vlgmr.msra.gmra.mxu0 %v1376_v62  ;;  %v3056_v30 = vpop.f32.mrf.mxu1  ;;  %6415 = vmatmul.mubr.f32.vlgmr.msra.gmra.mxu1 %v1383_v63  ;;  %v684_v62 = vld [vmem:[%s11788_s28 + $0xc00] sm:$0x3]  ;;  %v686_v63 = vld [vmem:[%s11788_s28 + $0xc10] sm:$0x3] }
 0x159   : > { %v2987_v31 = vadd.f32 %v2986_v29, %v2917_v15  ;;  %6449 = vmatpush1.xpose.msra.mxu0 %v676_v22  ;;  %6519 = vmatpush1.xpose.msra.mxu1 %v678_v23  ;;  %v1444_v15 = vrot.slane %v269_v61, %v11812_v19  ;;  %v435_v22 = vld [vmem:[%s11788_s28 + $0x438] sm:$0xff]  ;;  %v441_v61 = vld [vmem:[%s11788_s28 + $0x468] sm:$0xff] }
 0x15a   : > { %v2988_v32 = vpop.f32.mrf.mxu0  ;;  %v3058_v33 = vpop.f32.mrf.mxu1  ;;  %6450 = vmatprep.subr.mxu0 %v421_v24  ;;  %6520 = vmatprep.subr.mxu1 %v423_v25  ;;  %v1453_v24 = vcombine.high %v1451_v16, %v1451_v16  ;;  %v1454_v25 = vcombine.high %v270_v17, %v270_v17 }
 0x15b   : > { %v3057_v36 = vadd.f32 %v3056_v30, %v2987_v31  ;;  %6484 = vmatprep.mubr.f32.mxu0 %v1401_v26  ;;  %6554 = vmatprep.mubr.f32.mxu1 %v1402_v27  ;;  %v1452_v23 = vcombine.high %v1444_v15, %v1444_v15  ;;  %v432_v31 = vld [vmem:[%s11788_s28 + $0x420] sm:$0xff]  ;;  %v434_v32 = vld [vmem:[%s11788_s28 + $0x430] sm:$0xff] }
 0x15d   : > { %6451 = vmatpush1.xpose.msra.mxu0 %v420_v34  ;;  %6521 = vmatpush1.xpose.msra.mxu1 %v422_v35  ;;  %v693_v34 = vld [vmem:[%s11788_s28 + $0xc48] sm:$0x3]  ;;  %v695_v35 = vld [vmem:[%s11788_s28 + $0xc58] sm:$0x3] }
 0x15e   : > { %6588 = vmatprep.subr.mxu0 %v681_v37  ;;  %6658 = vmatprep.subr.mxu1 %v683_v38  ;;  %v1468_v37 = vrot.slane %v1454_v25, %v11812_v19  ;;  %v271_v38 = vld [vmem:[%s11781_s30 + $0x118] sm:$0xff] }
 0x160   : > { %v3126_v49 = vpop.f32.mrf.mxu0  ;;  %6485 = vmatmul.mubr.f32.vlgmr.msra.gmra.mxu0 %v1393_v18  ;;  %v3196_v50 = vpop.f32.mrf.mxu1  ;;  %6555 = vmatmul.mubr.f32.vlgmr.msra.gmra.mxu1 %v1400_v20  ;;  %v688_v18 = vld [vmem:[%s11788_s28 + $0xc20] sm:$0x3]  ;;  %v690_v20 = vld [vmem:[%s11788_s28 + $0xc30] sm:$0x3] }
 0x161   : > { %v3127_v51 = vadd.f32 %v3126_v49, %v3057_v36  ;;  %6589 = vmatpush1.xpose.msra.mxu0 %v680_v42  ;;  %6659 = vmatpush1.xpose.msra.mxu1 %v682_v43  ;;  %v1461_v36 = vrot.slane %v270_v17, %v11812_v19  ;;  %v439_v42 = vld [vmem:[%s11788_s28 + $0x458] sm:$0xff]  ;;  %v445_v17 = vld [vmem:[%s11788_s28 + $0x488] sm:$0xff] }
 0x162   : > { %v3128_v52 = vpop.f32.mrf.mxu0  ;;  %v3198_v53 = vpop.f32.mrf.mxu1  ;;  %6590 = vmatprep.subr.mxu0 %v425_v44  ;;  %6660 = vmatprep.subr.mxu1 %v427_v45  ;;  %v1470_v44 = vcombine.high %v1468_v37, %v1468_v37  ;;  %v1471_v45 = vcombine.high %v271_v38, %v271_v38 }
 0x163   : > { %v3197_v56 = vadd.f32 %v3196_v50, %v3127_v51  ;;  %6624 = vmatprep.mubr.f32.mxu0 %v1418_v46  ;;  %6694 = vmatprep.mubr.f32.mxu1 %v1419_v47  ;;  %v1469_v43 = vcombine.high %v1461_v36, %v1461_v36  ;;  %v436_v51 = vld [vmem:[%s11788_s28 + $0x440] sm:$0xff]  ;;  %v438_v52 = vld [vmem:[%s11788_s28 + $0x450] sm:$0xff] }
 0x165   : > { %6591 = vmatpush1.xpose.msra.mxu0 %v424_v54  ;;  %6661 = vmatpush1.xpose.msra.mxu1 %v426_v55  ;;  %v697_v54 = vld [vmem:[%s11788_s28 + $0xc68] sm:$0x3]  ;;  %v699_v55 = vld [vmem:[%s11788_s28 + $0xc78] sm:$0x3] }
 0x166   : > { %6728 = vmatprep.subr.mxu0 %v685_v57  ;;  %6798 = vmatprep.subr.mxu1 %v687_v58  ;;  %v1485_v57 = vrot.slane %v1471_v45, %v11812_v19  ;;  %v272_v58 = vld [vmem:[%s11781_s30 + $0x120] sm:$0xff] }
 0x168   : > { %v3266_v5 = vpop.f32.mrf.mxu0  ;;  %6625 = vmatmul.mubr.f32.vlgmr.msra.gmra.mxu0 %v1410_v39  ;;  %v3336_v6 = vpop.f32.mrf.mxu1  ;;  %6695 = vmatmul.mubr.f32.vlgmr.msra.gmra.mxu1 %v1417_v40  ;;  %v692_v39 = vld [vmem:[%s11788_s28 + $0xc40] sm:$0x3]  ;;  %v694_v40 = vld [vmem:[%s11788_s28 + $0xc50] sm:$0x3] }
 0x169   : > { %v3267_v7 = vadd.f32 %v3266_v5, %v3197_v56  ;;  %6729 = vmatpush1.xpose.msra.mxu0 %v684_v62  ;;  %6799 = vmatpush1.xpose.msra.mxu1 %v686_v63  ;;  %v1478_v56 = vrot.slane %v271_v38, %v11812_v19  ;;  %v443_v62 = vld [vmem:[%s11788_s28 + $0x478] sm:$0xff]  ;;  %v449_v38 = vld [vmem:[%s11788_s28 + $0x4a8] sm:$0xff] }
 0x16a   : > { %v3268_v8 = vpop.f32.mrf.mxu0  ;;  %v3338_v9 = vpop.f32.mrf.mxu1  ;;  %6730 = vmatprep.subr.mxu0 %v429_v0  ;;  %6800 = vmatprep.subr.mxu1 %v431_v1  ;;  %v1487_v0 = vcombine.high %v1485_v57, %v1485_v57  ;;  %v1488_v1 = vcombine.high %v272_v58, %v272_v58 }
 0x16b   : > { %v3337_v12 = vadd.f32 %v3336_v6, %v3267_v7  ;;  %6764 = vmatprep.mubr.f32.mxu0 %v1435_v2  ;;  %6834 = vmatprep.mubr.f32.mxu1 %v1436_v3  ;;  %v1486_v63 = vcombine.high %v1478_v56, %v1478_v56  ;;  %v440_v7 = vld [vmem:[%s11788_s28 + $0x460] sm:$0xff]  ;;  %v442_v8 = vld [vmem:[%s11788_s28 + $0x470] sm:$0xff] }
 0x16d   : > { %6731 = vmatpush1.xpose.msra.mxu0 %v428_v10  ;;  %6801 = vmatpush1.xpose.msra.mxu1 %v430_v11  ;;  %v701_v10 = vld [vmem:[%s11788_s28 + $0xc88] sm:$0x3]  ;;  %v703_v11 = vld [vmem:[%s11788_s28 + $0xc98] sm:$0x3] }
 0x16e   : > { %6868 = vmatprep.subr.mxu0 %v689_v13  ;;  %6938 = vmatprep.subr.mxu1 %v691_v14  ;;  %v1502_v13 = vrot.slane %v1488_v1, %v11812_v19  ;;  %v273_v14 = vld [vmem:[%s11781_s30 + $0x128] sm:$0xff] }
 0x170   : > { %v3406_v26 = vpop.f32.mrf.mxu0  ;;  %6765 = vmatmul.mubr.f32.vlgmr.msra.gmra.mxu0 %v1427_v59  ;;  %v3476_v27 = vpop.f32.mrf.mxu1  ;;  %6835 = vmatmul.mubr.f32.vlgmr.msra.gmra.mxu1 %v1434_v60  ;;  %v696_v59 = vld [vmem:[%s11788_s28 + $0xc60] sm:$0x3]  ;;  %v698_v60 = vld [vmem:[%s11788_s28 + $0xc70] sm:$0x3] }
 0x171   : > { %v3407_v28 = vadd.f32 %v3406_v26, %v3337_v12  ;;  %6869 = vmatpush1.xpose.msra.mxu0 %v688_v18  ;;  %6939 = vmatpush1.xpose.msra.mxu1 %v690_v20  ;;  %v1495_v12 = vrot.slane %v272_v58, %v11812_v19  ;;  %v447_v18 = vld [vmem:[%s11788_s28 + $0x498] sm:$0xff]  ;;  %v453_v58 = vld [vmem:[%s11788_s28 + $0x4c8] sm:$0xff] }
 0x172   : > { %v3408_v29 = vpop.f32.mrf.mxu0  ;;  %v3478_v30 = vpop.f32.mrf.mxu1  ;;  %6870 = vmatprep.subr.mxu0 %v433_v21  ;;  %6940 = vmatprep.subr.mxu1 %v435_v22  ;;  %v1504_v21 = vcombine.high %v1502_v13, %v1502_v13  ;;  %v1505_v22 = vcombine.high %v273_v14, %v273_v14 }
 0x173   : > { %v3477_v33 = vadd.f32 %v3476_v27, %v3407_v28  ;;  %6904 = vmatprep.mubr.f32.mxu0 %v1452_v23  ;;  %6974 = vmatprep.mubr.f32.mxu1 %v1453_v24  ;;  %v1503_v20 = vcombine.high %v1495_v12, %v1495_v12  ;;  %v444_v28 = vld [vmem:[%s11788_s28 + $0x480] sm:$0xff]  ;;  %v446_v29 = vld [vmem:[%s11788_s28 + $0x490] sm:$0xff] }
 0x175   : > { %6871 = vmatpush1.xpose.msra.mxu0 %v432_v31  ;;  %6941 = vmatpush1.xpose.msra.mxu1 %v434_v32  ;;  %v705_v31 = vld [vmem:[%s11788_s28 + $0xca8] sm:$0x3]  ;;  %v707_v32 = vld [vmem:[%s11788_s28 + $0xcb8] sm:$0x3] }
 0x176   : > { %7008 = vmatprep.subr.mxu0 %v693_v34  ;;  %7078 = vmatprep.subr.mxu1 %v695_v35  ;;  %v1519_v34 = vrot.slane %v1505_v22, %v11812_v19  ;;  %v274_v35 = vld [vmem:[%s11781_s30 + $0x130] sm:$0xff] }
 0x178   : > { %v3546_v46 = vpop.f32.mrf.mxu0  ;;  %6905 = vmatmul.mubr.f32.vlgmr.msra.gmra.mxu0 %v1444_v15  ;;  %v3616_v47 = vpop.f32.mrf.mxu1  ;;  %6975 = vmatmul.mubr.f32.vlgmr.msra.gmra.mxu1 %v1451_v16  ;;  %v700_v15 = vld [vmem:[%s11788_s28 + $0xc80] sm:$0x3]  ;;  %v702_v16 = vld [vmem:[%s11788_s28 + $0xc90] sm:$0x3] }
 0x179   : > { %v3547_v48 = vadd.f32 %v3546_v46, %v3477_v33  ;;  %7009 = vmatpush1.xpose.msra.mxu0 %v692_v39  ;;  %7079 = vmatpush1.xpose.msra.mxu1 %v694_v40  ;;  %v1512_v33 = vrot.slane %v273_v14, %v11812_v19  ;;  %v451_v39 = vld [vmem:[%s11788_s28 + $0x4b8] sm:$0xff]  ;;  %v457_v14 = vld [vmem:[%s11788_s28 + $0x4e8] sm:$0xff] }
 0x17a   : > { %v3548_v49 = vpop.f32.mrf.mxu0  ;;  %v3618_v50 = vpop.f32.mrf.mxu1  ;;  %7010 = vmatprep.subr.mxu0 %v437_v41  ;;  %7080 = vmatprep.subr.mxu1 %v439_v42  ;;  %v1521_v41 = vcombine.high %v1519_v34, %v1519_v34  ;;  %v1522_v42 = vcombine.high %v274_v35, %v274_v35 }
 0x17b   : > { %v3617_v53 = vadd.f32 %v3616_v47, %v3547_v48  ;;  %7044 = vmatprep.mubr.f32.mxu0 %v1469_v43  ;;  %7114 = vmatprep.mubr.f32.mxu1 %v1470_v44  ;;  %v1520_v40 = vcombine.high %v1512_v33, %v1512_v33  ;;  %v448_v48 = vld [vmem:[%s11788_s28 + $0x4a0] sm:$0xff]  ;;  %v450_v49 = vld [vmem:[%s11788_s28 + $0x4b0] sm:$0xff] }
 0x17d   : > { %7011 = vmatpush1.xpose.msra.mxu0 %v436_v51  ;;  %7081 = vmatpush1.xpose.msra.mxu1 %v438_v52  ;;  %v709_v51 = vld [vmem:[%s11788_s28 + $0xcc8] sm:$0x3]  ;;  %v711_v52 = vld [vmem:[%s11788_s28 + $0xcd8] sm:$0x3] }
 0x17e   : > { %7148 = vmatprep.subr.mxu0 %v697_v54  ;;  %7218 = vmatprep.subr.mxu1 %v699_v55  ;;  %v1536_v54 = vrot.slane %v1522_v42, %v11812_v19  ;;  %v275_v55 = vld [vmem:[%s11781_s30 + $0x138] sm:$0xff] }
 0x180   : > { %v3686_v2 = vpop.f32.mrf.mxu0  ;;  %7045 = vmatmul.mubr.f32.vlgmr.msra.gmra.mxu0 %v1461_v36  ;;  %v3756_v3 = vpop.f32.mrf.mxu1  ;;  %7115 = vmatmul.mubr.f32.vlgmr.msra.gmra.mxu1 %v1468_v37  ;;  %v704_v36 = vld [vmem:[%s11788_s28 + $0xca0] sm:$0x3]  ;;  %v706_v37 = vld [vmem:[%s11788_s28 + $0xcb0] sm:$0x3] }
 0x181   : > { %v3687_v4 = vadd.f32 %v3686_v2, %v3617_v53  ;;  %7149 = vmatpush1.xpose.msra.mxu0 %v696_v59  ;;  %7219 = vmatpush1.xpose.msra.mxu1 %v698_v60  ;;  %v1529_v53 = vrot.slane %v274_v35, %v11812_v19  ;;  %v455_v59 = vld [vmem:[%s11788_s28 + $0x4d8] sm:$0xff]  ;;  %v461_v35 = vld [vmem:[%s11788_s28 + $0x508] sm:$0xff] }
 0x182   : > { %v3688_v5 = vpop.f32.mrf.mxu0  ;;  %v3758_v6 = vpop.f32.mrf.mxu1  ;;  %7150 = vmatprep.subr.mxu0 %v441_v61  ;;  %7220 = vmatprep.subr.mxu1 %v443_v62  ;;  %v1538_v61 = vcombine.high %v1536_v54, %v1536_v54  ;;  %v1539_v62 = vcombine.high %v275_v55, %v275_v55 }
 0x183   : > { %v3757_v9 = vadd.f32 %v3756_v3, %v3687_v4  ;;  %7184 = vmatprep.mubr.f32.mxu0 %v1486_v63  ;;  %7254 = vmatprep.mubr.f32.mxu1 %v1487_v0  ;;  %v1537_v60 = vcombine.high %v1529_v53, %v1529_v53  ;;  %v452_v4 = vld [vmem:[%s11788_s28 + $0x4c0] sm:$0xff]  ;;  %v454_v5 = vld [vmem:[%s11788_s28 + $0x4d0] sm:$0xff] }
 0x185   : > { %7151 = vmatpush1.xpose.msra.mxu0 %v440_v7  ;;  %7221 = vmatpush1.xpose.msra.mxu1 %v442_v8  ;;  %v713_v7 = vld [vmem:[%s11788_s28 + $0xce8] sm:$0x3]  ;;  %v715_v8 = vld [vmem:[%s11788_s28 + $0xcf8] sm:$0x3] }
 0x186   : > { %7288 = vmatprep.subr.mxu0 %v701_v10  ;;  %7358 = vmatprep.subr.mxu1 %v703_v11  ;;  %v1553_v10 = vrot.slane %v1539_v62, %v11812_v19  ;;  %v276_v11 = vld [vmem:[%s11781_s30 + $0x140] sm:$0xff] }
 0x188   : > { %v3826_v23 = vpop.f32.mrf.mxu0  ;;  %7185 = vmatmul.mubr.f32.vlgmr.msra.gmra.mxu0 %v1478_v56  ;;  %v3896_v24 = vpop.f32.mrf.mxu1  ;;  %7255 = vmatmul.mubr.f32.vlgmr.msra.gmra.mxu1 %v1485_v57  ;;  %v708_v56 = vld [vmem:[%s11788_s28 + $0xcc0] sm:$0x3]  ;;  %v710_v57 = vld [vmem:[%s11788_s28 + $0xcd0] sm:$0x3] }
 0x189   : > { %v3827_v25 = vadd.f32 %v3826_v23, %v3757_v9  ;;  %7289 = vmatpush1.xpose.msra.mxu0 %v700_v15  ;;  %7359 = vmatpush1.xpose.msra.mxu1 %v702_v16  ;;  %v1546_v9 = vrot.slane %v275_v55, %v11812_v19  ;;  %v459_v15 = vld [vmem:[%s11788_s28 + $0x4f8] sm:$0xff]  ;;  %v465_v55 = vld [vmem:[%s11788_s28 + $0x528] sm:$0xff] }
 0x18a   : > { %v3828_v26 = vpop.f32.mrf.mxu0  ;;  %v3898_v27 = vpop.f32.mrf.mxu1  ;;  %7290 = vmatprep.subr.mxu0 %v445_v17  ;;  %7360 = vmatprep.subr.mxu1 %v447_v18  ;;  %v1555_v17 = vcombine.high %v1553_v10, %v1553_v10  ;;  %v1556_v18 = vcombine.high %v276_v11, %v276_v11 }
 0x18b   : > { %v3897_v30 = vadd.f32 %v3896_v24, %v3827_v25  ;;  %7324 = vmatprep.mubr.f32.mxu0 %v1503_v20  ;;  %7394 = vmatprep.mubr.f32.mxu1 %v1504_v21  ;;  %v1554_v16 = vcombine.high %v1546_v9, %v1546_v9  ;;  %v456_v25 = vld [vmem:[%s11788_s28 + $0x4e0] sm:$0xff]  ;;  %v458_v26 = vld [vmem:[%s11788_s28 + $0x4f0] sm:$0xff] }
 0x18d   : > { %7291 = vmatpush1.xpose.msra.mxu0 %v444_v28  ;;  %7361 = vmatpush1.xpose.msra.mxu1 %v446_v29  ;;  %v717_v28 = vld [vmem:[%s11788_s28 + $0xd08] sm:$0x3]  ;;  %v719_v29 = vld [vmem:[%s11788_s28 + $0xd18] sm:$0x3] }
 0x18e   : > { %7428 = vmatprep.subr.mxu0 %v705_v31  ;;  %7498 = vmatprep.subr.mxu1 %v707_v32  ;;  %v1570_v31 = vrot.slane %v1556_v18, %v11812_v19  ;;  %v277_v32 = vld [vmem:[%s11781_s30 + $0x148] sm:$0xff] }
 0x190   : > { %v3966_v43 = vpop.f32.mrf.mxu0  ;;  %7325 = vmatmul.mubr.f32.vlgmr.msra.gmra.mxu0 %v1495_v12  ;;  %v4036_v44 = vpop.f32.mrf.mxu1  ;;  %7395 = vmatmul.mubr.f32.vlgmr.msra.gmra.mxu1 %v1502_v13  ;;  %v712_v12 = vld [vmem:[%s11788_s28 + $0xce0] sm:$0x3]  ;;  %v714_v13 = vld [vmem:[%s11788_s28 + $0xcf0] sm:$0x3] }
 0x191   : > { %v3967_v45 = vadd.f32 %v3966_v43, %v3897_v30  ;;  %7429 = vmatpush1.xpose.msra.mxu0 %v704_v36  ;;  %7499 = vmatpush1.xpose.msra.mxu1 %v706_v37  ;;  %v1563_v30 = vrot.slane %v276_v11, %v11812_v19  ;;  %v463_v36 = vld [vmem:[%s11788_s28 + $0x518] sm:$0xff]  ;;  %v469_v11 = vld [vmem:[%s11788_s28 + $0x548] sm:$0xff] }
 0x192   : > { %v3968_v46 = vpop.f32.mrf.mxu0  ;;  %v4038_v47 = vpop.f32.mrf.mxu1  ;;  %7430 = vmatprep.subr.mxu0 %v449_v38  ;;  %7500 = vmatprep.subr.mxu1 %v451_v39  ;;  %v1572_v38 = vcombine.high %v1570_v31, %v1570_v31  ;;  %v1573_v39 = vcombine.high %v277_v32, %v277_v32 }
 0x193   : > { %v4037_v50 = vadd.f32 %v4036_v44, %v3967_v45  ;;  %7464 = vmatprep.mubr.f32.mxu0 %v1520_v40  ;;  %7534 = vmatprep.mubr.f32.mxu1 %v1521_v41  ;;  %v1571_v37 = vcombine.high %v1563_v30, %v1563_v30  ;;  %v460_v45 = vld [vmem:[%s11788_s28 + $0x500] sm:$0xff]  ;;  %v462_v46 = vld [vmem:[%s11788_s28 + $0x510] sm:$0xff] }
 0x195   : > { %7431 = vmatpush1.xpose.msra.mxu0 %v448_v48  ;;  %7501 = vmatpush1.xpose.msra.mxu1 %v450_v49  ;;  %v721_v48 = vld [vmem:[%s11788_s28 + $0xd28] sm:$0x3]  ;;  %v723_v49 = vld [vmem:[%s11788_s28 + $0xd38] sm:$0x3] }
 0x196   : > { %7568 = vmatprep.subr.mxu0 %v709_v51  ;;  %7638 = vmatprep.subr.mxu1 %v711_v52  ;;  %v1587_v51 = vrot.slane %v1573_v39, %v11812_v19  ;;  %v278_v52 = vld [vmem:[%s11781_s30 + $0x150] sm:$0xff] }
 0x198   : > { %v4106_v63 = vpop.f32.mrf.mxu0  ;;  %7465 = vmatmul.mubr.f32.vlgmr.msra.gmra.mxu0 %v1512_v33  ;;  %v4176_v0 = vpop.f32.mrf.mxu1  ;;  %7535 = vmatmul.mubr.f32.vlgmr.msra.gmra.mxu1 %v1519_v34  ;;  %v716_v33 = vld [vmem:[%s11788_s28 + $0xd00] sm:$0x3]  ;;  %v718_v34 = vld [vmem:[%s11788_s28 + $0xd10] sm:$0x3] }
 0x199   : > { %v4107_v1 = vadd.f32 %v4106_v63, %v4037_v50  ;;  %7569 = vmatpush1.xpose.msra.mxu0 %v708_v56  ;;  %7639 = vmatpush1.xpose.msra.mxu1 %v710_v57  ;;  %v1580_v50 = vrot.slane %v277_v32, %v11812_v19  ;;  %v467_v56 = vld [vmem:[%s11788_s28 + $0x538] sm:$0xff]  ;;  %v473_v32 = vld [vmem:[%s11788_s28 + $0x568] sm:$0xff] }
 0x19a   : > { %v4108_v2 = vpop.f32.mrf.mxu0  ;;  %v4178_v3 = vpop.f32.mrf.mxu1  ;;  %7570 = vmatprep.subr.mxu0 %v453_v58  ;;  %7640 = vmatprep.subr.mxu1 %v455_v59  ;;  %v1589_v58 = vcombine.high %v1587_v51, %v1587_v51  ;;  %v1590_v59 = vcombine.high %v278_v52, %v278_v52 }
 0x19b   : > { %v4177_v6 = vadd.f32 %v4176_v0, %v4107_v1  ;;  %7604 = vmatprep.mubr.f32.mxu0 %v1537_v60  ;;  %7674 = vmatprep.mubr.f32.mxu1 %v1538_v61  ;;  %v1588_v57 = vcombine.high %v1580_v50, %v1580_v50  ;;  %v464_v1 = vld [vmem:[%s11788_s28 + $0x520] sm:$0xff]  ;;  %v466_v2 = vld [vmem:[%s11788_s28 + $0x530] sm:$0xff] }
 0x19d   : > { %7571 = vmatpush1.xpose.msra.mxu0 %v452_v4  ;;  %7641 = vmatpush1.xpose.msra.mxu1 %v454_v5  ;;  %v725_v4 = vld [vmem:[%s11788_s28 + $0xd48] sm:$0x3]  ;;  %v727_v5 = vld [vmem:[%s11788_s28 + $0xd58] sm:$0x3] }
 0x19e   : > { %7708 = vmatprep.subr.mxu0 %v713_v7  ;;  %7778 = vmatprep.subr.mxu1 %v715_v8  ;;  %v1604_v7 = vrot.slane %v1590_v59, %v11812_v19  ;;  %v279_v8 = vld [vmem:[%s11781_s30 + $0x158] sm:$0xff] }
 0x1a0   : > { %v4246_v20 = vpop.f32.mrf.mxu0  ;;  %7605 = vmatmul.mubr.f32.vlgmr.msra.gmra.mxu0 %v1529_v53  ;;  %v4316_v21 = vpop.f32.mrf.mxu1  ;;  %7675 = vmatmul.mubr.f32.vlgmr.msra.gmra.mxu1 %v1536_v54  ;;  %v720_v53 = vld [vmem:[%s11788_s28 + $0xd20] sm:$0x3]  ;;  %v722_v54 = vld [vmem:[%s11788_s28 + $0xd30] sm:$0x3] }
 0x1a1   : > { %v4247_v22 = vadd.f32 %v4246_v20, %v4177_v6  ;;  %7709 = vmatpush1.xpose.msra.mxu0 %v712_v12  ;;  %7779 = vmatpush1.xpose.msra.mxu1 %v714_v13  ;;  %v1597_v6 = vrot.slane %v278_v52, %v11812_v19  ;;  %v471_v12 = vld [vmem:[%s11788_s28 + $0x558] sm:$0xff]  ;;  %v477_v52 = vld [vmem:[%s11788_s28 + $0x588] sm:$0xff] }
 0x1a2   : > { %v4248_v23 = vpop.f32.mrf.mxu0  ;;  %v4318_v24 = vpop.f32.mrf.mxu1  ;;  %7710 = vmatprep.subr.mxu0 %v457_v14  ;;  %7780 = vmatprep.subr.mxu1 %v459_v15  ;;  %v1606_v14 = vcombine.high %v1604_v7, %v1604_v7  ;;  %v1607_v15 = vcombine.high %v279_v8, %v279_v8 }
 0x1a3   : > { %v4317_v27 = vadd.f32 %v4316_v21, %v4247_v22  ;;  %7744 = vmatprep.mubr.f32.mxu0 %v1554_v16  ;;  %7814 = vmatprep.mubr.f32.mxu1 %v1555_v17  ;;  %v1605_v13 = vcombine.high %v1597_v6, %v1597_v6  ;;  %v468_v22 = vld [vmem:[%s11788_s28 + $0x540] sm:$0xff]  ;;  %v470_v23 = vld [vmem:[%s11788_s28 + $0x550] sm:$0xff] }
 0x1a5   : > { %7711 = vmatpush1.xpose.msra.mxu0 %v456_v25  ;;  %7781 = vmatpush1.xpose.msra.mxu1 %v458_v26  ;;  %v729_v25 = vld [vmem:[%s11788_s28 + $0xd68] sm:$0x3]  ;;  %v731_v26 = vld [vmem:[%s11788_s28 + $0xd78] sm:$0x3] }
 0x1a6   : > { %7848 = vmatprep.subr.mxu0 %v717_v28  ;;  %7918 = vmatprep.subr.mxu1 %v719_v29  ;;  %v1621_v28 = vrot.slane %v1607_v15, %v11812_v19  ;;  %v280_v29 = vld [vmem:[%s11781_s30 + $0x160] sm:$0xff] }
 0x1a8   : > { %v4386_v40 = vpop.f32.mrf.mxu0  ;;  %7745 = vmatmul.mubr.f32.vlgmr.msra.gmra.mxu0 %v1546_v9  ;;  %v4456_v41 = vpop.f32.mrf.mxu1  ;;  %7815 = vmatmul.mubr.f32.vlgmr.msra.gmra.mxu1 %v1553_v10  ;;  %v724_v9 = vld [vmem:[%s11788_s28 + $0xd40] sm:$0x3]  ;;  %v726_v10 = vld [vmem:[%s11788_s28 + $0xd50] sm:$0x3] }
 0x1a9   : > { %v4387_v42 = vadd.f32 %v4386_v40, %v4317_v27  ;;  %7849 = vmatpush1.xpose.msra.mxu0 %v716_v33  ;;  %7919 = vmatpush1.xpose.msra.mxu1 %v718_v34  ;;  %v1614_v27 = vrot.slane %v279_v8, %v11812_v19  ;;  %v475_v33 = vld [vmem:[%s11788_s28 + $0x578] sm:$0xff]  ;;  %v481_v8 = vld [vmem:[%s11788_s28 + $0x5a8] sm:$0xff] }
 0x1aa   : > { %v4388_v43 = vpop.f32.mrf.mxu0  ;;  %v4458_v44 = vpop.f32.mrf.mxu1  ;;  %7850 = vmatprep.subr.mxu0 %v461_v35  ;;  %7920 = vmatprep.subr.mxu1 %v463_v36  ;;  %v1623_v35 = vcombine.high %v1621_v28, %v1621_v28  ;;  %v1624_v36 = vcombine.high %v280_v29, %v280_v29 }
 0x1ab   : > { %v4457_v47 = vadd.f32 %v4456_v41, %v4387_v42  ;;  %7884 = vmatprep.mubr.f32.mxu0 %v1571_v37  ;;  %7954 = vmatprep.mubr.f32.mxu1 %v1572_v38  ;;  %v1622_v34 = vcombine.high %v1614_v27, %v1614_v27  ;;  %v472_v42 = vld [vmem:[%s11788_s28 + $0x560] sm:$0xff]  ;;  %v474_v43 = vld [vmem:[%s11788_s28 + $0x570] sm:$0xff] }
 0x1ad   : > { %7851 = vmatpush1.xpose.msra.mxu0 %v460_v45  ;;  %7921 = vmatpush1.xpose.msra.mxu1 %v462_v46  ;;  %v733_v45 = vld [vmem:[%s11788_s28 + $0xd88] sm:$0x3]  ;;  %v735_v46 = vld [vmem:[%s11788_s28 + $0xd98] sm:$0x3] }
 0x1ae   : > { %7988 = vmatprep.subr.mxu0 %v721_v48  ;;  %8058 = vmatprep.subr.mxu1 %v723_v49  ;;  %v1638_v48 = vrot.slane %v1624_v36, %v11812_v19  ;;  %v281_v49 = vld [vmem:[%s11781_s30 + $0x168] sm:$0xff] }
 0x1b0   : > { %v4526_v60 = vpop.f32.mrf.mxu0  ;;  %7885 = vmatmul.mubr.f32.vlgmr.msra.gmra.mxu0 %v1563_v30  ;;  %v4596_v61 = vpop.f32.mrf.mxu1  ;;  %7955 = vmatmul.mubr.f32.vlgmr.msra.gmra.mxu1 %v1570_v31  ;;  %v728_v30 = vld [vmem:[%s11788_s28 + $0xd60] sm:$0x3]  ;;  %v730_v31 = vld [vmem:[%s11788_s28 + $0xd70] sm:$0x3] }
 0x1b1   : > { %v4527_v62 = vadd.f32 %v4526_v60, %v4457_v47  ;;  %7989 = vmatpush1.xpose.msra.mxu0 %v720_v53  ;;  %8059 = vmatpush1.xpose.msra.mxu1 %v722_v54  ;;  %v1631_v47 = vrot.slane %v280_v29, %v11812_v19  ;;  %v479_v53 = vld [vmem:[%s11788_s28 + $0x598] sm:$0xff]  ;;  %v485_v29 = vld [vmem:[%s11788_s28 + $0x5c8] sm:$0xff] }
 0x1b2   : > { %v4528_v63 = vpop.f32.mrf.mxu0  ;;  %v4598_v0 = vpop.f32.mrf.mxu1  ;;  %7990 = vmatprep.subr.mxu0 %v465_v55  ;;  %8060 = vmatprep.subr.mxu1 %v467_v56  ;;  %v1640_v55 = vcombine.high %v1638_v48, %v1638_v48  ;;  %v1641_v56 = vcombine.high %v281_v49, %v281_v49 }
 0x1b3   : > { %v4597_v3 = vadd.f32 %v4596_v61, %v4527_v62  ;;  %8024 = vmatprep.mubr.f32.mxu0 %v1588_v57  ;;  %8094 = vmatprep.mubr.f32.mxu1 %v1589_v58  ;;  %v1639_v54 = vcombine.high %v1631_v47, %v1631_v47  ;;  %v476_v62 = vld [vmem:[%s11788_s28 + $0x580] sm:$0xff]  ;;  %v478_v63 = vld [vmem:[%s11788_s28 + $0x590] sm:$0xff] }
 0x1b5   : > { %7991 = vmatpush1.xpose.msra.mxu0 %v464_v1  ;;  %8061 = vmatpush1.xpose.msra.mxu1 %v466_v2  ;;  %v737_v1 = vld [vmem:[%s11788_s28 + $0xda8] sm:$0x3]  ;;  %v739_v2 = vld [vmem:[%s11788_s28 + $0xdb8] sm:$0x3] }
 0x1b6   : > { %8128 = vmatprep.subr.mxu0 %v725_v4  ;;  %8198 = vmatprep.subr.mxu1 %v727_v5  ;;  %v1655_v4 = vrot.slane %v1641_v56, %v11812_v19  ;;  %v282_v5 = vld [vmem:[%s11781_s30 + $0x170] sm:$0xff] }
 0x1b8   : > { %v4666_v16 = vpop.f32.mrf.mxu0  ;;  %8025 = vmatmul.mubr.f32.vlgmr.msra.gmra.mxu0 %v1580_v50  ;;  %v4736_v17 = vpop.f32.mrf.mxu1  ;;  %8095 = vmatmul.mubr.f32.vlgmr.msra.gmra.mxu1 %v1587_v51  ;;  %v732_v50 = vld [vmem:[%s11788_s28 + $0xd80] sm:$0x3]  ;;  %v734_v51 = vld [vmem:[%s11788_s28 + $0xd90] sm:$0x3] }
 0x1b9   : > { %v4667_v18 = vadd.f32 %v4666_v16, %v4597_v3  ;;  %8129 = vmatpush1.xpose.msra.mxu0 %v724_v9  ;;  %8199 = vmatpush1.xpose.msra.mxu1 %v726_v10  ;;  %v1648_v3 = vrot.slane %v281_v49, %v11812_v19  ;;  %v483_v9 = vld [vmem:[%s11788_s28 + $0x5b8] sm:$0xff]  ;;  %v489_v49 = vld [vmem:[%s11788_s28 + $0x5e8] sm:$0xff] }
 0x1ba   : > { %v4668_v20 = vpop.f32.mrf.mxu0  ;;  %v4738_v21 = vpop.f32.mrf.mxu1  ;;  %8130 = vmatprep.subr.mxu0 %v469_v11  ;;  %8200 = vmatprep.subr.mxu1 %v471_v12  ;;  %v1657_v11 = vcombine.high %v1655_v4, %v1655_v4  ;;  %v1658_v12 = vcombine.high %v282_v5, %v282_v5 }
 0x1bb   : > { %v4737_v24 = vadd.f32 %v4736_v17, %v4667_v18  ;;  %8164 = vmatprep.mubr.f32.mxu0 %v1605_v13  ;;  %8234 = vmatprep.mubr.f32.mxu1 %v1606_v14  ;;  %v1656_v10 = vcombine.high %v1648_v3, %v1648_v3  ;;  %v480_v18 = vld [vmem:[%s11788_s28 + $0x5a0] sm:$0xff]  ;;  %v482_v20 = vld [vmem:[%s11788_s28 + $0x5b0] sm:$0xff] }
 0x1bd   : > { %8131 = vmatpush1.xpose.msra.mxu0 %v468_v22  ;;  %8201 = vmatpush1.xpose.msra.mxu1 %v470_v23  ;;  %v741_v22 = vld [vmem:[%s11788_s28 + $0xdc8] sm:$0x3]  ;;  %v743_v23 = vld [vmem:[%s11788_s28 + $0xdd8] sm:$0x3] }
 0x1be   : > { %8268 = vmatprep.subr.mxu0 %v729_v25  ;;  %8338 = vmatprep.subr.mxu1 %v731_v26  ;;  %v1672_v25 = vrot.slane %v1658_v12, %v11812_v19  ;;  %v283_v26 = vld [vmem:[%s11781_s30 + $0x178] sm:$0xff] }
 0x1c0   : > { %v4806_v37 = vpop.f32.mrf.mxu0  ;;  %8165 = vmatmul.mubr.f32.vlgmr.msra.gmra.mxu0 %v1597_v6  ;;  %v4876_v38 = vpop.f32.mrf.mxu1  ;;  %8235 = vmatmul.mubr.f32.vlgmr.msra.gmra.mxu1 %v1604_v7  ;;  %v736_v6 = vld [vmem:[%s11788_s28 + $0xda0] sm:$0x3]  ;;  %v738_v7 = vld [vmem:[%s11788_s28 + $0xdb0] sm:$0x3] }
 0x1c1   : > { %v4807_v39 = vadd.f32 %v4806_v37, %v4737_v24  ;;  %8269 = vmatpush1.xpose.msra.mxu0 %v728_v30  ;;  %8339 = vmatpush1.xpose.msra.mxu1 %v730_v31  ;;  %v1665_v24 = vrot.slane %v282_v5, %v11812_v19  ;;  %v487_v30 = vld [vmem:[%s11788_s28 + $0x5d8] sm:$0xff]  ;;  %v493_v5 = vld [vmem:[%s11788_s28 + $0x608] sm:$0xff] }
 0x1c2   : > { %v4808_v40 = vpop.f32.mrf.mxu0  ;;  %v4878_v41 = vpop.f32.mrf.mxu1  ;;  %8270 = vmatprep.subr.mxu0 %v473_v32  ;;  %8340 = vmatprep.subr.mxu1 %v475_v33  ;;  %v1674_v32 = vcombine.high %v1672_v25, %v1672_v25  ;;  %v1675_v33 = vcombine.high %v283_v26, %v283_v26 }
 0x1c3   : > { %v4877_v44 = vadd.f32 %v4876_v38, %v4807_v39  ;;  %8304 = vmatprep.mubr.f32.mxu0 %v1622_v34  ;;  %8374 = vmatprep.mubr.f32.mxu1 %v1623_v35  ;;  %v1673_v31 = vcombine.high %v1665_v24, %v1665_v24  ;;  %v484_v39 = vld [vmem:[%s11788_s28 + $0x5c0] sm:$0xff]  ;;  %v486_v40 = vld [vmem:[%s11788_s28 + $0x5d0] sm:$0xff] }
 0x1c5   : > { %8271 = vmatpush1.xpose.msra.mxu0 %v472_v42  ;;  %8341 = vmatpush1.xpose.msra.mxu1 %v474_v43  ;;  %v745_v42 = vld [vmem:[%s11788_s28 + $0xde8] sm:$0x3]  ;;  %v747_v43 = vld [vmem:[%s11788_s28 + $0xdf8] sm:$0x3] }
 0x1c6   : > { %8408 = vmatprep.subr.mxu0 %v733_v45  ;;  %8478 = vmatprep.subr.mxu1 %v735_v46  ;;  %v1689_v45 = vrot.slane %v1675_v33, %v11812_v19  ;;  %v284_v46 = vld [vmem:[%s11781_s30 + $0x180] sm:$0xff] }
 0x1c8   : > { %v4946_v57 = vpop.f32.mrf.mxu0  ;;  %8305 = vmatmul.mubr.f32.vlgmr.msra.gmra.mxu0 %v1614_v27  ;;  %v5016_v58 = vpop.f32.mrf.mxu1  ;;  %8375 = vmatmul.mubr.f32.vlgmr.msra.gmra.mxu1 %v1621_v28  ;;  %v740_v27 = vld [vmem:[%s11788_s28 + $0xdc0] sm:$0x3]  ;;  %v742_v28 = vld [vmem:[%s11788_s28 + $0xdd0] sm:$0x3] }
 0x1c9   : > { %v4947_v59 = vadd.f32 %v4946_v57, %v4877_v44  ;;  %8409 = vmatpush1.xpose.msra.mxu0 %v732_v50  ;;  %8479 = vmatpush1.xpose.msra.mxu1 %v734_v51  ;;  %v1682_v44 = vrot.slane %v283_v26, %v11812_v19  ;;  %v491_v50 = vld [vmem:[%s11788_s28 + $0x5f8] sm:$0xff]  ;;  %v497_v26 = vld [vmem:[%s11788_s28 + $0x628] sm:$0xff] }
 0x1ca   : > { %v4948_v60 = vpop.f32.mrf.mxu0  ;;  %v5018_v61 = vpop.f32.mrf.mxu1  ;;  %8410 = vmatprep.subr.mxu0 %v477_v52  ;;  %8480 = vmatprep.subr.mxu1 %v479_v53  ;;  %v1691_v52 = vcombine.high %v1689_v45, %v1689_v45  ;;  %v1692_v53 = vcombine.high %v284_v46, %v284_v46 }
 0x1cb   : > { %v5017_v0 = vadd.f32 %v5016_v58, %v4947_v59  ;;  %8444 = vmatprep.mubr.f32.mxu0 %v1639_v54  ;;  %8514 = vmatprep.mubr.f32.mxu1 %v1640_v55  ;;  %v1690_v51 = vcombine.high %v1682_v44, %v1682_v44  ;;  %v488_v59 = vld [vmem:[%s11788_s28 + $0x5e0] sm:$0xff]  ;;  %v490_v60 = vld [vmem:[%s11788_s28 + $0x5f0] sm:$0xff] }
 0x1cd   : > { %8411 = vmatpush1.xpose.msra.mxu0 %v476_v62  ;;  %8481 = vmatpush1.xpose.msra.mxu1 %v478_v63  ;;  %v749_v62 = vld [vmem:[%s11788_s28 + $0xe08] sm:$0x3]  ;;  %v751_v63 = vld [vmem:[%s11788_s28 + $0xe18] sm:$0x3] }
 0x1ce   : > { %8548 = vmatprep.subr.mxu0 %v737_v1  ;;  %8618 = vmatprep.subr.mxu1 %v739_v2  ;;  %v1706_v1 = vrot.slane %v1692_v53, %v11812_v19  ;;  %v285_v2 = vld [vmem:[%s11781_s30 + $0x188] sm:$0xff] }
 0x1d0   : > { %v5086_v13 = vpop.f32.mrf.mxu0  ;;  %8445 = vmatmul.mubr.f32.vlgmr.msra.gmra.mxu0 %v1631_v47  ;;  %v5156_v14 = vpop.f32.mrf.mxu1  ;;  %8515 = vmatmul.mubr.f32.vlgmr.msra.gmra.mxu1 %v1638_v48  ;;  %v744_v47 = vld [vmem:[%s11788_s28 + $0xde0] sm:$0x3]  ;;  %v746_v48 = vld [vmem:[%s11788_s28 + $0xdf0] sm:$0x3] }
 0x1d1   : > { %v5087_v15 = vadd.f32 %v5086_v13, %v5017_v0  ;;  %8549 = vmatpush1.xpose.msra.mxu0 %v736_v6  ;;  %8619 = vmatpush1.xpose.msra.mxu1 %v738_v7  ;;  %v1699_v0 = vrot.slane %v284_v46, %v11812_v19  ;;  %v495_v6 = vld [vmem:[%s11788_s28 + $0x618] sm:$0xff]  ;;  %v501_v46 = vld [vmem:[%s11788_s28 + $0x648] sm:$0xff] }
 0x1d2   : > { %v5088_v16 = vpop.f32.mrf.mxu0  ;;  %v5158_v17 = vpop.f32.mrf.mxu1  ;;  %8550 = vmatprep.subr.mxu0 %v481_v8  ;;  %8620 = vmatprep.subr.mxu1 %v483_v9  ;;  %v1708_v8 = vcombine.high %v1706_v1, %v1706_v1  ;;  %v1709_v9 = vcombine.high %v285_v2, %v285_v2 }
 0x1d3   : > { %v5157_v21 = vadd.f32 %v5156_v14, %v5087_v15  ;;  %8584 = vmatprep.mubr.f32.mxu0 %v1656_v10  ;;  %8654 = vmatprep.mubr.f32.mxu1 %v1657_v11  ;;  %v1707_v7 = vcombine.high %v1699_v0, %v1699_v0  ;;  %v492_v15 = vld [vmem:[%s11788_s28 + $0x600] sm:$0xff]  ;;  %v494_v16 = vld [vmem:[%s11788_s28 + $0x610] sm:$0xff] }
 0x1d5   : > { %8551 = vmatpush1.xpose.msra.mxu0 %v480_v18  ;;  %8621 = vmatpush1.xpose.msra.mxu1 %v482_v20  ;;  %v753_v18 = vld [vmem:[%s11788_s28 + $0xe28] sm:$0x3]  ;;  %v755_v20 = vld [vmem:[%s11788_s28 + $0xe38] sm:$0x3] }
 0x1d6   : > { %8688 = vmatprep.subr.mxu0 %v741_v22  ;;  %8758 = vmatprep.subr.mxu1 %v743_v23  ;;  %v1723_v22 = vrot.slane %v1709_v9, %v11812_v19  ;;  %v286_v23 = vld [vmem:[%s11781_s30 + $0x190] sm:$0xff] }
 0x1d8   : > { %v5226_v34 = vpop.f32.mrf.mxu0  ;;  %8585 = vmatmul.mubr.f32.vlgmr.msra.gmra.mxu0 %v1648_v3  ;;  %v5296_v35 = vpop.f32.mrf.mxu1  ;;  %8655 = vmatmul.mubr.f32.vlgmr.msra.gmra.mxu1 %v1655_v4  ;;  %v748_v3 = vld [vmem:[%s11788_s28 + $0xe00] sm:$0x3]  ;;  %v750_v4 = vld [vmem:[%s11788_s28 + $0xe10] sm:$0x3] }
 0x1d9   : > { %v5227_v36 = vadd.f32 %v5226_v34, %v5157_v21  ;;  %8689 = vmatpush1.xpose.msra.mxu0 %v740_v27  ;;  %8759 = vmatpush1.xpose.msra.mxu1 %v742_v28  ;;  %v1716_v21 = vrot.slane %v285_v2, %v11812_v19  ;;  %v499_v27 = vld [vmem:[%s11788_s28 + $0x638] sm:$0xff]  ;;  %v505_v2 = vld [vmem:[%s11788_s28 + $0x668] sm:$0xff] }
 0x1da   : > { %v5228_v37 = vpop.f32.mrf.mxu0  ;;  %v5298_v38 = vpop.f32.mrf.mxu1  ;;  %8690 = vmatprep.subr.mxu0 %v485_v29  ;;  %8760 = vmatprep.subr.mxu1 %v487_v30  ;;  %v1725_v29 = vcombine.high %v1723_v22, %v1723_v22  ;;  %v1726_v30 = vcombine.high %v286_v23, %v286_v23 }
 0x1db   : > { %v5297_v41 = vadd.f32 %v5296_v35, %v5227_v36  ;;  %8724 = vmatprep.mubr.f32.mxu0 %v1673_v31  ;;  %8794 = vmatprep.mubr.f32.mxu1 %v1674_v32  ;;  %v1724_v28 = vcombine.high %v1716_v21, %v1716_v21  ;;  %v496_v36 = vld [vmem:[%s11788_s28 + $0x620] sm:$0xff]  ;;  %v498_v37 = vld [vmem:[%s11788_s28 + $0x630] sm:$0xff] }
 0x1dd   : > { %8691 = vmatpush1.xpose.msra.mxu0 %v484_v39  ;;  %8761 = vmatpush1.xpose.msra.mxu1 %v486_v40  ;;  %v757_v39 = vld [vmem:[%s11788_s28 + $0xe48] sm:$0x3]  ;;  %v759_v40 = vld [vmem:[%s11788_s28 + $0xe58] sm:$0x3] }
 0x1de   : > { %8828 = vmatprep.subr.mxu0 %v745_v42  ;;  %8898 = vmatprep.subr.mxu1 %v747_v43  ;;  %v1740_v42 = vrot.slane %v1726_v30, %v11812_v19  ;;  %v287_v43 = vld [vmem:[%s11781_s30 + $0x198] sm:$0xff] }
 0x1e0   : > { %v5366_v54 = vpop.f32.mrf.mxu0  ;;  %8725 = vmatmul.mubr.f32.vlgmr.msra.gmra.mxu0 %v1665_v24  ;;  %v5436_v55 = vpop.f32.mrf.mxu1  ;;  %8795 = vmatmul.mubr.f32.vlgmr.msra.gmra.mxu1 %v1672_v25  ;;  %v752_v24 = vld [vmem:[%s11788_s28 + $0xe20] sm:$0x3]  ;;  %v754_v25 = vld [vmem:[%s11788_s28 + $0xe30] sm:$0x3] }
 0x1e1   : > { %v5367_v56 = vadd.f32 %v5366_v54, %v5297_v41  ;;  %8829 = vmatpush1.xpose.msra.mxu0 %v744_v47  ;;  %8899 = vmatpush1.xpose.msra.mxu1 %v746_v48  ;;  %v1733_v41 = vrot.slane %v286_v23, %v11812_v19  ;;  %v503_v47 = vld [vmem:[%s11788_s28 + $0x658] sm:$0xff]  ;;  %v509_v23 = vld [vmem:[%s11788_s28 + $0x688] sm:$0xff] }
 0x1e2   : > { %v5368_v57 = vpop.f32.mrf.mxu0  ;;  %v5438_v58 = vpop.f32.mrf.mxu1  ;;  %8830 = vmatprep.subr.mxu0 %v489_v49  ;;  %8900 = vmatprep.subr.mxu1 %v491_v50  ;;  %v1742_v49 = vcombine.high %v1740_v42, %v1740_v42  ;;  %v1743_v50 = vcombine.high %v287_v43, %v287_v43 }
 0x1e3   : > { %v5437_v61 = vadd.f32 %v5436_v55, %v5367_v56  ;;  %8864 = vmatprep.mubr.f32.mxu0 %v1690_v51  ;;  %8934 = vmatprep.mubr.f32.mxu1 %v1691_v52  ;;  %v1741_v48 = vcombine.high %v1733_v41, %v1733_v41  ;;  %v500_v56 = vld [vmem:[%s11788_s28 + $0x640] sm:$0xff]  ;;  %v502_v57 = vld [vmem:[%s11788_s28 + $0x650] sm:$0xff] }
 0x1e5   : > { %8831 = vmatpush1.xpose.msra.mxu0 %v488_v59  ;;  %8901 = vmatpush1.xpose.msra.mxu1 %v490_v60  ;;  %v761_v59 = vld [vmem:[%s11788_s28 + $0xe68] sm:$0x3]  ;;  %v763_v60 = vld [vmem:[%s11788_s28 + $0xe78] sm:$0x3] }
 0x1e6   : > { %8968 = vmatprep.subr.mxu0 %v749_v62  ;;  %9038 = vmatprep.subr.mxu1 %v751_v63  ;;  %v1757_v62 = vrot.slane %v1743_v50, %v11812_v19  ;;  %v288_v63 = vld [vmem:[%s11781_s30 + $0x1a0] sm:$0xff] }
 0x1e8   : > { %v5506_v10 = vpop.f32.mrf.mxu0  ;;  %8865 = vmatmul.mubr.f32.vlgmr.msra.gmra.mxu0 %v1682_v44  ;;  %v5576_v11 = vpop.f32.mrf.mxu1  ;;  %8935 = vmatmul.mubr.f32.vlgmr.msra.gmra.mxu1 %v1689_v45  ;;  %v756_v44 = vld [vmem:[%s11788_s28 + $0xe40] sm:$0x3]  ;;  %v758_v45 = vld [vmem:[%s11788_s28 + $0xe50] sm:$0x3] }
 0x1e9   : > { %v5507_v12 = vadd.f32 %v5506_v10, %v5437_v61  ;;  %8969 = vmatpush1.xpose.msra.mxu0 %v748_v3  ;;  %9039 = vmatpush1.xpose.msra.mxu1 %v750_v4  ;;  %v1750_v61 = vrot.slane %v287_v43, %v11812_v19  ;;  %v507_v3 = vld [vmem:[%s11788_s28 + $0x678] sm:$0xff]  ;;  %v513_v43 = vld [vmem:[%s11788_s28 + $0x6a8] sm:$0xff] }
 0x1ea   : > { %v5508_v13 = vpop.f32.mrf.mxu0  ;;  %v5578_v14 = vpop.f32.mrf.mxu1  ;;  %8970 = vmatprep.subr.mxu0 %v493_v5  ;;  %9040 = vmatprep.subr.mxu1 %v495_v6  ;;  %v1759_v5 = vcombine.high %v1757_v62, %v1757_v62  ;;  %v1760_v6 = vcombine.high %v288_v63, %v288_v63 }
 0x1eb   : > { %v5577_v17 = vadd.f32 %v5576_v11, %v5507_v12  ;;  %9004 = vmatprep.mubr.f32.mxu0 %v1707_v7  ;;  %9074 = vmatprep.mubr.f32.mxu1 %v1708_v8  ;;  %v1758_v4 = vcombine.high %v1750_v61, %v1750_v61  ;;  %v504_v12 = vld [vmem:[%s11788_s28 + $0x660] sm:$0xff]  ;;  %v506_v13 = vld [vmem:[%s11788_s28 + $0x670] sm:$0xff] }
 0x1ed   : > { %8971 = vmatpush1.xpose.msra.mxu0 %v492_v15  ;;  %9041 = vmatpush1.xpose.msra.mxu1 %v494_v16  ;;  %v765_v15 = vld [vmem:[%s11788_s28 + $0xe88] sm:$0x3]  ;;  %v767_v16 = vld [vmem:[%s11788_s28 + $0xe98] sm:$0x3] }
 0x1ee   : > { %9108 = vmatprep.subr.mxu0 %v753_v18  ;;  %9178 = vmatprep.subr.mxu1 %v755_v20  ;;  %v1774_v18 = vrot.slane %v1760_v6, %v11812_v19  ;;  %v289_v20 = vld [vmem:[%s11781_s30 + $0x1a8] sm:$0xff] }
 0x1f0   : > { %v5646_v31 = vpop.f32.mrf.mxu0  ;;  %9005 = vmatmul.mubr.f32.vlgmr.msra.gmra.mxu0 %v1699_v0  ;;  %v5716_v32 = vpop.f32.mrf.mxu1  ;;  %9075 = vmatmul.mubr.f32.vlgmr.msra.gmra.mxu1 %v1706_v1  ;;  %v760_v0 = vld [vmem:[%s11788_s28 + $0xe60] sm:$0x3]  ;;  %v762_v1 = vld [vmem:[%s11788_s28 + $0xe70] sm:$0x3] }
 0x1f1   : > { %v5647_v33 = vadd.f32 %v5646_v31, %v5577_v17  ;;  %9109 = vmatpush1.xpose.msra.mxu0 %v752_v24  ;;  %9179 = vmatpush1.xpose.msra.mxu1 %v754_v25  ;;  %v1767_v17 = vrot.slane %v288_v63, %v11812_v19  ;;  %v511_v24 = vld [vmem:[%s11788_s28 + $0x698] sm:$0xff]  ;;  %v517_v63 = vld [vmem:[%s11788_s28 + $0x6c8] sm:$0xff] }
 0x1f2   : > { %v5648_v34 = vpop.f32.mrf.mxu0  ;;  %v5718_v35 = vpop.f32.mrf.mxu1  ;;  %9110 = vmatprep.subr.mxu0 %v497_v26  ;;  %9180 = vmatprep.subr.mxu1 %v499_v27  ;;  %v1776_v26 = vcombine.high %v1774_v18, %v1774_v18  ;;  %v1777_v27 = vcombine.high %v289_v20, %v289_v20 }
 0x1f3   : > { %v5717_v38 = vadd.f32 %v5716_v32, %v5647_v33  ;;  %9144 = vmatprep.mubr.f32.mxu0 %v1724_v28  ;;  %9214 = vmatprep.mubr.f32.mxu1 %v1725_v29  ;;  %v1775_v25 = vcombine.high %v1767_v17, %v1767_v17  ;;  %v508_v33 = vld [vmem:[%s11788_s28 + $0x680] sm:$0xff]  ;;  %v510_v34 = vld [vmem:[%s11788_s28 + $0x690] sm:$0xff] }
 0x1f5   : > { %9111 = vmatpush1.xpose.msra.mxu0 %v496_v36  ;;  %9181 = vmatpush1.xpose.msra.mxu1 %v498_v37  ;;  %v769_v36 = vld [vmem:[%s11788_s28 + $0xea8] sm:$0x3]  ;;  %v771_v37 = vld [vmem:[%s11788_s28 + $0xeb8] sm:$0x3] }
 0x1f6   : > { %9248 = vmatprep.subr.mxu0 %v757_v39  ;;  %9318 = vmatprep.subr.mxu1 %v759_v40  ;;  %v1791_v39 = vrot.slane %v1777_v27, %v11812_v19  ;;  %v290_v40 = vld [vmem:[%s11781_s30 + $0x1b0] sm:$0xff] }
 0x1f8   : > { %v5786_v51 = vpop.f32.mrf.mxu0  ;;  %9145 = vmatmul.mubr.f32.vlgmr.msra.gmra.mxu0 %v1716_v21  ;;  %v5856_v52 = vpop.f32.mrf.mxu1  ;;  %9215 = vmatmul.mubr.f32.vlgmr.msra.gmra.mxu1 %v1723_v22  ;;  %v764_v21 = vld [vmem:[%s11788_s28 + $0xe80] sm:$0x3]  ;;  %v766_v22 = vld [vmem:[%s11788_s28 + $0xe90] sm:$0x3] }
 0x1f9   : > { %v5787_v53 = vadd.f32 %v5786_v51, %v5717_v38  ;;  %9249 = vmatpush1.xpose.msra.mxu0 %v756_v44  ;;  %9319 = vmatpush1.xpose.msra.mxu1 %v758_v45  ;;  %v1784_v38 = vrot.slane %v289_v20, %v11812_v19  ;;  %v515_v44 = vld [vmem:[%s11788_s28 + $0x6b8] sm:$0xff]  ;;  %v521_v20 = vld [vmem:[%s11788_s28 + $0x6e8] sm:$0xff] }
 0x1fa   : > { %v5788_v54 = vpop.f32.mrf.mxu0  ;;  %v5858_v55 = vpop.f32.mrf.mxu1  ;;  %9250 = vmatprep.subr.mxu0 %v501_v46  ;;  %9320 = vmatprep.subr.mxu1 %v503_v47  ;;  %v1793_v46 = vcombine.high %v1791_v39, %v1791_v39  ;;  %v1794_v47 = vcombine.high %v290_v40, %v290_v40 }
 0x1fb   : > { %v5857_v58 = vadd.f32 %v5856_v52, %v5787_v53  ;;  %9284 = vmatprep.mubr.f32.mxu0 %v1741_v48  ;;  %9354 = vmatprep.mubr.f32.mxu1 %v1742_v49  ;;  %v1792_v45 = vcombine.high %v1784_v38, %v1784_v38  ;;  %v512_v53 = vld [vmem:[%s11788_s28 + $0x6a0] sm:$0xff]  ;;  %v514_v54 = vld [vmem:[%s11788_s28 + $0x6b0] sm:$0xff] }
 0x1fd   : > { %9251 = vmatpush1.xpose.msra.mxu0 %v500_v56  ;;  %9321 = vmatpush1.xpose.msra.mxu1 %v502_v57  ;;  %v773_v56 = vld [vmem:[%s11788_s28 + $0xec8] sm:$0x3]  ;;  %v775_v57 = vld [vmem:[%s11788_s28 + $0xed8] sm:$0x3] }
 0x1fe   : > { %9388 = vmatprep.subr.mxu0 %v761_v59  ;;  %9458 = vmatprep.subr.mxu1 %v763_v60  ;;  %v1808_v59 = vrot.slane %v1794_v47, %v11812_v19  ;;  %v291_v60 = vld [vmem:[%s11781_s30 + $0x1b8] sm:$0xff] }
 0x200   : > { %v5926_v7 = vpop.f32.mrf.mxu0  ;;  %9285 = vmatmul.mubr.f32.vlgmr.msra.gmra.mxu0 %v1733_v41  ;;  %v5996_v8 = vpop.f32.mrf.mxu1  ;;  %9355 = vmatmul.mubr.f32.vlgmr.msra.gmra.mxu1 %v1740_v42  ;;  %v768_v41 = vld [vmem:[%s11788_s28 + $0xea0] sm:$0x3]  ;;  %v770_v42 = vld [vmem:[%s11788_s28 + $0xeb0] sm:$0x3] }
 0x201   : > { %v5927_v9 = vadd.f32 %v5926_v7, %v5857_v58  ;;  %9389 = vmatpush1.xpose.msra.mxu0 %v760_v0  ;;  %9459 = vmatpush1.xpose.msra.mxu1 %v762_v1  ;;  %v1801_v58 = vrot.slane %v290_v40, %v11812_v19  ;;  %v519_v0 = vld [vmem:[%s11788_s28 + $0x6d8] sm:$0xff]  ;;  %v525_v40 = vld [vmem:[%s11788_s28 + $0x708] sm:$0xff] }
 0x202   : > { %v5928_v10 = vpop.f32.mrf.mxu0  ;;  %v5998_v11 = vpop.f32.mrf.mxu1  ;;  %9390 = vmatprep.subr.mxu0 %v505_v2  ;;  %9460 = vmatprep.subr.mxu1 %v507_v3  ;;  %v1810_v2 = vcombine.high %v1808_v59, %v1808_v59  ;;  %v1811_v3 = vcombine.high %v291_v60, %v291_v60 }
 0x203   : > { %v5997_v14 = vadd.f32 %v5996_v8, %v5927_v9  ;;  %9424 = vmatprep.mubr.f32.mxu0 %v1758_v4  ;;  %9494 = vmatprep.mubr.f32.mxu1 %v1759_v5  ;;  %v1809_v1 = vcombine.high %v1801_v58, %v1801_v58  ;;  %v516_v9 = vld [vmem:[%s11788_s28 + $0x6c0] sm:$0xff]  ;;  %v518_v10 = vld [vmem:[%s11788_s28 + $0x6d0] sm:$0xff] }
 0x205   : > { %9391 = vmatpush1.xpose.msra.mxu0 %v504_v12  ;;  %9461 = vmatpush1.xpose.msra.mxu1 %v506_v13  ;;  %v777_v12 = vld [vmem:[%s11788_s28 + $0xee8] sm:$0x3]  ;;  %v779_v13 = vld [vmem:[%s11788_s28 + $0xef8] sm:$0x3] }
 0x206   : > { %9528 = vmatprep.subr.mxu0 %v765_v15  ;;  %9598 = vmatprep.subr.mxu1 %v767_v16  ;;  %v1825_v15 = vrot.slane %v1811_v3, %v11812_v19  ;;  %v292_v16 = vld [vmem:[%s11781_s30 + $0x1c0] sm:$0xff] }
 0x208   : > { %v6066_v28 = vpop.f32.mrf.mxu0  ;;  %9425 = vmatmul.mubr.f32.vlgmr.msra.gmra.mxu0 %v1750_v61  ;;  %v6136_v29 = vpop.f32.mrf.mxu1  ;;  %9495 = vmatmul.mubr.f32.vlgmr.msra.gmra.mxu1 %v1757_v62  ;;  %v772_v61 = vld [vmem:[%s11788_s28 + $0xec0] sm:$0x3]  ;;  %v774_v62 = vld [vmem:[%s11788_s28 + $0xed0] sm:$0x3] }
 0x209   : > { %v6067_v30 = vadd.f32 %v6066_v28, %v5997_v14  ;;  %9529 = vmatpush1.xpose.msra.mxu0 %v764_v21  ;;  %9599 = vmatpush1.xpose.msra.mxu1 %v766_v22  ;;  %v1818_v14 = vrot.slane %v291_v60, %v11812_v19  ;;  %v523_v21 = vld [vmem:[%s11788_s28 + $0x6f8] sm:$0xff]  ;;  %v529_v60 = vld [vmem:[%s11788_s28 + $0x728] sm:$0xff] }
 0x20a   : > { %v6068_v31 = vpop.f32.mrf.mxu0  ;;  %v6138_v32 = vpop.f32.mrf.mxu1  ;;  %9530 = vmatprep.subr.mxu0 %v509_v23  ;;  %9600 = vmatprep.subr.mxu1 %v511_v24  ;;  %v1827_v23 = vcombine.high %v1825_v15, %v1825_v15  ;;  %v1828_v24 = vcombine.high %v292_v16, %v292_v16 }
 0x20b   : > { %v6137_v35 = vadd.f32 %v6136_v29, %v6067_v30  ;;  %9564 = vmatprep.mubr.f32.mxu0 %v1775_v25  ;;  %9634 = vmatprep.mubr.f32.mxu1 %v1776_v26  ;;  %v1826_v22 = vcombine.high %v1818_v14, %v1818_v14  ;;  %v520_v30 = vld [vmem:[%s11788_s28 + $0x6e0] sm:$0xff]  ;;  %v522_v31 = vld [vmem:[%s11788_s28 + $0x6f0] sm:$0xff] }
 0x20d   : > { %9531 = vmatpush1.xpose.msra.mxu0 %v508_v33  ;;  %9601 = vmatpush1.xpose.msra.mxu1 %v510_v34  ;;  %v781_v33 = vld [vmem:[%s11788_s28 + $0xf08] sm:$0x3]  ;;  %v783_v34 = vld [vmem:[%s11788_s28 + $0xf18] sm:$0x3] }
 0x20e   : > { %9668 = vmatprep.subr.mxu0 %v769_v36  ;;  %9738 = vmatprep.subr.mxu1 %v771_v37  ;;  %v1842_v36 = vrot.slane %v1828_v24, %v11812_v19  ;;  %v293_v37 = vld [vmem:[%s11781_s30 + $0x1c8] sm:$0xff] }
 0x210   : > { %v6206_v48 = vpop.f32.mrf.mxu0  ;;  %9565 = vmatmul.mubr.f32.vlgmr.msra.gmra.mxu0 %v1767_v17  ;;  %v6276_v49 = vpop.f32.mrf.mxu1  ;;  %9635 = vmatmul.mubr.f32.vlgmr.msra.gmra.mxu1 %v1774_v18  ;;  %v776_v17 = vld [vmem:[%s11788_s28 + $0xee0] sm:$0x3]  ;;  %v778_v18 = vld [vmem:[%s11788_s28 + $0xef0] sm:$0x3] }
 0x211   : > { %v6207_v50 = vadd.f32 %v6206_v48, %v6137_v35  ;;  %9669 = vmatpush1.xpose.msra.mxu0 %v768_v41  ;;  %9739 = vmatpush1.xpose.msra.mxu1 %v770_v42  ;;  %v1835_v35 = vrot.slane %v292_v16, %v11812_v19  ;;  %v527_v41 = vld [vmem:[%s11788_s28 + $0x718] sm:$0xff]  ;;  %v533_v16 = vld [vmem:[%s11788_s28 + $0x748] sm:$0xff] }
 0x212   : > { %v6208_v51 = vpop.f32.mrf.mxu0  ;;  %v6278_v52 = vpop.f32.mrf.mxu1  ;;  %9670 = vmatprep.subr.mxu0 %v513_v43  ;;  %9740 = vmatprep.subr.mxu1 %v515_v44  ;;  %v1844_v43 = vcombine.high %v1842_v36, %v1842_v36  ;;  %v1845_v44 = vcombine.high %v293_v37, %v293_v37 }
 0x213   : > { %v6277_v55 = vadd.f32 %v6276_v49, %v6207_v50  ;;  %9704 = vmatprep.mubr.f32.mxu0 %v1792_v45  ;;  %9774 = vmatprep.mubr.f32.mxu1 %v1793_v46  ;;  %v1843_v42 = vcombine.high %v1835_v35, %v1835_v35  ;;  %v524_v50 = vld [vmem:[%s11788_s28 + $0x700] sm:$0xff]  ;;  %v526_v51 = vld [vmem:[%s11788_s28 + $0x710] sm:$0xff] }
 0x215   : > { %9671 = vmatpush1.xpose.msra.mxu0 %v512_v53  ;;  %9741 = vmatpush1.xpose.msra.mxu1 %v514_v54  ;;  %v785_v53 = vld [vmem:[%s11788_s28 + $0xf28] sm:$0x3]  ;;  %v787_v54 = vld [vmem:[%s11788_s28 + $0xf38] sm:$0x3] }
 0x216   : > { %9808 = vmatprep.subr.mxu0 %v773_v56  ;;  %9878 = vmatprep.subr.mxu1 %v775_v57  ;;  %v1859_v56 = vrot.slane %v1845_v44, %v11812_v19  ;;  %v294_v57 = vld [vmem:[%s11781_s30 + $0x1d0] sm:$0xff] }
 0x218   : > { %v6346_v4 = vpop.f32.mrf.mxu0  ;;  %9705 = vmatmul.mubr.f32.vlgmr.msra.gmra.mxu0 %v1784_v38  ;;  %v6416_v5 = vpop.f32.mrf.mxu1  ;;  %9775 = vmatmul.mubr.f32.vlgmr.msra.gmra.mxu1 %v1791_v39  ;;  %v780_v38 = vld [vmem:[%s11788_s28 + $0xf00] sm:$0x3]  ;;  %v782_v39 = vld [vmem:[%s11788_s28 + $0xf10] sm:$0x3] }
 0x219   : > { %v6347_v6 = vadd.f32 %v6346_v4, %v6277_v55  ;;  %9809 = vmatpush1.xpose.msra.mxu0 %v772_v61  ;;  %9879 = vmatpush1.xpose.msra.mxu1 %v774_v62  ;;  %v1852_v55 = vrot.slane %v293_v37, %v11812_v19  ;;  %v531_v61 = vld [vmem:[%s11788_s28 + $0x738] sm:$0xff]  ;;  %v537_v37 = vld [vmem:[%s11788_s28 + $0x768] sm:$0xff] }
 0x21a   : > { %v6348_v7 = vpop.f32.mrf.mxu0  ;;  %v6418_v8 = vpop.f32.mrf.mxu1  ;;  %9810 = vmatprep.subr.mxu0 %v517_v63  ;;  %9880 = vmatprep.subr.mxu1 %v519_v0  ;;  %v1861_v63 = vcombine.high %v1859_v56, %v1859_v56  ;;  %v1862_v0 = vcombine.high %v294_v57, %v294_v57 }
 0x21b   : > { %v6417_v11 = vadd.f32 %v6416_v5, %v6347_v6  ;;  %9844 = vmatprep.mubr.f32.mxu0 %v1809_v1  ;;  %9914 = vmatprep.mubr.f32.mxu1 %v1810_v2  ;;  %v1860_v62 = vcombine.high %v1852_v55, %v1852_v55  ;;  %v528_v6 = vld [vmem:[%s11788_s28 + $0x720] sm:$0xff]  ;;  %v530_v7 = vld [vmem:[%s11788_s28 + $0x730] sm:$0xff] }
 0x21d   : > { %9811 = vmatpush1.xpose.msra.mxu0 %v516_v9  ;;  %9881 = vmatpush1.xpose.msra.mxu1 %v518_v10  ;;  %v789_v9 = vld [vmem:[%s11788_s28 + $0xf48] sm:$0x3]  ;;  %v791_v10 = vld [vmem:[%s11788_s28 + $0xf58] sm:$0x3] }
 0x21e   : > { %9948 = vmatprep.subr.mxu0 %v777_v12  ;;  %10018 = vmatprep.subr.mxu1 %v779_v13  ;;  %v1876_v12 = vrot.slane %v1862_v0, %v11812_v19  ;;  %v295_v13 = vld [vmem:[%s11781_s30 + $0x1d8] sm:$0xff] }
 0x220   : > { %v6486_v25 = vpop.f32.mrf.mxu0  ;;  %9845 = vmatmul.mubr.f32.vlgmr.msra.gmra.mxu0 %v1801_v58  ;;  %v6556_v26 = vpop.f32.mrf.mxu1  ;;  %9915 = vmatmul.mubr.f32.vlgmr.msra.gmra.mxu1 %v1808_v59  ;;  %v784_v58 = vld [vmem:[%s11788_s28 + $0xf20] sm:$0x3]  ;;  %v786_v59 = vld [vmem:[%s11788_s28 + $0xf30] sm:$0x3] }
 0x221   : > { %v6487_v27 = vadd.f32 %v6486_v25, %v6417_v11  ;;  %9949 = vmatpush1.xpose.msra.mxu0 %v776_v17  ;;  %10019 = vmatpush1.xpose.msra.mxu1 %v778_v18  ;;  %v1869_v11 = vrot.slane %v294_v57, %v11812_v19  ;;  %v535_v17 = vld [vmem:[%s11788_s28 + $0x758] sm:$0xff]  ;;  %v541_v57 = vld [vmem:[%s11788_s28 + $0x788] sm:$0xff] }
 0x222   : > { %v6488_v28 = vpop.f32.mrf.mxu0  ;;  %v6558_v29 = vpop.f32.mrf.mxu1  ;;  %9950 = vmatprep.subr.mxu0 %v521_v20  ;;  %10020 = vmatprep.subr.mxu1 %v523_v21  ;;  %v1878_v20 = vcombine.high %v1876_v12, %v1876_v12  ;;  %v1879_v21 = vcombine.high %v295_v13, %v295_v13 }
 0x223   : > { %v6557_v32 = vadd.f32 %v6556_v26, %v6487_v27  ;;  %9984 = vmatprep.mubr.f32.mxu0 %v1826_v22  ;;  %10054 = vmatprep.mubr.f32.mxu1 %v1827_v23  ;;  %v1877_v18 = vcombine.high %v1869_v11, %v1869_v11  ;;  %v532_v27 = vld [vmem:[%s11788_s28 + $0x740] sm:$0xff]  ;;  %v534_v28 = vld [vmem:[%s11788_s28 + $0x750] sm:$0xff] }
 0x225   : > { %9951 = vmatpush1.xpose.msra.mxu0 %v520_v30  ;;  %10021 = vmatpush1.xpose.msra.mxu1 %v522_v31  ;;  %v793_v30 = vld [vmem:[%s11788_s28 + $0xf68] sm:$0x3]  ;;  %v795_v31 = vld [vmem:[%s11788_s28 + $0xf78] sm:$0x3] }
 0x226   : > { %10088 = vmatprep.subr.mxu0 %v781_v33  ;;  %10158 = vmatprep.subr.mxu1 %v783_v34  ;;  %v1893_v33 = vrot.slane %v1879_v21, %v11812_v19  ;;  %v296_v34 = vld [vmem:[%s11781_s30 + $0x1e0] sm:$0xff] }
 0x228   : > { %v6626_v45 = vpop.f32.mrf.mxu0  ;;  %9985 = vmatmul.mubr.f32.vlgmr.msra.gmra.mxu0 %v1818_v14  ;;  %v6696_v46 = vpop.f32.mrf.mxu1  ;;  %10055 = vmatmul.mubr.f32.vlgmr.msra.gmra.mxu1 %v1825_v15  ;;  %v788_v14 = vld [vmem:[%s11788_s28 + $0xf40] sm:$0x3]  ;;  %v790_v15 = vld [vmem:[%s11788_s28 + $0xf50] sm:$0x3] }
 0x229   : > { %v6627_v47 = vadd.f32 %v6626_v45, %v6557_v32  ;;  %10089 = vmatpush1.xpose.msra.mxu0 %v780_v38  ;;  %10159 = vmatpush1.xpose.msra.mxu1 %v782_v39  ;;  %v1886_v32 = vrot.slane %v295_v13, %v11812_v19  ;;  %v539_v38 = vld [vmem:[%s11788_s28 + $0x778] sm:$0xff]  ;;  %v545_v13 = vld [vmem:[%s11788_s28 + $0x7a8] sm:$0xff] }
 0x22a   : > { %v6628_v48 = vpop.f32.mrf.mxu0  ;;  %v6698_v49 = vpop.f32.mrf.mxu1  ;;  %10090 = vmatprep.subr.mxu0 %v525_v40  ;;  %10160 = vmatprep.subr.mxu1 %v527_v41  ;;  %v1895_v40 = vcombine.high %v1893_v33, %v1893_v33  ;;  %v1896_v41 = vcombine.high %v296_v34, %v296_v34 }
 0x22b   : > { %v6697_v52 = vadd.f32 %v6696_v46, %v6627_v47  ;;  %10124 = vmatprep.mubr.f32.mxu0 %v1843_v42  ;;  %10194 = vmatprep.mubr.f32.mxu1 %v1844_v43  ;;  %v1894_v39 = vcombine.high %v1886_v32, %v1886_v32  ;;  %v536_v47 = vld [vmem:[%s11788_s28 + $0x760] sm:$0xff]  ;;  %v538_v48 = vld [vmem:[%s11788_s28 + $0x770] sm:$0xff] }
 0x22d   : > { %10091 = vmatpush1.xpose.msra.mxu0 %v524_v50  ;;  %10161 = vmatpush1.xpose.msra.mxu1 %v526_v51  ;;  %v797_v50 = vld [vmem:[%s11788_s28 + $0xf88] sm:$0x3]  ;;  %v799_v51 = vld [vmem:[%s11788_s28 + $0xf98] sm:$0x3] }
 0x22e   : > { %10228 = vmatprep.subr.mxu0 %v785_v53  ;;  %10298 = vmatprep.subr.mxu1 %v787_v54  ;;  %v1910_v53 = vrot.slane %v1896_v41, %v11812_v19  ;;  %v297_v54 = vld [vmem:[%s11781_s30 + $0x1e8] sm:$0xff] }
 0x230   : > { %v6766_v1 = vpop.f32.mrf.mxu0  ;;  %10125 = vmatmul.mubr.f32.vlgmr.msra.gmra.mxu0 %v1835_v35  ;;  %v6836_v2 = vpop.f32.mrf.mxu1  ;;  %10195 = vmatmul.mubr.f32.vlgmr.msra.gmra.mxu1 %v1842_v36  ;;  %v792_v35 = vld [vmem:[%s11788_s28 + $0xf60] sm:$0x3]  ;;  %v794_v36 = vld [vmem:[%s11788_s28 + $0xf70] sm:$0x3] }
 0x231   : > { %v6767_v3 = vadd.f32 %v6766_v1, %v6697_v52  ;;  %10229 = vmatpush1.xpose.msra.mxu0 %v784_v58  ;;  %10299 = vmatpush1.xpose.msra.mxu1 %v786_v59  ;;  %v1903_v52 = vrot.slane %v296_v34, %v11812_v19  ;;  %v543_v58 = vld [vmem:[%s11788_s28 + $0x798] sm:$0xff]  ;;  %v549_v34 = vld [vmem:[%s11788_s28 + $0x7c8] sm:$0xff] }
 0x232   : > { %v6768_v4 = vpop.f32.mrf.mxu0  ;;  %v6838_v5 = vpop.f32.mrf.mxu1  ;;  %10230 = vmatprep.subr.mxu0 %v529_v60  ;;  %10300 = vmatprep.subr.mxu1 %v531_v61  ;;  %v1912_v60 = vcombine.high %v1910_v53, %v1910_v53  ;;  %v1913_v61 = vcombine.high %v297_v54, %v297_v54 }
 0x233   : > { %v6837_v8 = vadd.f32 %v6836_v2, %v6767_v3  ;;  %10264 = vmatprep.mubr.f32.mxu0 %v1860_v62  ;;  %10334 = vmatprep.mubr.f32.mxu1 %v1861_v63  ;;  %v1911_v59 = vcombine.high %v1903_v52, %v1903_v52  ;;  %v540_v3 = vld [vmem:[%s11788_s28 + $0x780] sm:$0xff]  ;;  %v542_v4 = vld [vmem:[%s11788_s28 + $0x790] sm:$0xff] }
 0x235   : > { %10231 = vmatpush1.xpose.msra.mxu0 %v528_v6  ;;  %10301 = vmatpush1.xpose.msra.mxu1 %v530_v7  ;;  %v801_v6 = vld [vmem:[%s11788_s28 + $0xfa8] sm:$0x3]  ;;  %v803_v7 = vld [vmem:[%s11788_s28 + $0xfb8] sm:$0x3] }
 0x236   : > { %10368 = vmatprep.subr.mxu0 %v789_v9  ;;  %10438 = vmatprep.subr.mxu1 %v791_v10  ;;  %v1927_v9 = vrot.slane %v1913_v61, %v11812_v19  ;;  %v298_v10 = vld [vmem:[%s11781_s30 + $0x1f0] sm:$0xff]  ;;  %v552_v61 = vld [vmem:[%s11788_s28 + $0x7e0] sm:$0xff] }
 0x238   : > { %v6906_v22 = vpop.f32.mrf.mxu0  ;;  %10265 = vmatmul.mubr.f32.vlgmr.msra.gmra.mxu0 %v1852_v55  ;;  %v6976_v23 = vpop.f32.mrf.mxu1  ;;  %10335 = vmatmul.mubr.f32.vlgmr.msra.gmra.mxu1 %v1859_v56  ;;  %v796_v55 = vld [vmem:[%s11788_s28 + $0xf80] sm:$0x3]  ;;  %v798_v56 = vld [vmem:[%s11788_s28 + $0xf90] sm:$0x3] }
 0x239   : > { %v6907_v24 = vadd.f32 %v6906_v22, %v6837_v8  ;;  %10369 = vmatpush1.xpose.msra.mxu0 %v788_v14  ;;  %10439 = vmatpush1.xpose.msra.mxu1 %v790_v15  ;;  %v1920_v8 = vrot.slane %v297_v54, %v11812_v19  ;;  %v547_v14 = vld [vmem:[%s11788_s28 + $0x7b8] sm:$0xff] }
 0x23a   : > { %v6908_v25 = vpop.f32.mrf.mxu0  ;;  %v6978_v26 = vpop.f32.mrf.mxu1  ;;  %10370 = vmatprep.subr.mxu0 %v533_v16  ;;  %10440 = vmatprep.subr.mxu1 %v535_v17  ;;  %v1929_v16 = vcombine.high %v1927_v9, %v1927_v9  ;;  %v1930_v17 = vcombine.high %v298_v10, %v298_v10  ;;  %v555_v54 = vld [vmem:[%s11788_s28 + $0x7f8] sm:$0xff] }
 0x23b   : > { %v6977_v29 = vadd.f32 %v6976_v23, %v6907_v24  ;;  %10404 = vmatprep.mubr.f32.mxu0 %v1877_v18  ;;  %10474 = vmatprep.mubr.f32.mxu1 %v1878_v20  ;;  %v1928_v15 = vcombine.high %v1920_v8, %v1920_v8  ;;  %v544_v24 = vld [vmem:[%s11788_s28 + $0x7a0] sm:$0xff]  ;;  %v546_v25 = vld [vmem:[%s11788_s28 + $0x7b0] sm:$0xff] }
 0x23d   : > { %10371 = vmatpush1.xpose.msra.mxu0 %v532_v27  ;;  %10441 = vmatpush1.xpose.msra.mxu1 %v534_v28  ;;  %v805_v27 = vld [vmem:[%s11788_s28 + $0xfc8] sm:$0x3]  ;;  %v807_v28 = vld [vmem:[%s11788_s28 + $0xfd8] sm:$0x3] }
 0x23e   : > { %10508 = vmatprep.subr.mxu0 %v793_v30  ;;  %10578 = vmatprep.subr.mxu1 %v795_v31  ;;  %v1944_v30 = vrot.slane %v1930_v17, %v11812_v19  ;;  %v299_v31 = vld [vmem:[%s11781_s30 + $0x1f8] sm:$0xff] }
 0x240   : > { %v7046_v42 = vpop.f32.mrf.mxu0  ;;  %10405 = vmatmul.mubr.f32.vlgmr.msra.gmra.mxu0 %v1869_v11  ;;  %v7116_v43 = vpop.f32.mrf.mxu1  ;;  %10475 = vmatmul.mubr.f32.vlgmr.msra.gmra.mxu1 %v1876_v12  ;;  %v800_v11 = vld [vmem:[%s11788_s28 + $0xfa0] sm:$0x3]  ;;  %v802_v12 = vld [vmem:[%s11788_s28 + $0xfb0] sm:$0x3] }
 0x241   : > { %v7047_v44 = vadd.f32 %v7046_v42, %v6977_v29  ;;  %10509 = vmatpush1.xpose.msra.mxu0 %v792_v35  ;;  %10579 = vmatpush1.xpose.msra.mxu1 %v794_v36  ;;  %v1937_v29 = vrot.slane %v298_v10, %v11812_v19  ;;  %v551_v35 = vld [vmem:[%s11788_s28 + $0x7d8] sm:$0xff] }
 0x242   : > { %v7048_v45 = vpop.f32.mrf.mxu0  ;;  %v7118_v46 = vpop.f32.mrf.mxu1  ;;  %10510 = vmatprep.subr.mxu0 %v537_v37  ;;  %10580 = vmatprep.subr.mxu1 %v539_v38  ;;  %v1946_v37 = vcombine.high %v1944_v30, %v1944_v30  ;;  %v1947_v38 = vcombine.high %v299_v31, %v299_v31 }
 0x243   : > { %v7117_v49 = vadd.f32 %v7116_v43, %v7047_v44  ;;  %10544 = vmatprep.mubr.f32.mxu0 %v1894_v39  ;;  %10614 = vmatprep.mubr.f32.mxu1 %v1895_v40  ;;  %v1945_v36 = vcombine.high %v1937_v29, %v1937_v29  ;;  %v548_v44 = vld [vmem:[%s11788_s28 + $0x7c0] sm:$0xff]  ;;  %v550_v45 = vld [vmem:[%s11788_s28 + $0x7d0] sm:$0xff] }
 0x245   : > { %10511 = vmatpush1.xpose.msra.mxu0 %v536_v47  ;;  %10581 = vmatpush1.xpose.msra.mxu1 %v538_v48  ;;  %v809_v47 = vld [vmem:[%s11788_s28 + $0xfe8] sm:$0x3]  ;;  %v811_v48 = vld [vmem:[%s11788_s28 + $0xff8] sm:$0x3] }
 0x246   : > { %10648 = vmatprep.subr.mxu0 %v797_v50  ;;  %10718 = vmatprep.subr.mxu1 %v799_v51  ;;  %v1961_v50 = vrot.slane %v1947_v38, %v11812_v19  ;;  %v808_v51 = vld [vmem:[%s11788_s28 + $0xfe0] sm:$0x3] }
 0x248   : > { %v7186_v62 = vpop.f32.mrf.mxu0  ;;  %10545 = vmatmul.mubr.f32.vlgmr.msra.gmra.mxu0 %v1886_v32  ;;  %v7256_v63 = vpop.f32.mrf.mxu1  ;;  %10615 = vmatmul.mubr.f32.vlgmr.msra.gmra.mxu1 %v1893_v33  ;;  %v804_v32 = vld [vmem:[%s11788_s28 + $0xfc0] sm:$0x3]  ;;  %v806_v33 = vld [vmem:[%s11788_s28 + $0xfd0] sm:$0x3] }
 0x249   : > { %v7187_v0 = vadd.f32 %v7186_v62, %v7117_v49  ;;  %10649 = vmatpush1.xpose.msra.mxu0 %v796_v55  ;;  %10719 = vmatpush1.xpose.msra.mxu1 %v798_v56  ;;  %v1954_v49 = vrot.slane %v299_v31, %v11812_v19  ;;  %v1963_v56 = vcombine.high %v1961_v50, %v1961_v50  ;;  %v554_v62 = vld [vmem:[%s11788_s28 + $0x7f0] sm:$0xff] }
 0x24a   : > { %v7188_v1 = vpop.f32.mrf.mxu0  ;;  %v7258_v2 = vpop.f32.mrf.mxu1  ;;  %10650 = vmatprep.subr.mxu0 %v541_v57  ;;  %10720 = vmatprep.subr.mxu1 %v543_v58 }
 0x24b   : > { %v7257_v5 = vadd.f32 %v7256_v63, %v7187_v0  ;;  %10684 = vmatprep.mubr.f32.mxu0 %v1911_v59  ;;  %10754 = vmatprep.mubr.f32.mxu1 %v1912_v60  ;;  %v1962_v55 = vcombine.high %v1954_v49, %v1954_v49 }
 0x24d   : > { %10651 = vmatpush1.xpose.msra.mxu0 %v540_v3  ;;  %10721 = vmatpush1.xpose.msra.mxu1 %v542_v4 }
 0x24e   : > { %10788 = vmatprep.subr.mxu0 %v801_v6  ;;  %10858 = vmatprep.subr.mxu1 %v803_v7 }
 0x250   : > { %v7326_v18 = vpop.f32.mrf.mxu0  ;;  %10685 = vmatmul.mubr.f32.vlgmr.msra.gmra.mxu0 %v1903_v52  ;;  %v7396_v20 = vpop.f32.mrf.mxu1  ;;  %10755 = vmatmul.mubr.f32.vlgmr.msra.gmra.mxu1 %v1910_v53  ;;  %v810_v52 = vld [vmem:[%s11788_s28 + $0xff0] sm:$0x3]  ;;  %v553_v53 = vld [vmem:[%s11788_s28 + $0x7e8] sm:$0xff] }
 0x251   : > { %v7327_v21 = vadd.f32 %v7326_v18, %v7257_v5  ;;  %10789 = vmatpush1.xpose.msra.mxu0 %v800_v11  ;;  %10859 = vmatpush1.xpose.msra.mxu1 %v802_v12 }
 0x252   : > { %v7328_v22 = vpop.f32.mrf.mxu0  ;;  %v7398_v23 = vpop.f32.mrf.mxu1  ;;  %10790 = vmatprep.subr.mxu0 %v545_v13  ;;  %10860 = vmatprep.subr.mxu1 %v547_v14 }
 0x253   : > { %v7397_v26 = vadd.f32 %v7396_v20, %v7327_v21  ;;  %10824 = vmatprep.mubr.f32.mxu0 %v1928_v15  ;;  %10894 = vmatprep.mubr.f32.mxu1 %v1929_v16 }
 0x255   : > { %10791 = vmatpush1.xpose.msra.mxu0 %v544_v24  ;;  %10861 = vmatpush1.xpose.msra.mxu1 %v546_v25 }
 0x256   : > { %10928 = vmatprep.subr.mxu0 %v805_v27  ;;  %10998 = vmatprep.subr.mxu1 %v807_v28 }
 0x258   : > { %v7466_v39 = vpop.f32.mrf.mxu0  ;;  %10825 = vmatmul.mubr.f32.vlgmr.msra.gmra.mxu0 %v1920_v8  ;;  %v7536_v40 = vpop.f32.mrf.mxu1  ;;  %10895 = vmatmul.mubr.f32.vlgmr.msra.gmra.mxu1 %v1927_v9 }
 0x259   : > { %v7467_v41 = vadd.f32 %v7466_v39, %v7397_v26  ;;  %10929 = vmatpush1.xpose.msra.mxu0 %v804_v32  ;;  %10999 = vmatpush1.xpose.msra.mxu1 %v806_v33 }
 0x25a   : > { %v7468_v42 = vpop.f32.mrf.mxu0  ;;  %v7538_v43 = vpop.f32.mrf.mxu1  ;;  %10930 = vmatprep.subr.mxu0 %v549_v34  ;;  %11000 = vmatprep.subr.mxu1 %v551_v35 }
 0x25b   : > { %v7537_v46 = vadd.f32 %v7536_v40, %v7467_v41  ;;  %10964 = vmatprep.mubr.f32.mxu0 %v1945_v36  ;;  %11034 = vmatprep.mubr.f32.mxu1 %v1946_v37 }
 0x25d   : > { %10931 = vmatpush1.xpose.msra.mxu0 %v548_v44  ;;  %11001 = vmatpush1.xpose.msra.mxu1 %v550_v45 }
 0x25e   : > { %11068 = vmatprep.subr.mxu0 %v809_v47  ;;  %11138 = vmatprep.subr.mxu1 %v811_v48 }
 0x260   : > { %v7606_v57 = vpop.f32.mrf.mxu0  ;;  %10965 = vmatmul.mubr.f32.vlgmr.msra.gmra.mxu0 %v1937_v29  ;;  %v7676_v58 = vpop.f32.mrf.mxu1  ;;  %11035 = vmatmul.mubr.f32.vlgmr.msra.gmra.mxu1 %v1944_v30 }
 0x261   : > { %v7607_v59 = vadd.f32 %v7606_v57, %v7537_v46  ;;  %11069 = vmatpush1.xpose.msra.mxu0 %v808_v51  ;;  %11139 = vmatpush1.xpose.msra.mxu1 %v810_v52 }
 0x262   : > { %v7608_v19 = vpop.f32.mrf.mxu0  ;;  %v7678_v60 = vpop.f32.mrf.mxu1  ;;  %11070 = vmatprep.subr.mxu0 %v553_v53  ;;  %11140 = vmatprep.subr.mxu1 %v555_v54 }
 0x263   : > { %v7677_v63 = vadd.f32 %v7676_v58, %v7607_v59  ;;  %11104 = vmatprep.mubr.f32.mxu0 %v1962_v55  ;;  %11174 = vmatprep.mubr.f32.mxu1 %v1963_v56 }
 0x265   : > { %11071 = vmatpush1.xpose.msra.mxu0 %v552_v61  ;;  %11141 = vmatpush1.xpose.msra.mxu1 %v554_v62 }
 0x268   : > { %v7746_v0 = vpop.f32.mrf.mxu0  ;;  %11105 = vmatmul.mubr.f32.vlgmr.msra.gmra.mxu0 %v1954_v49  ;;  %11175 = vmatmul.mubr.f32.vlgmr.msra.gmra.mxu1 %v1961_v50  ;;  %v7816_v1 = vpop.f32.mrf.mxu1 }
 0x269   : > { %v7747_v2 = vadd.f32 %v7746_v0, %v7677_v63 }
 0x26a   : > { %v7748_v3 = vpop.f32.mrf.mxu0  ;;  %v7818_v4 = vpop.f32.mrf.mxu1 }
 0x26b   : > { %v7817_v5 = vadd.f32 %v7816_v1, %v7747_v2 }
 0x270   : > { %v7886_v6 = vpop.f32.mrf.mxu0  ;;  %v7956_v7 = vpop.f32.mrf.mxu1 }
 0x271   : > { %v7887_v8 = vadd.f32 %v7886_v6, %v7817_v5 }
 0x272   : > { %v7888_v9 = vpop.f32.mrf.mxu0  ;;  %v7958_v10 = vpop.f32.mrf.mxu1 }
 0x273   : > { %v7957_v11 = vadd.f32 %v7956_v7, %v7887_v8 }
 0x278   : > { %v8026_v12 = vpop.f32.mrf.mxu0  ;;  %v8096_v13 = vpop.f32.mrf.mxu1 }
 0x279   : > { %v8027_v14 = vadd.f32 %v8026_v12, %v7957_v11 }
 0x27a   : > { %v8028_v15 = vpop.f32.mrf.mxu0  ;;  %v8098_v16 = vpop.f32.mrf.mxu1 }
 0x27b   : > { %v8097_v17 = vadd.f32 %v8096_v13, %v8027_v14 }
 0x280   : > { %v8166_v18 = vpop.f32.mrf.mxu0  ;;  %v8236_v20 = vpop.f32.mrf.mxu1 }
 0x281   : > { %v8167_v21 = vadd.f32 %v8166_v18, %v8097_v17 }
 0x282   : > { %v8168_v22 = vpop.f32.mrf.mxu0  ;;  %v8238_v23 = vpop.f32.mrf.mxu1 }
 0x283   : > { %v8237_v24 = vadd.f32 %v8236_v20, %v8167_v21 }
 0x288   : > { %v8306_v25 = vpop.f32.mrf.mxu0  ;;  %v8376_v26 = vpop.f32.mrf.mxu1 }
 0x289   : > { %v8307_v27 = vadd.f32 %v8306_v25, %v8237_v24 }
 0x28a   : > { %v8308_v28 = vpop.f32.mrf.mxu0  ;;  %v8378_v29 = vpop.f32.mrf.mxu1 }
 0x28b   : > { %v8377_v30 = vadd.f32 %v8376_v26, %v8307_v27 }
 0x290   : > { %v8446_v31 = vpop.f32.mrf.mxu0  ;;  %v8516_v32 = vpop.f32.mrf.mxu1 }
 0x291   : > { %v8447_v33 = vadd.f32 %v8446_v31, %v8377_v30 }
 0x292   : > { %v8448_v34 = vpop.f32.mrf.mxu0  ;;  %v8518_v35 = vpop.f32.mrf.mxu1 }
 0x293   : > { %v8517_v36 = vadd.f32 %v8516_v32, %v8447_v33 }
 0x298   : > { %v8586_v37 = vpop.f32.mrf.mxu0  ;;  %v8656_v38 = vpop.f32.mrf.mxu1 }
 0x299   : > { %v8587_v39 = vadd.f32 %v8586_v37, %v8517_v36 }
 0x29a   : > { %v8588_v40 = vpop.f32.mrf.mxu0  ;;  %v8658_v41 = vpop.f32.mrf.mxu1 }
 0x29b   : > { %v8657_v42 = vadd.f32 %v8656_v38, %v8587_v39 }
 0x2a0   : > { %v8726_v43 = vpop.f32.mrf.mxu0  ;;  %v8796_v44 = vpop.f32.mrf.mxu1 }
 0x2a1   : > { %v8727_v45 = vadd.f32 %v8726_v43, %v8657_v42 }
 0x2a2   : > { %v8728_v46 = vpop.f32.mrf.mxu0  ;;  %v8798_v47 = vpop.f32.mrf.mxu1 }
 0x2a3   : > { %v8797_v48 = vadd.f32 %v8796_v44, %v8727_v45 }
 0x2a8   : > { %v8866_v49 = vpop.f32.mrf.mxu0  ;;  %v8936_v50 = vpop.f32.mrf.mxu1 }
 0x2a9   : > { %v8867_v51 = vadd.f32 %v8866_v49, %v8797_v48 }
 0x2aa   : > { %v8868_v52 = vpop.f32.mrf.mxu0  ;;  %v8938_v53 = vpop.f32.mrf.mxu1 }
 0x2ab   : > { %v8937_v54 = vadd.f32 %v8936_v50, %v8867_v51 }
 0x2b0   : > { %v9006_v55 = vpop.f32.mrf.mxu0  ;;  %v9076_v56 = vpop.f32.mrf.mxu1 }
 0x2b1   : > { %v9007_v6 = vadd.f32 %v9006_v55, %v8937_v54 }
 0x2b2   : > { %v9008_v57 = vpop.f32.mrf.mxu0  ;;  %v9078_v58 = vpop.f32.mrf.mxu1 }
 0x2b3   : > { %v9077_v11 = vadd.f32 %v9076_v56, %v9007_v6 }
 0x2b8   : > { %v9146_v59 = vpop.f32.mrf.mxu0  ;;  %v9216_v19 = vpop.f32.mrf.mxu1 }
 0x2b9   : > { %v9147_v12 = vadd.f32 %v9146_v59, %v9077_v11 }
 0x2ba   : > { %v9148_v60 = vpop.f32.mrf.mxu0  ;;  %v9218_v61 = vpop.f32.mrf.mxu1 }
 0x2bb   : > { %v9217_v15 = vadd.f32 %v9216_v19, %v9147_v12 }
 0x2c0   : > { %v9286_v62 = vpop.f32.mrf.mxu0  ;;  %v9356_v63 = vpop.f32.mrf.mxu1 }
 0x2c1   : > { %v9287_v18 = vadd.f32 %v9286_v62, %v9217_v15 }
 0x2c2   : > { %v9288_v0 = vpop.f32.mrf.mxu0  ;;  %v9358_v1 = vpop.f32.mrf.mxu1 }
 0x2c3   : > { %v9357_v20 = vadd.f32 %v9356_v63, %v9287_v18 }
 0x2c8   : > { %v9426_v2 = vpop.f32.mrf.mxu0  ;;  %v9496_v3 = vpop.f32.mrf.mxu1 }
 0x2c9   : > { %v9427_v23 = vadd.f32 %v9426_v2, %v9357_v20  ;;  %v235_v20 = vld [vmem:[#allocation8] sm:$0x3] }
 0x2ca   : > { %v9428_v4 = vpop.f32.mrf.mxu0  ;;  %v9498_v5 = vpop.f32.mrf.mxu1 }
 0x2cb   : > { %v9497_v26 = vadd.f32 %v9496_v3, %v9427_v23 }
 0x2d0   : > { %v9566_v7 = vpop.f32.mrf.mxu0  ;;  %v9636_v8 = vpop.f32.mrf.mxu1 }
 0x2d1   : > { %v9567_v27 = vadd.f32 %v9566_v7, %v9497_v26 }
 0x2d2   : > { %v9568_v9 = vpop.f32.mrf.mxu0  ;;  %v9638_v10 = vpop.f32.mrf.mxu1 }
 0x2d3   : > { %v9637_v32 = vadd.f32 %v9636_v8, %v9567_v27 }
 0x2d8   : > { %v9706_v13 = vpop.f32.mrf.mxu0  ;;  %v9776_v14 = vpop.f32.mrf.mxu1 }
 0x2d9   : > { %v9707_v33 = vadd.f32 %v9706_v13, %v9637_v32 }
 0x2da   : > { %v9708_v16 = vpop.f32.mrf.mxu0  ;;  %v9778_v17 = vpop.f32.mrf.mxu1 }
 0x2db   : > { %v9777_v36 = vadd.f32 %v9776_v14, %v9707_v33 }
 0x2e0   : > { %v9846_v21 = vpop.f32.mrf.mxu0  ;;  %v9916_v22 = vpop.f32.mrf.mxu1 }
 0x2e1   : > { %v9847_v39 = vadd.f32 %v9846_v21, %v9777_v36 }
 0x2e2   : > { %v9848_v24 = vpop.f32.mrf.mxu0  ;;  %v9918_v25 = vpop.f32.mrf.mxu1 }
 0x2e3   : > { %v9917_v40 = vadd.f32 %v9916_v22, %v9847_v39 }
 0x2e8   : > { %v9986_v28 = vpop.f32.mrf.mxu0  ;;  %v10056_v29 = vpop.f32.mrf.mxu1 }
 0x2e9   : > { %v9987_v43 = vadd.f32 %v9986_v28, %v9917_v40 }
 0x2ea   : > { %v9988_v30 = vpop.f32.mrf.mxu0  ;;  %v10058_v31 = vpop.f32.mrf.mxu1 }
 0x2eb   : > { %v10057_v46 = vadd.f32 %v10056_v29, %v9987_v43 }
 0x2f0   : > { %v10126_v34 = vpop.f32.mrf.mxu0  ;;  %v10196_v35 = vpop.f32.mrf.mxu1 }
 0x2f1   : > { %v10127_v47 = vadd.f32 %v10126_v34, %v10057_v46 }
 0x2f2   : > { %v10128_v37 = vpop.f32.mrf.mxu0  ;;  %v10198_v38 = vpop.f32.mrf.mxu1 }
 0x2f3   : > { %v10197_v52 = vadd.f32 %v10196_v35, %v10127_v47 }
 0x2f8   : > { %v10266_v41 = vpop.f32.mrf.mxu0  ;;  %v10336_v42 = vpop.f32.mrf.mxu1 }
 0x2f9   : > { %v10267_v53 = vadd.f32 %v10266_v41, %v10197_v52 }
 0x2fa   : > { %v10268_v44 = vpop.f32.mrf.mxu0  ;;  %v10338_v45 = vpop.f32.mrf.mxu1 }
 0x2fb   : > { %v10337_v56 = vadd.f32 %v10336_v42, %v10267_v53 }
 0x300   : > { %v10406_v48 = vpop.f32.mrf.mxu0  ;;  %v10476_v49 = vpop.f32.mrf.mxu1 }
 0x301   : > { %v10407_v59 = vadd.f32 %v10406_v48, %v10337_v56 }
 0x302   : > { %v10408_v50 = vpop.f32.mrf.mxu0  ;;  %v10478_v51 = vpop.f32.mrf.mxu1 }
 0x303   : > { %v10477_v19 = vadd.f32 %v10476_v49, %v10407_v59 }
 0x308   : > { %v10546_v54 = vpop.f32.mrf.mxu0  ;;  %v10616_v55 = vpop.f32.mrf.mxu1 }
 0x309   : > { %v10547_v62 = vadd.f32 %v10546_v54, %v10477_v19 }
 0x30a   : > { %v10548_v57 = vpop.f32.mrf.mxu0  ;;  %v10618_v58 = vpop.f32.mrf.mxu1 }
 0x30b   : > { %v10617_v1 = vadd.f32 %v10616_v55, %v10547_v62 }
 0x310   : > { %v10686_v60 = vpop.f32.mrf.mxu0  ;;  %v10756_v61 = vpop.f32.mrf.mxu1 }
 0x311   : > { %v10687_v2 = vadd.f32 %v10686_v60, %v10617_v1 }
 0x312   : > { %v10688_v63 = vpop.f32.mrf.mxu0  ;;  %v10758_v0 = vpop.f32.mrf.mxu1 }
 0x313   : > { %v10757_v7 = vadd.f32 %v10756_v61, %v10687_v2 }
 0x318   : > { %v10826_v3 = vpop.f32.mrf.mxu0  ;;  %v10896_v4 = vpop.f32.mrf.mxu1 }
 0x319   : > { %v10827_v8 = vadd.f32 %v10826_v3, %v10757_v7 }
 0x31a   : > { %v10828_v5 = vpop.f32.mrf.mxu0  ;;  %v10898_v6 = vpop.f32.mrf.mxu1 }
 0x31b   : > { %v10897_v11 = vadd.f32 %v10896_v4, %v10827_v8 }
 0x320   : > { %v10966_v9 = vpop.f32.mrf.mxu0  ;;  %v11036_v10 = vpop.f32.mrf.mxu1 }
 0x321   : > { %v10967_v14 = vadd.f32 %v10966_v9, %v10897_v11 }
 0x322   : > { %v10968_v12 = vpop.f32.mrf.mxu0  ;;  %v11038_v13 = vpop.f32.mrf.mxu1 }
 0x323   : > { %v11037_v15 = vadd.f32 %v11036_v10, %v10967_v14 }
 0x328   : > { %v11106_v16 = vpop.f32.mrf.mxu0  ;;  %v11176_v17 = vpop.f32.mrf.mxu1 }
 0x329   : > { %v11107_v18 = vadd.f32 %v11106_v16, %v11037_v15 }
 0x32a   : > { %v11108_v21 = vpop.f32.mrf.mxu0  ;;  %v11178_v22 = vpop.f32.mrf.mxu1 }
 0x32b   : > { %v11177_v23 = vadd.f32 %v11176_v17, %v11107_v18  ;;  %11186 = sbr.rel (%p11301_p1) target bundleno = 826 (0x33a), region = 52 }
 0x32d   : > { %v11180_v24 = vadd.f32 %v11177_v23, %v235_v20 }
 0x32f   : > { %11182 = vst.msk [vmem:[#allocation8] sm:$0x3] %vm11181_vm1, %v11180_v24 }
 0x330   : > { %v11302_v26 = vld [vmem:[#allocation7] ss:$0 sm:$0xff] }
 0x336   : > { %v11187_v25 = vld [vmem:[#allocation8] sm:$0x3] }
 0x337   : > { %v11195_v27 = vadd.f32 %v11302_v26, %v11187_v25 }
 0x339   : > { %11196 = vst.msk [vmem:[#allocation8] sm:$0x3] %vm11181_vm1, %v11195_v27 }
 0x33a PF: > { %p11335_p6 = scmp.eq.s32.totalorder %s11642_s16, 5  ;;  %s11602_s21 = smov [#allocation8]  }
 0x33b   : > { %s11204_s22 = sshll.u32 %s11602_s21, 4  ;;  %s11205_s22 = int_to_ptr.vmem [resolvable:$true] %s11204_s22 }
 0x33c   : > { %s11522_s29 = scalar_lea.vmem %s11205_s22, 32  ;;  %p11529_p0 = scmp.lt.s32.totalorder %s11205_s22, %s11205_s22 }
 0x33d   : > { %p11523_p9 = scmp.ne.s32.totalorder %s11205_s22, %s11522_s29  ;;  %p11530_p12 = scmp.lt.s32.totalorder %s11522_s29, %s11522_s29 }
 0x33f   : > { %p11524_p7 = pnand %p11523_p9, %p11335_p6  ;;  %p11531_p3 = por %p11530_p12, %p11529_p0 }
 0x341   : > { %p11525_p11 = pneg %p11524_p7 }
 0x343   : > { %p11532_p4 = pnand %p11531_p3, %p11525_p11 }
 0x345   : > { %11535 = shalt.err (!%p11532_p4)
}
 0x346   : > { %11318 = dma.vmem_to_hbm [thread:$0]  (%p11335_p6), %s11205_s22, 32, %s12535_s3, [#allocation4]  }
 0x347   : > { %11575 = dma.done.wait (%p11335_p6), [#allocation4], 32  }
 0x348   : > { %11577 = vsyncadd (%p11335_p6), [#allocation4], 4294967264 }
 0x349 PF: > { %p17_p5 = scmp.ge.s32.totalorder %s11645_s17, 8   ;;  %s12548_s12 = smov %s11584_s13 }
 0x34a   : > { %s12549_s13 = smov %s11588_s14  ;;  %s12550_s14 = smov %s11655_s20 }
 0x34b   : > { %s12551_s15 = smov %s11645_s17  ;;  %19 = sbr.rel (!%p17_p5) target bundleno = 6 (0x6), region = 94 }
 0x350   :  { %11217 = vsyncpa [#allocation3], 1 }
 0x351   :  { %11219 = vsyncpa [#allocation3 + $0x1], 1 }
 0x352   :  { %11220 = vsyncpa [#allocation6], 1 }
 0x353   :  { %11222 = vsyncpa [#allocation6 + $0x1], 1 }
 0x354   :  { %11223 = vsyncpa [#allocation4], 1 }
 0x355   :  { %11225 = vsyncpa [#allocation4 + $0x1], 1 }

</bundles_post_ra>
